<compile_context>
chip_gen: v5e
topology: v5e:2x2
jax: 0.10.0
libtpu: 0.0.40
codegen_flags: <defaults>
</compile_context>

<pallas_src>
import jax
import jax.numpy as jnp
from jax.experimental import pallas as pl
from jax.experimental.pallas import tpu as pltpu


# ============================================================================
# Kernel 1: fused conv1 -> conv2 -> conv3, one batch element per grid step.
# ============================================================================
def _fused_l123_kernel(x_ref, b1e_ref, w1_ref, w2_ref, b2_ref, w3_ref, b3_ref,
                       o_ref):
    w1 = w1_ref[...]                       # (4*nc, 32) bf16
    b1e = b1e_ref[0]                       # (1, 32) f32: b1 + v-contribution

    # conv1 (k=2) + conv2 (k=2), interleaved over conv2's 4 patch offsets so
    # the conv1 activation never grows beyond a (256, 32) tile.
    acc2 = jnp.zeros((256, 64), jnp.float32)
    for j in range(4):                                       # j = 2*dh1 + dw1
        xj = x_ref[0, j * 256:(j + 1) * 256, :].astype(jnp.bfloat16)
        a1 = jnp.dot(xj, w1, preferred_element_type=jnp.float32)      # (256, 32)
        a1 = jnp.maximum(a1 + b1e, 0.0).astype(jnp.bfloat16)
        acc2 = acc2 + jnp.dot(a1, w2_ref[j * 32:(j + 1) * 32, :],
                              preferred_element_type=jnp.float32)
    a2 = jnp.maximum(acc2 + b2_ref[...], 0.0).astype(jnp.bfloat16)     # (256, 64)

    # conv3 (k=2): sum of 4 contiguous row-block matmuls.
    acc3 = jnp.zeros((64, 128), jnp.float32)
    for j in range(4):                                       # j = 2*dh2 + dw2
        acc3 = acc3 + jnp.dot(a2[j * 64:(j + 1) * 64, :],
                              w3_ref[j * 64:(j + 1) * 64, :],
                              preferred_element_type=jnp.float32)
    # rows of o are (8*h3 + w3) -> row-major flatten == conv4 (kh, kw, cin) order
    o_ref[0] = jnp.maximum(acc3 + b3_ref[...], 0.0).astype(o_ref.dtype)  # (64,128) bf16


# ============================================================================
# Kernel 2: conv4 (8x8, stride 8)  ==  relu((B, 8192) @ (8192, 256) + b).
# grid = (2 output-column halves ["parallel" -> both cores], 2 K-chunks
# ["arbitrary" -> accumulate; pipelines the 1 MiB weight-block DMA behind MXU]).
# ============================================================================
def _conv4_kernel(a_ref, w4_ref, b4_ref, o_ref):
    k = pl.program_id(1)

    @pl.when(k == 0)
    def _():
        o_ref[...] = jnp.broadcast_to(b4_ref[...], o_ref.shape)

    o_ref[...] += jnp.dot(a_ref[...], w4_ref[...],
                          preferred_element_type=jnp.float32)

    @pl.when(k == pl.num_programs(1) - 1)
    def _():
        o_ref[...] = jnp.maximum(o_ref[...], 0.0)


# ============================================================================
# One-time weight pre-packing (runs eagerly, OUTSIDE the jitted forward).
# ============================================================================
def _conv_as_matrix(w):
    """PyTorch OIHW (Cout,Cin,kh,kw) -> (kh*kw*Cin, Cout), (kh, kw, cin) order."""
    cout, cin, kh, kw = w.shape
    return jnp.transpose(w, (2, 3, 1, 0)).reshape(kh * kw * cin, cout)


def prepack_params(params, nc, nc_query):
    """params = [(w_oihw, b, k), ...]  ->  dict of matmul-ready weights.

    conv1 is split: the x-channels become a (4*nc, 32) bf16 matmul weight; the
    v-channels (spatially constant input) are pre-summed over the 2x2 kernel
    into a (nc_query, 32) f32 matrix used to build an effective conv1 bias.
    """
    (w1, b1, _), (w2, b2, _), (w3, b3, _), (w4, b4, _) = params
    w1x = _conv_as_matrix(w1[:, nc_query:, :, :]).astype(jnp.bfloat16)       # (4*nc, 32)
    w1v = jnp.sum(w1[:, :nc_query, :, :], axis=(2, 3)).T.astype(jnp.float32)  # (ncq, 32)
    return {
        "w1x": w1x, "w1v": w1v, "b1": b1.astype(jnp.float32),
        "w2": _conv_as_matrix(w2).astype(jnp.bfloat16),
        "b2": b2.reshape(1, -1).astype(jnp.float32),
        "w3": _conv_as_matrix(w3).astype(jnp.bfloat16),
        "b3": b3.reshape(1, -1).astype(jnp.float32),
        "w4": _conv_as_matrix(w4).astype(jnp.bfloat16),   # (8192, 256)
        "b4": b4.reshape(1, -1).astype(jnp.float32),
    }


# ============================================================================
# Input glue: hierarchical patch extraction of x only (pure layout transpose).
# ============================================================================
def _extract_hier_patches_nchw(x):
    """NCHW (B,C,64,64) -> (B, 1024, 4*C).

    row = (2*dh1+dw1)*256 + (2*dh2+dw2)*64 + 8*h3 + w3
    col = (2*dh0+dw0)*C + c          (matches conv1 weight row order)
    """
    B, C, H, W = x.shape
    assert H == 64 and W == 64, "Pyramid is defined for 64x64 inputs"
    t = x.reshape(B, C, 8, 2, 2, 2, 8, 2, 2, 2)
    #              b  c h3 dh2 dh1 dh0 w3 dw2 dw1 dw0
    t = t.transpose(0, 4, 8, 3, 7, 2, 6, 5, 9, 1)
    #              b dh1 dw1 dh2 dw2 h3 w3 dh0 dw0 c
    return t.reshape(B, 1024, 4 * C)


# ============================================================================
# Pyramid forward (Pallas-backed, 2 pallas_calls total).
# ============================================================================
@jax.jit
def pyramid_forward(x_nchw, v, packed):
    B = x_nchw.shape[0]
    nc = x_nchw.shape[1]
    Kx = 4 * nc

    # conv1 bias folded with the (spatially constant) query-vector contribution.
    b1e = (jnp.dot(v.astype(jnp.float32), packed["w1v"])
           + packed["b1"]).reshape(B, 1, 32)

    x1 = _extract_hier_patches_nchw(x_nchw)                  # (B, 1024, 4*nc)

    a3 = pl.pallas_call(
        _fused_l123_kernel,
        out_shape=jax.ShapeDtypeStruct((B, 64, 128), jnp.bfloat16),
        grid=(B,),
        in_specs=[
            pl.BlockSpec((1, 1024, Kx), lambda b: (b, 0, 0)),   # x patches (per batch)
            pl.BlockSpec((1, 1, 32), lambda b: (b, 0, 0)),      # effective conv1 bias
            pl.BlockSpec((Kx, 32), lambda b: (0, 0)),           # w1 (x part, bf16)
            pl.BlockSpec((128, 64), lambda b: (0, 0)),          # w2 (bf16)
            pl.BlockSpec((1, 64), lambda b: (0, 0)),            # b2
            pl.BlockSpec((256, 128), lambda b: (0, 0)),         # w3 (bf16)
            pl.BlockSpec((1, 128), lambda b: (0, 0)),           # b3
        ],
        out_specs=pl.BlockSpec((1, 64, 128), lambda b: (b, 0, 0)),
        compiler_params=pltpu.CompilerParams(
            dimension_semantics=("parallel",)),
    )(x1, b1e, packed["w1x"], packed["w2"], packed["b2"],
      packed["w3"], packed["b3"])

    a3_flat = a3.reshape(B, 64 * 128)     # row-major flatten; matches w4 row order

    KC = 2                                # K-chunks (pipeline weight DMA vs MXU)
    kchunk = (64 * 128) // KC             # 4096 rows per chunk (1 MiB bf16)
    y = pl.pallas_call(
        _conv4_kernel,
        out_shape=jax.ShapeDtypeStruct((B, 256), jnp.float32),
        grid=(2, KC),                     # (output-column halves, K chunks)
        in_specs=[
            pl.BlockSpec((B, kchunk), lambda j, k: (0, k)),      # conv4 input chunk
            pl.BlockSpec((kchunk, 128), lambda j, k: (k, j)),    # w4 block (bf16)
            pl.BlockSpec((1, 128), lambda j, k: (0, j)),         # b4 block
        ],
        out_specs=pl.BlockSpec((B, 128), lambda j, k: (0, j)),
        compiler_params=pltpu.CompilerParams(
            dimension_semantics=("parallel", "arbitrary")),
    )(a3_flat, packed["w4"], packed["b4"])

    return y.reshape(B, 256, 1, 1)


# ============================================================================
# Pure-JAX reference (lax.conv, full f32) for correctness checking.
# ============================================================================
def pyramid_reference(x_nchw, v, params):
    B = x_nchw.shape[0]
    nc_query = v.shape[-1]
    v_img = jnp.broadcast_to(v[:, :, None, None], (B, nc_query, 64, 64))
    h = jnp.concatenate([v_img, x_nchw], axis=1)
    for (w, b, k) in params:
        h = jax.lax.conv_general_dilated(
            h, w, window_strides=(k, k), padding="VALID",
            dimension_numbers=("NCHW", "OIHW", "NCHW"))
        h = jax.nn.relu(h + b[None, :, None, None])
    return h


# ============================================================================
# Deterministic parameter init (shapes from Pyramid.__init__).
# ============================================================================
def init_params(key, nc, nc_query):
    layer_defs = [
        (nc + nc_query, 32, 2),
        (32, 64, 2),
        (64, 128, 2),
        (128, 256, 8),
    ]
    params = []
    for (cin, cout, k) in layer_defs:
        key, kw_key, kb_key = jax.random.split(key, 3)
        fan_in = cin * k * k
        bound = 1.0 / jnp.sqrt(jnp.float32(fan_in))
        w = jax.random.uniform(kw_key, (cout, cin, k, k),
                               minval=-bound, maxval=bound, dtype=jnp.float32)
        b = jax.random.uniform(kb_key, (cout,),
                               minval=-bound, maxval=bound, dtype=jnp.float32)
        params.append((w, b, k))
    return params


if __name__ == "__main__":
    nc, nc_query, B = 3, 7, 2          # spatial size fixed at 64 by the module
    key = jax.random.PRNGKey(0)
    kx, kv, kp = jax.random.split(key, 3)

    x = jax.random.normal(kx, (B, nc, 64, 64), dtype=jnp.float32)
    v = jax.random.normal(kv, (B, nc_query), dtype=jnp.float32)
    params = init_params(kp, nc, nc_query)
    packed = prepack_params(params, nc, nc_query)   # one-time, outside the jit

    out = jax.block_until_ready(pyramid_forward(x, v, packed))
    ref = jax.block_until_ready(pyramid_reference(x, v, params))

    assert out.shape == (B, 256, 1, 1), out.shape
    # bf16 weight/activation storage vs. f32 reference -> loosened tolerance.
    max_err = float(jnp.max(jnp.abs(out - ref)))
    assert jnp.allclose(out, ref, atol=2e-2, rtol=2e-2), max_err

    print("KERNEL_OK")
</pallas_src>

<mosaic_0001>
module attributes {stable_mosaic.version = 11 : i64} {
  func.func @_fused_l123_kernel(%arg0: i32, %arg1: memref<1x1024x12xf32, #tpu.memory_space<vmem>>, %arg2: memref<1x1x32xf32, #tpu.memory_space<vmem>>, %arg3: memref<12x32xbf16, #tpu.memory_space<vmem>>, %arg4: memref<128x64xbf16, #tpu.memory_space<vmem>>, %arg5: memref<1x64xf32, #tpu.memory_space<vmem>>, %arg6: memref<256x128xbf16, #tpu.memory_space<vmem>>, %arg7: memref<1x128xf32, #tpu.memory_space<vmem>>, %arg8: memref<1x64x128xbf16, #tpu.memory_space<vmem>>) attributes {dimension_semantics = [#tpu.dimension_semantics<parallel>], iteration_bounds = array<i64: 2>, scalar_prefetch = 0 : i64, scratch_operands = 0 : i64, tpu.core_type = #tpu.core_type<tc>, window_params = [{transform_indices = @transform_0, window_bounds = array<i64: 1, 1024, 12>}, {transform_indices = @transform_1, window_bounds = array<i64: 1, 1, 32>}, {pipeline_mode = #tpu.pipeline_mode<synchronous>, transform_indices = @transform_2, window_bounds = array<i64: 12, 32>}, {pipeline_mode = #tpu.pipeline_mode<synchronous>, transform_indices = @transform_3, window_bounds = array<i64: 128, 64>}, {pipeline_mode = #tpu.pipeline_mode<synchronous>, transform_indices = @transform_4, window_bounds = array<i64: 1, 64>}, {pipeline_mode = #tpu.pipeline_mode<synchronous>, transform_indices = @transform_5, window_bounds = array<i64: 256, 128>}, {pipeline_mode = #tpu.pipeline_mode<synchronous>, transform_indices = @transform_6, window_bounds = array<i64: 1, 128>}, {transform_indices = @transform_7, window_bounds = array<i64: 1, 64, 128>}]} {
    %c0 = arith.constant 0 : index
    %c0_0 = arith.constant 0 : index
    %0 = vector.load %arg3[%c0, %c0_0] : memref<12x32xbf16, #tpu.memory_space<vmem>>, vector<12x32xbf16>
    %c0_1 = arith.constant 0 : index
    %c0_2 = arith.constant 0 : index
    %c0_3 = arith.constant 0 : index
    %1 = vector.load %arg2[%c0_1, %c0_2, %c0_3] : memref<1x1x32xf32, #tpu.memory_space<vmem>>, vector<1x1x32xf32>
    %2 = vector.shape_cast %1 : vector<1x1x32xf32> to vector<1x32xf32>
    %cst = arith.constant 0.000000e+00 : f32
    %3 = vector.broadcast %cst : f32 to vector<256x64xf32>
    %c0_4 = arith.constant 0 : index
    %c0_5 = arith.constant 0 : index
    %c0_6 = arith.constant 0 : index
    %4 = vector.load %arg1[%c0_4, %c0_5, %c0_6] : memref<1x1024x12xf32, #tpu.memory_space<vmem>>, vector<1x256x12xf32>
    %5 = vector.shape_cast %4 : vector<1x256x12xf32> to vector<256x12xf32>
    %6 = arith.truncf %5 : vector<256x12xf32> to vector<256x12xbf16>
    %cst_7 = arith.constant dense<0.000000e+00> : vector<256x32xf32>
    %7 = tpu.matmul %6, %0, %cst_7 {dimension_numbers = #tpu.dot_dimension_numbers<[1], [0], [0], [1], [0, 0, 1, 1], [], []>} : vector<256x12xbf16>, vector<12x32xbf16>, vector<256x32xf32> -> vector<256x32xf32>
    %8 = vector.broadcast %2 : vector<1x32xf32> to vector<256x32xf32>
    %9 = arith.addf %7, %8 : vector<256x32xf32>
    %cst_8 = arith.constant 0.000000e+00 : f32
    %10 = vector.broadcast %cst_8 : f32 to vector<256x32xf32>
    %11 = arith.maximumf %9, %10 : vector<256x32xf32>
    %12 = arith.truncf %11 : vector<256x32xf32> to vector<256x32xbf16>
    %c0_9 = arith.constant 0 : index
    %c0_10 = arith.constant 0 : index
    %13 = vector.load %arg4[%c0_9, %c0_10] : memref<128x64xbf16, #tpu.memory_space<vmem>>, vector<32x64xbf16>
    %cst_11 = arith.constant dense<0.000000e+00> : vector<256x64xf32>
    %14 = tpu.matmul %12, %13, %cst_11 {dimension_numbers = #tpu.dot_dimension_numbers<[1], [0], [0], [1], [0, 0, 1, 1], [], []>} : vector<256x32xbf16>, vector<32x64xbf16>, vector<256x64xf32> -> vector<256x64xf32>
    %15 = arith.addf %3, %14 : vector<256x64xf32>
    %c0_12 = arith.constant 0 : index
    %c256 = arith.constant 256 : index
    %c0_13 = arith.constant 0 : index
    %16 = vector.load %arg1[%c0_12, %c256, %c0_13] : memref<1x1024x12xf32, #tpu.memory_space<vmem>>, vector<1x256x12xf32>
    %17 = vector.shape_cast %16 : vector<1x256x12xf32> to vector<256x12xf32>
    %18 = arith.truncf %17 : vector<256x12xf32> to vector<256x12xbf16>
    %cst_14 = arith.constant dense<0.000000e+00> : vector<256x32xf32>
    %19 = tpu.matmul %18, %0, %cst_14 {dimension_numbers = #tpu.dot_dimension_numbers<[1], [0], [0], [1], [0, 0, 1, 1], [], []>} : vector<256x12xbf16>, vector<12x32xbf16>, vector<256x32xf32> -> vector<256x32xf32>
    %20 = vector.broadcast %2 : vector<1x32xf32> to vector<256x32xf32>
    %21 = arith.addf %19, %20 : vector<256x32xf32>
    %cst_15 = arith.constant 0.000000e+00 : f32
    %22 = vector.broadcast %cst_15 : f32 to vector<256x32xf32>
    %23 = arith.maximumf %21, %22 : vector<256x32xf32>
    %24 = arith.truncf %23 : vector<256x32xf32> to vector<256x32xbf16>
    %c32 = arith.constant 32 : index
    %c0_16 = arith.constant 0 : index
    %25 = vector.load %arg4[%c32, %c0_16] : memref<128x64xbf16, #tpu.memory_space<vmem>>, vector<32x64xbf16>
    %cst_17 = arith.constant dense<0.000000e+00> : vector<256x64xf32>
    %26 = tpu.matmul %24, %25, %cst_17 {dimension_numbers = #tpu.dot_dimension_numbers<[1], [0], [0], [1], [0, 0, 1, 1], [], []>} : vector<256x32xbf16>, vector<32x64xbf16>, vector<256x64xf32> -> vector<256x64xf32>
    %27 = arith.addf %15, %26 : vector<256x64xf32>
    %c0_18 = arith.constant 0 : index
    %c512 = arith.constant 512 : index
    %c0_19 = arith.constant 0 : index
    %28 = vector.load %arg1[%c0_18, %c512, %c0_19] : memref<1x1024x12xf32, #tpu.memory_space<vmem>>, vector<1x256x12xf32>
    %29 = vector.shape_cast %28 : vector<1x256x12xf32> to vector<256x12xf32>
    %30 = arith.truncf %29 : vector<256x12xf32> to vector<256x12xbf16>
    %cst_20 = arith.constant dense<0.000000e+00> : vector<256x32xf32>
    %31 = tpu.matmul %30, %0, %cst_20 {dimension_numbers = #tpu.dot_dimension_numbers<[1], [0], [0], [1], [0, 0, 1, 1], [], []>} : vector<256x12xbf16>, vector<12x32xbf16>, vector<256x32xf32> -> vector<256x32xf32>
    %32 = vector.broadcast %2 : vector<1x32xf32> to vector<256x32xf32>
    %33 = arith.addf %31, %32 : vector<256x32xf32>
    %cst_21 = arith.constant 0.000000e+00 : f32
    %34 = vector.broadcast %cst_21 : f32 to vector<256x32xf32>
    %35 = arith.maximumf %33, %34 : vector<256x32xf32>
    %36 = arith.truncf %35 : vector<256x32xf32> to vector<256x32xbf16>
    %c64 = arith.constant 64 : index
    %c0_22 = arith.constant 0 : index
    %37 = vector.load %arg4[%c64, %c0_22] : memref<128x64xbf16, #tpu.memory_space<vmem>>, vector<32x64xbf16>
    %cst_23 = arith.constant dense<0.000000e+00> : vector<256x64xf32>
    %38 = tpu.matmul %36, %37, %cst_23 {dimension_numbers = #tpu.dot_dimension_numbers<[1], [0], [0], [1], [0, 0, 1, 1], [], []>} : vector<256x32xbf16>, vector<32x64xbf16>, vector<256x64xf32> -> vector<256x64xf32>
    %39 = arith.addf %27, %38 : vector<256x64xf32>
    %c0_24 = arith.constant 0 : index
    %c768 = arith.constant 768 : index
    %c0_25 = arith.constant 0 : index
    %40 = vector.load %arg1[%c0_24, %c768, %c0_25] : memref<1x1024x12xf32, #tpu.memory_space<vmem>>, vector<1x256x12xf32>
    %41 = vector.shape_cast %40 : vector<1x256x12xf32> to vector<256x12xf32>
    %42 = arith.truncf %41 : vector<256x12xf32> to vector<256x12xbf16>
    %cst_26 = arith.constant dense<0.000000e+00> : vector<256x32xf32>
    %43 = tpu.matmul %42, %0, %cst_26 {dimension_numbers = #tpu.dot_dimension_numbers<[1], [0], [0], [1], [0, 0, 1, 1], [], []>} : vector<256x12xbf16>, vector<12x32xbf16>, vector<256x32xf32> -> vector<256x32xf32>
    %44 = vector.broadcast %2 : vector<1x32xf32> to vector<256x32xf32>
    %45 = arith.addf %43, %44 : vector<256x32xf32>
    %cst_27 = arith.constant 0.000000e+00 : f32
    %46 = vector.broadcast %cst_27 : f32 to vector<256x32xf32>
    %47 = arith.maximumf %45, %46 : vector<256x32xf32>
    %48 = arith.truncf %47 : vector<256x32xf32> to vector<256x32xbf16>
    %c96 = arith.constant 96 : index
    %c0_28 = arith.constant 0 : index
    %49 = vector.load %arg4[%c96, %c0_28] : memref<128x64xbf16, #tpu.memory_space<vmem>>, vector<32x64xbf16>
    %cst_29 = arith.constant dense<0.000000e+00> : vector<256x64xf32>
    %50 = tpu.matmul %48, %49, %cst_29 {dimension_numbers = #tpu.dot_dimension_numbers<[1], [0], [0], [1], [0, 0, 1, 1], [], []>} : vector<256x32xbf16>, vector<32x64xbf16>, vector<256x64xf32> -> vector<256x64xf32>
    %51 = arith.addf %39, %50 : vector<256x64xf32>
    %c0_30 = arith.constant 0 : index
    %c0_31 = arith.constant 0 : index
    %52 = vector.load %arg5[%c0_30, %c0_31] : memref<1x64xf32, #tpu.memory_space<vmem>>, vector<1x64xf32>
    %53 = vector.broadcast %52 : vector<1x64xf32> to vector<256x64xf32>
    %54 = arith.addf %51, %53 : vector<256x64xf32>
    %cst_32 = arith.constant 0.000000e+00 : f32
    %55 = vector.broadcast %cst_32 : f32 to vector<256x64xf32>
    %56 = arith.maximumf %54, %55 : vector<256x64xf32>
    %57 = arith.truncf %56 : vector<256x64xf32> to vector<256x64xbf16>
    %cst_33 = arith.constant 0.000000e+00 : f32
    %58 = vector.broadcast %cst_33 : f32 to vector<64x128xf32>
    %59 = vector.extract_strided_slice %57 {offsets = [0, 0], sizes = [64, 64], strides = [1, 1]} : vector<256x64xbf16> to vector<64x64xbf16>
    %c0_34 = arith.constant 0 : index
    %c0_35 = arith.constant 0 : index
    %60 = vector.load %arg6[%c0_34, %c0_35] : memref<256x128xbf16, #tpu.memory_space<vmem>>, vector<64x128xbf16>
    %cst_36 = arith.constant dense<0.000000e+00> : vector<64x128xf32>
    %61 = tpu.matmul %59, %60, %cst_36 {dimension_numbers = #tpu.dot_dimension_numbers<[1], [0], [0], [1], [0, 0, 1, 1], [], []>} : vector<64x64xbf16>, vector<64x128xbf16>, vector<64x128xf32> -> vector<64x128xf32>
    %62 = arith.addf %58, %61 : vector<64x128xf32>
    %63 = vector.extract_strided_slice %57 {offsets = [64, 0], sizes = [64, 64], strides = [1, 1]} : vector<256x64xbf16> to vector<64x64xbf16>
    %c64_37 = arith.constant 64 : index
    %c0_38 = arith.constant 0 : index
    %64 = vector.load %arg6[%c64_37, %c0_38] : memref<256x128xbf16, #tpu.memory_space<vmem>>, vector<64x128xbf16>
    %cst_39 = arith.constant dense<0.000000e+00> : vector<64x128xf32>
    %65 = tpu.matmul %63, %64, %cst_39 {dimension_numbers = #tpu.dot_dimension_numbers<[1], [0], [0], [1], [0, 0, 1, 1], [], []>} : vector<64x64xbf16>, vector<64x128xbf16>, vector<64x128xf32> -> vector<64x128xf32>
    %66 = arith.addf %62, %65 : vector<64x128xf32>
    %67 = vector.extract_strided_slice %57 {offsets = [128, 0], sizes = [64, 64], strides = [1, 1]} : vector<256x64xbf16> to vector<64x64xbf16>
    %c128 = arith.constant 128 : index
    %c0_40 = arith.constant 0 : index
    %68 = vector.load %arg6[%c128, %c0_40] : memref<256x128xbf16, #tpu.memory_space<vmem>>, vector<64x128xbf16>
    %cst_41 = arith.constant dense<0.000000e+00> : vector<64x128xf32>
    %69 = tpu.matmul %67, %68, %cst_41 {dimension_numbers = #tpu.dot_dimension_numbers<[1], [0], [0], [1], [0, 0, 1, 1], [], []>} : vector<64x64xbf16>, vector<64x128xbf16>, vector<64x128xf32> -> vector<64x128xf32>
    %70 = arith.addf %66, %69 : vector<64x128xf32>
    %71 = vector.extract_strided_slice %57 {offsets = [192, 0], sizes = [64, 64], strides = [1, 1]} : vector<256x64xbf16> to vector<64x64xbf16>
    %c192 = arith.constant 192 : index
    %c0_42 = arith.constant 0 : index
    %72 = vector.load %arg6[%c192, %c0_42] : memref<256x128xbf16, #tpu.memory_space<vmem>>, vector<64x128xbf16>
    %cst_43 = arith.constant dense<0.000000e+00> : vector<64x128xf32>
    %73 = tpu.matmul %71, %72, %cst_43 {dimension_numbers = #tpu.dot_dimension_numbers<[1], [0], [0], [1], [0, 0, 1, 1], [], []>} : vector<64x64xbf16>, vector<64x128xbf16>, vector<64x128xf32> -> vector<64x128xf32>
    %74 = arith.addf %70, %73 : vector<64x128xf32>
    %c0_44 = arith.constant 0 : index
    %c0_45 = arith.constant 0 : index
    %75 = vector.load %arg7[%c0_44, %c0_45] : memref<1x128xf32, #tpu.memory_space<vmem>>, vector<1x128xf32>
    %76 = vector.broadcast %75 : vector<1x128xf32> to vector<64x128xf32>
    %77 = arith.addf %74, %76 : vector<64x128xf32>
    %cst_46 = arith.constant 0.000000e+00 : f32
    %78 = vector.broadcast %cst_46 : f32 to vector<64x128xf32>
    %79 = arith.maximumf %77, %78 : vector<64x128xf32>
    %80 = arith.truncf %79 : vector<64x128xf32> to vector<64x128xbf16>
    %c0_47 = arith.constant 0 : index
    %c0_48 = arith.constant 0 : index
    %c0_49 = arith.constant 0 : index
    %81 = vector.load %arg8[%c0_47, %c0_48, %c0_49] : memref<1x64x128xbf16, #tpu.memory_space<vmem>>, vector<1x64x128xbf16>
    %82 = vector.shape_cast %81 : vector<1x64x128xbf16> to vector<64x128xbf16>
    %83 = vector.shape_cast %80 : vector<64x128xbf16> to vector<1x64x128xbf16>
    tpu.vector_store %arg8[%c0_47, %c0_48, %c0_49], %83 {strides = array<i32>} : memref<1x64x128xbf16, #tpu.memory_space<vmem>>, vector<1x64x128xbf16>,
    return
  }
  func.func @transform_0(%arg0: i32) -> (i32, i32, i32) {
    %c0_i32 = arith.constant 0 : i32
    %c0_i32_0 = arith.constant 0 : i32
    %c0_i32_1 = arith.constant 0 : i32
    return %arg0, %c0_i32, %c0_i32_0 : i32, i32, i32
  }
  func.func @transform_1(%arg0: i32) -> (i32, i32, i32) {
    %c0_i32 = arith.constant 0 : i32
    %c0_i32_0 = arith.constant 0 : i32
    %c0_i32_1 = arith.constant 0 : i32
    return %arg0, %c0_i32, %c0_i32_0 : i32, i32, i32
  }
  func.func @transform_2(%arg0: i32) -> (i32, i32) {
    %c0_i32 = arith.constant 0 : i32
    %c0_i32_0 = arith.constant 0 : i32
    %c0_i32_1 = arith.constant 0 : i32
    return %c0_i32, %c0_i32_0 : i32, i32
  }
  func.func @transform_3(%arg0: i32) -> (i32, i32) {
    %c0_i32 = arith.constant 0 : i32
    %c0_i32_0 = arith.constant 0 : i32
    %c0_i32_1 = arith.constant 0 : i32
    return %c0_i32, %c0_i32_0 : i32, i32
  }
  func.func @transform_4(%arg0: i32) -> (i32, i32) {
    %c0_i32 = arith.constant 0 : i32
    %c0_i32_0 = arith.constant 0 : i32
    %c0_i32_1 = arith.constant 0 : i32
    return %c0_i32, %c0_i32_0 : i32, i32
  }
  func.func @transform_5(%arg0: i32) -> (i32, i32) {
    %c0_i32 = arith.constant 0 : i32
    %c0_i32_0 = arith.constant 0 : i32
    %c0_i32_1 = arith.constant 0 : i32
    return %c0_i32, %c0_i32_0 : i32, i32
  }
  func.func @transform_6(%arg0: i32) -> (i32, i32) {
    %c0_i32 = arith.constant 0 : i32
    %c0_i32_0 = arith.constant 0 : i32
    %c0_i32_1 = arith.constant 0 : i32
    return %c0_i32, %c0_i32_0 : i32, i32
  }
  func.func @transform_7(%arg0: i32) -> (i32, i32, i32) {
    %c0_i32 = arith.constant 0 : i32
    %c0_i32_0 = arith.constant 0 : i32
    %c0_i32_1 = arith.constant 0 : i32
    return %arg0, %c0_i32, %c0_i32_0 : i32, i32, i32
  }
}

module attributes {stable_mosaic.version = 11 : i64} {
  func.func @_conv4_kernel(%arg0: i32, %arg1: i32, %arg2: memref<2x4096xbf16, #tpu.memory_space<vmem>>, %arg3: memref<4096x128xbf16, #tpu.memory_space<vmem>>, %arg4: memref<1x128xf32, #tpu.memory_space<vmem>>, %arg5: memref<2x128xf32, #tpu.memory_space<vmem>>) attributes {dimension_semantics = [#tpu.dimension_semantics<parallel>, #tpu.dimension_semantics<arbitrary>], iteration_bounds = array<i64: 2, 2>, scalar_prefetch = 0 : i64, scratch_operands = 0 : i64, tpu.core_type = #tpu.core_type<tc>, window_params = [{transform_indices = @transform_0, window_bounds = array<i64: 2, 4096>}, {transform_indices = @transform_1, window_bounds = array<i64: 4096, 128>}, {transform_indices = @transform_2, window_bounds = array<i64: 1, 128>}, {transform_indices = @transform_3, window_bounds = array<i64: 2, 128>}]} {
    %c0_i32 = arith.constant 0 : i32
    %0 = arith.cmpi eq, %arg1, %c0_i32 : i32
    %1 = arith.extui %0 : i1 to i32
    %c0_i32_0 = arith.constant 0 : i32
    %2 = arith.cmpi ne, %1, %c0_i32_0 : i32
    scf.if %2 {
      %c0_9 = arith.constant 0 : index
      %c0_10 = arith.constant 0 : index
      %12 = vector.load %arg4[%c0_9, %c0_10] : memref<1x128xf32, #tpu.memory_space<vmem>>, vector<1x128xf32>
      %13 = vector.shape_cast %12 : vector<1x128xf32> to vector<1x128xf32>
      %14 = vector.broadcast %13 : vector<1x128xf32> to vector<2x128xf32>
      %c0_11 = arith.constant 0 : index
      %c0_12 = arith.constant 0 : index
      %15 = vector.load %arg5[%c0_11, %c0_12] : memref<2x128xf32, #tpu.memory_space<vmem>>, vector<2x128xf32>
      tpu.vector_store %arg5[%c0_11, %c0_12], %14 {strides = array<i32>} : memref<2x128xf32, #tpu.memory_space<vmem>>, vector<2x128xf32>,
    } else {
    }
    %c0 = arith.constant 0 : index
    %c0_1 = arith.constant 0 : index
    %3 = vector.load %arg5[%c0, %c0_1] : memref<2x128xf32, #tpu.memory_space<vmem>>, vector<2x128xf32>
    %c0_2 = arith.constant 0 : index
    %c0_3 = arith.constant 0 : index
    %4 = vector.load %arg2[%c0_2, %c0_3] : memref<2x4096xbf16, #tpu.memory_space<vmem>>, vector<2x4096xbf16>
    %c0_4 = arith.constant 0 : index
    %c0_5 = arith.constant 0 : index
    %5 = vector.load %arg3[%c0_4, %c0_5] : memref<4096x128xbf16, #tpu.memory_space<vmem>>, vector<4096x128xbf16>
    %cst = arith.constant dense<0.000000e+00> : vector<2x128xf32>
    %6 = tpu.matmul %4, %5, %cst {dimension_numbers = #tpu.dot_dimension_numbers<[1], [0], [0], [1], [0, 0, 1, 1], [], []>} : vector<2x4096xbf16>, vector<4096x128xbf16>, vector<2x128xf32> -> vector<2x128xf32>
    %7 = arith.addf %3, %6 : vector<2x128xf32>
    %c0_6 = arith.constant 0 : index
    %c0_7 = arith.constant 0 : index
    %8 = vector.load %arg5[%c0_6, %c0_7] : memref<2x128xf32, #tpu.memory_space<vmem>>, vector<2x128xf32>
    tpu.vector_store %arg5[%c0_6, %c0_7], %7 {strides = array<i32>} : memref<2x128xf32, #tpu.memory_space<vmem>>, vector<2x128xf32>,
    %c1_i32 = arith.constant 1 : i32
    %9 = arith.cmpi eq, %arg1, %c1_i32 : i32
    %10 = arith.extui %9 : i1 to i32
    %c0_i32_8 = arith.constant 0 : i32
    %11 = arith.cmpi ne, %10, %c0_i32_8 : i32
    scf.if %11 {
      %c0_9 = arith.constant 0 : index
      %c0_10 = arith.constant 0 : index
      %12 = vector.load %arg5[%c0_9, %c0_10] : memref<2x128xf32, #tpu.memory_space<vmem>>, vector<2x128xf32>
      %cst_11 = arith.constant 0.000000e+00 : f32
      %13 = vector.broadcast %cst_11 : f32 to vector<2x128xf32>
      %14 = arith.maximumf %12, %13 : vector<2x128xf32>
      %c0_12 = arith.constant 0 : index
      %c0_13 = arith.constant 0 : index
      %15 = vector.load %arg5[%c0_12, %c0_13] : memref<2x128xf32, #tpu.memory_space<vmem>>, vector<2x128xf32>
      tpu.vector_store %arg5[%c0_12, %c0_13], %14 {strides = array<i32>} : memref<2x128xf32, #tpu.memory_space<vmem>>, vector<2x128xf32>,
    } else {
    }
    return
  }
  func.func @transform_0(%arg0: i32, %arg1: i32) -> (i32, i32) {
    %c0_i32 = arith.constant 0 : i32
    %c0_i32_0 = arith.constant 0 : i32
    return %c0_i32, %arg1 : i32, i32
  }
  func.func @transform_1(%arg0: i32, %arg1: i32) -> (i32, i32) {
    %c0_i32 = arith.constant 0 : i32
    return %arg1, %arg0 : i32, i32
  }
  func.func @transform_2(%arg0: i32, %arg1: i32) -> (i32, i32) {
    %c0_i32 = arith.constant 0 : i32
    %c0_i32_0 = arith.constant 0 : i32
    return %c0_i32, %arg0 : i32, i32
  }
  func.func @transform_3(%arg0: i32, %arg1: i32) -> (i32, i32) {
    %c0_i32 = arith.constant 0 : i32
    %c0_i32_0 = arith.constant 0 : i32
    return %c0_i32, %arg0 : i32, i32
  }
}

</mosaic_0001>

<bundles_post_ra>
// kernel: pyramid_forward.2
= control target key start
LH: loop header
LB: loop body
LE: loop exit
PB: predicated region body
PF: predicated region fallthrough
CT: control target
= control target key end

     0   :  { %s2873_s24 = smov 0   ;;  %s3628_s0 = inlined_call_operand.vmem [shape: f32[2,1024,12], index: 0, kind: input, shape index: {}]   ;;  %s3629_s1 = inlined_call_operand.vmem [shape: f32[2,1,32], index: 1, kind: input, shape index: {}]   ;;  %s3630_s2 = inlined_call_operand.vmem [shape: bf16[12,32], index: 2, kind: input, shape index: {}]   ;;  %s3631_s3 = inlined_call_operand.vmem [shape: bf16[128,64], index: 3, kind: input, shape index: {}]   ;;  %s3632_s4 = inlined_call_operand.vmem [shape: f32[1,64], index: 4, kind: input, shape index: {}]   ;;  %s3633_s5 = inlined_call_operand.vmem [shape: bf16[256,128], index: 5, kind: input, shape index: {}]   ;;  %s3634_s6 = inlined_call_operand.vmem [shape: f32[1,128], index: 6, kind: input, shape index: {}]   ;;  %s3635_s7 = inlined_call_operand.vmem [shape: bf16[2,64,128], index: 7, kind: output, shape index: {}]  }
   0x1 LB: > { %s2508_s25 = sadd.s32 4294967295, %s2831_s24   ;;  %p2512_p0 = scmp.ge.s32.totalorder %s2831_s24, 1  ;;  %s2831_s24 = sphi %s2873_s24, %s17_s24  }
   0x2   : > { %p245_p1 = scmp.lt.s32.totalorder %s2831_s24, 3 }
   0x4   : > { %p246_p2 = pnand %p2512_p0, %p245_p1 }
   0x6   : > { %249 = sbr.rel (%p246_p2) target bundleno = 1103 (0x44f), region = 48 }
   0xb   : > { %v2519_v0 = vld [vmem:[%s3630_s2] sm:$0xf]  ;;  %v2765_v1 = vld [vmem:[%s3630_s2] sm:$0x30]  ;;  %vm402_vm0 = vcmask 1045504   ;;  %p280_p3 = scmp.lt.s32.totalorder %s2508_s25, 1 }
   0xc   : > { %v2520_v2 = vor.u32 %v2765_v1, %v2519_v0  ;;  %vm353_vm1 = vcmask 97280   ;;  %v2769_v46 = vld [vmem:[%s3631_s3 + $0x18] sm:$0xff]  ;;  %v2767_v47 = vld [vmem:[%s3631_s3 + $0x8] sm:$0xff]  ;;  %v2768_v48 = vld [vmem:[%s3631_s3 + $0x10] sm:$0xff]  ;;  %vm796_vm2 = vcmask 261120   ;;  %vm2079_vm3 = vcmask 523264  }
   0xd   : > { %s3639_s25 = smov (!%p280_p3, %s2508_s25), 1  ;;  %851 = vmatpush.bf16.msra.mxu2 %v2769_v46  ;;  %1000 = vmatpush.bf16.msra.mxu3 %v2767_v47  ;;  %v2766_v49 = vld [vmem:[%s3631_s3] sm:$0xff] }
   0xe   : > { %v2889_v3 = vsel %vm402_vm0, %v2520_v2, 0  ;;  %s2763_s30 = sshll.u32 %s3639_s25, 10  ;;  %s2898_s10 = scalar_lea.vmem %s3629_s1, %s3639_s25 }
   0xf   : > { %413 = vmatpush.bf16.msra.mxu0 %v2889_v3  ;;  %650 = vmatpush.bf16.msra.mxu1 %v2889_v3  ;;  %s2903_s13 = scalar_lea.vmem %s3628_s0, %s2763_s30  ;;  %v2972_v0 = vld [vmem:[%s2898_s10] ss:$0 sm:$0xff]  ;;  %s2764_s26 = sshll.u32 %s3639_s25, 5 }
  0x10   : > { %v297_v4 = vld [vmem:[%s2903_s13] sm:$0xff]  ;;  %v298_v5 = vld [vmem:[%s2903_s13 + $0x8] sm:$0xff]  ;;  %v299_v10 = vld [vmem:[%s2903_s13 + $0x10] sm:$0xff]  ;;  %s3613_s29 = scalar_lea.vmem %s3635_s7, %s2764_s26 }
  0x11   : > { %v547_v6 = vld [vmem:[%s2903_s13 + $0x100] sm:$0xff]  ;;  %v329_v7 = vpack.c.bf16 %v298_v5, %v297_v4  ;;  %v548_v8 = vld [vmem:[%s2903_s13 + $0x108] sm:$0xff]  ;;  %v300_v11 = vld [vmem:[%s2903_s13 + $0x18] sm:$0xff]  ;;  %852 = vmatpush.bf16.msra.mxu2 %v2768_v48  ;;  %1001 = vmatpush.bf16.msra.mxu3 %v2766_v49 }
  0x12   : > { %v579_v9 = vpack.c.bf16 %v548_v8, %v547_v6  ;;  %v549_v12 = vld [vmem:[%s2903_s13 + $0x110] sm:$0xff]  ;;  %v550_v13 = vld [vmem:[%s2903_s13 + $0x118] sm:$0xff]  ;;  %v330_v14 = vpack.c.bf16 %v300_v11, %v299_v10  ;;  %v301_v16 = vld [vmem:[%s2903_s13 + $0x20] sm:$0xff] }
  0x13   : > { %1186 = vmatpush.bf16.msrb.mxu0 %v2889_v3  ;;  %v580_v15 = vpack.c.bf16 %v550_v13, %v549_v12  ;;  %v302_v17 = vld [vmem:[%s2903_s13 + $0x28] sm:$0xff]  ;;  %v551_v18 = vld [vmem:[%s2903_s13 + $0x120] sm:$0xff]  ;;  %v303_v22 = vld [vmem:[%s2903_s13 + $0x30] sm:$0xff] }
  0x14   : > { %2521 = vmatmul.msk.bf16.vlgmr.msra.gmra.mxu0 %vm353_vm1, %v329_v7  ;;  %2537 = vmatmul.msk.bf16.vlgmr.msra.gmra.mxu1 %vm353_vm1, %v579_v9  ;;  %v552_v19 = vld [vmem:[%s2903_s13 + $0x128] sm:$0xff]  ;;  %v331_v20 = vpack.c.bf16 %v302_v17, %v301_v16  ;;  %v304_v23 = vld [vmem:[%s2903_s13 + $0x38] sm:$0xff]  ;;  %v553_v24 = vld [vmem:[%s2903_s13 + $0x130] sm:$0xff] }
  0x15   : > { %v581_v21 = vpack.c.bf16 %v552_v19, %v551_v18  ;;  %v554_v25 = vld [vmem:[%s2903_s13 + $0x138] sm:$0xff]  ;;  %v332_v26 = vpack.c.bf16 %v304_v23, %v303_v22  ;;  %v305_v28 = vld [vmem:[%s2903_s13 + $0x40] sm:$0xff]  ;;  %v306_v29 = vld [vmem:[%s2903_s13 + $0x48] sm:$0xff]  ;;  %1604 = vmatpush.bf16.msrb.mxu2 %v2889_v3 }
  0x16   : > { %v582_v27 = vpack.c.bf16 %v554_v25, %v553_v24  ;;  %v555_v30 = vld [vmem:[%s2903_s13 + $0x140] sm:$0xff]  ;;  %v556_v31 = vld [vmem:[%s2903_s13 + $0x148] sm:$0xff]  ;;  %v333_v32 = vpack.c.bf16 %v306_v29, %v305_v28  ;;  %v307_v34 = vld [vmem:[%s2903_s13 + $0x50] sm:$0xff] }
  0x17   : > { %v583_v33 = vpack.c.bf16 %v556_v31, %v555_v30  ;;  %v308_v35 = vld [vmem:[%s2903_s13 + $0x58] sm:$0xff]  ;;  %v557_v36 = vld [vmem:[%s2903_s13 + $0x150] sm:$0xff]  ;;  %v309_v40 = vld [vmem:[%s2903_s13 + $0x60] sm:$0xff] }
  0x18   : > { %v558_v37 = vld [vmem:[%s2903_s13 + $0x158] sm:$0xff]  ;;  %v334_v38 = vpack.c.bf16 %v308_v35, %v307_v34  ;;  %v310_v41 = vld [vmem:[%s2903_s13 + $0x68] sm:$0xff]  ;;  %v559_v42 = vld [vmem:[%s2903_s13 + $0x160] sm:$0xff] }
  0x19   : > { %v584_v39 = vpack.c.bf16 %v558_v37, %v557_v36  ;;  %v560_v43 = vld [vmem:[%s2903_s13 + $0x168] sm:$0xff]  ;;  %v335_v44 = vpack.c.bf16 %v310_v41, %v309_v40  ;;  %v311_v50 = vld [vmem:[%s2903_s13 + $0x70] sm:$0xff]  ;;  %v312_v51 = vld [vmem:[%s2903_s13 + $0x78] sm:$0xff] }
  0x1a   : > { %v585_v45 = vpack.c.bf16 %v560_v43, %v559_v42  ;;  %v561_v52 = vld [vmem:[%s2903_s13 + $0x170] sm:$0xff]  ;;  %v562_v53 = vld [vmem:[%s2903_s13 + $0x178] sm:$0xff]  ;;  %v336_v54 = vpack.c.bf16 %v312_v51, %v311_v50  ;;  %v313_v56 = vld [vmem:[%s2903_s13 + $0x80] sm:$0xff] }
  0x1b   : > { %v586_v55 = vpack.c.bf16 %v562_v53, %v561_v52  ;;  %v314_v57 = vld [vmem:[%s2903_s13 + $0x88] sm:$0xff]  ;;  %v563_v58 = vld [vmem:[%s2903_s13 + $0x180] sm:$0xff]  ;;  %v315_v11 = vld [vmem:[%s2903_s13 + $0x90] sm:$0xff] }
  0x1c   : > { %v564_v59 = vld [vmem:[%s2903_s13 + $0x188] sm:$0xff]  ;;  %v337_v60 = vpack.c.bf16 %v314_v57, %v313_v56  ;;  %v316_v12 = vld [vmem:[%s2903_s13 + $0x98] sm:$0xff]  ;;  %v317_v31 = vld [vmem:[%s2903_s13 + $0xa0] sm:$0xff] }
  0x1d   : > { %v587_v62 = vpack.c.bf16 %v564_v59, %v563_v58  ;;  %v338_v17 = vpack.c.bf16 %v316_v12, %v315_v11  ;;  %v567_v34 = vld [vmem:[%s2903_s13 + $0x1a0] sm:$0xff]  ;;  %v568_v35 = vld [vmem:[%s2903_s13 + $0x1a8] sm:$0xff]  ;;  %v319_v51 = vld [vmem:[%s2903_s13 + $0xb0] sm:$0xff] }
  0x1e   : > { %v320_v52 = vld [vmem:[%s2903_s13 + $0xb8] sm:$0xff]  ;;  %v571_v11 = vld [vmem:[%s2903_s13 + $0x1c0] sm:$0xff]  ;;  %v572_v12 = vld [vmem:[%s2903_s13 + $0x1c8] sm:$0xff] }
  0x1f   : > { %v340_v57 = vpack.c.bf16 %v320_v52, %v319_v51  ;;  %v575_v51 = vld [vmem:[%s2903_s13 + $0x1e0] sm:$0xff]  ;;  %v576_v52 = vld [vmem:[%s2903_s13 + $0x1e8] sm:$0xff] }
  0x24   : > { %2522 = vmatmul.msk.bf16.gmra.mxu0 %vm353_vm1, %v330_v14  ;;  %2538 = vmatmul.msk.bf16.gmra.mxu1 %vm353_vm1, %v580_v15  ;;  %v565_v14 = vld [vmem:[%s2903_s13 + $0x190] sm:$0xff]  ;;  %v566_v15 = vld [vmem:[%s2903_s13 + $0x198] sm:$0xff] }
  0x25   : > { %v588_v19 = vpack.c.bf16 %v566_v15, %v565_v14 }
  0x34   : > { %2523 = vmatmul.msk.bf16.gmra.mxu0 %vm353_vm1, %v331_v20  ;;  %2539 = vmatmul.msk.bf16.gmra.mxu1 %vm353_vm1, %v581_v21 }
  0x44   : > { %2524 = vmatmul.msk.bf16.gmra.mxu0 %vm353_vm1, %v332_v26  ;;  %2540 = vmatmul.msk.bf16.gmra.mxu1 %vm353_vm1, %v582_v27 }
  0x54   : > { %2525 = vmatmul.msk.bf16.gmra.mxu0 %vm353_vm1, %v333_v32  ;;  %2541 = vmatmul.msk.bf16.gmra.mxu1 %vm353_vm1, %v583_v33  ;;  %v318_v32 = vld [vmem:[%s2903_s13 + $0xa8] sm:$0xff] }
  0x55   : > { %v339_v37 = vpack.c.bf16 %v318_v32, %v317_v31  ;;  %v573_v31 = vld [vmem:[%s2903_s13 + $0x1d0] sm:$0xff]  ;;  %v574_v32 = vld [vmem:[%s2903_s13 + $0x1d8] sm:$0xff] }
  0x64   : > { %2526 = vmatmul.msk.bf16.gmra.mxu0 %vm353_vm1, %v334_v38  ;;  %2542 = vmatmul.msk.bf16.gmra.mxu1 %vm353_vm1, %v584_v39  ;;  %v589_v39 = vpack.c.bf16 %v568_v35, %v567_v34 }
  0x74   : > { %2527 = vmatmul.msk.bf16.gmra.mxu0 %vm353_vm1, %v335_v44  ;;  %2543 = vmatmul.msk.bf16.gmra.mxu1 %vm353_vm1, %v585_v45 }
  0x84   : > { %2528 = vmatmul.msk.bf16.gmra.mxu0 %vm353_vm1, %v336_v54  ;;  %2544 = vmatmul.msk.bf16.gmra.mxu1 %vm353_vm1, %v586_v55  ;;  %v569_v54 = vld [vmem:[%s2903_s13 + $0x1b0] sm:$0xff]  ;;  %v570_v55 = vld [vmem:[%s2903_s13 + $0x1b8] sm:$0xff] }
  0x85   : > { %v590_v59 = vpack.c.bf16 %v570_v55, %v569_v54 }
  0x91   : > { %v415_v61 = vpop.f32.mrf.mxu0  ;;  %v652_v63 = vpop.f32.mrf.mxu1 }
  0x92   : > { %v416_v1 = vadd.f32 %v2972_v0, %v415_v61  ;;  %v653_v2 = vadd.f32 %v2972_v0, %v652_v63 }
  0x94   : > { %2529 = vmatmul.msk.bf16.gmra.mxu0 %vm353_vm1, %v337_v60  ;;  %2545 = vmatmul.msk.bf16.gmra.mxu1 %vm353_vm1, %v587_v62  ;;  %v495_v4 = vmax.f32 %v416_v1, 0.0  ;;  %v732_v9 = vmax.f32 %v653_v2, 0.0 }
  0x99   : > { %v417_v3 = vpop.f32.mrf.mxu0  ;;  %v654_v6 = vpop.f32.mrf.mxu1 }
  0x9a   : > { %v418_v5 = vadd.f32 %v2972_v0, %v417_v3  ;;  %v655_v7 = vadd.f32 %v2972_v0, %v654_v6 }
  0x9c   : > { %v496_v8 = vmax.f32 %v418_v5, 0.0  ;;  %v733_v10 = vmax.f32 %v655_v7, 0.0 }
  0x9e   : > { %v527_v13 = vpack.c.bf16 %v496_v8, %v495_v4  ;;  %v764_v16 = vpack.c.bf16 %v733_v10, %v732_v9  ;;  %v321_v8 = vld [vmem:[%s2903_s13 + $0xc0] sm:$0xff]  ;;  %v322_v9 = vld [vmem:[%s2903_s13 + $0xc8] sm:$0xff] }
  0x9f   : > { %v341_v14 = vpack.c.bf16 %v322_v9, %v321_v8  ;;  %v577_v8 = vld [vmem:[%s2903_s13 + $0x1f0] sm:$0xff]  ;;  %v578_v9 = vld [vmem:[%s2903_s13 + $0x1f8] sm:$0xff] }
  0xa0   : > { %2585 = vmatmul.msk.bf16.vlgmr.msra.gmra.mxu3 %vm796_vm2, %v527_v13  ;;  %2561 = vmatmul.msk.bf16.vlgmr.msra.gmra.mxu2 %vm796_vm2, %v764_v16  ;;  %v591_v16 = vpack.c.bf16 %v572_v12, %v571_v11 }
  0xa1   : > { %v420_v18 = vpop.f32.mrf.mxu0  ;;  %v657_v20 = vpop.f32.mrf.mxu1 }
  0xa2   : > { %v421_v21 = vadd.f32 %v2972_v0, %v420_v18  ;;  %v658_v22 = vadd.f32 %v2972_v0, %v657_v20 }
  0xa4   : > { %2530 = vmatmul.msk.bf16.gmra.mxu0 %vm353_vm1, %v338_v17  ;;  %2546 = vmatmul.msk.bf16.gmra.mxu1 %vm353_vm1, %v588_v19  ;;  %v497_v24 = vmax.f32 %v421_v21, 0.0  ;;  %v734_v29 = vmax.f32 %v658_v22, 0.0 }
  0xa9   : > { %v422_v23 = vpop.f32.mrf.mxu0  ;;  %v659_v26 = vpop.f32.mrf.mxu1 }
  0xaa   : > { %v423_v25 = vadd.f32 %v2972_v0, %v422_v23  ;;  %v660_v27 = vadd.f32 %v2972_v0, %v659_v26 }
  0xac   : > { %v498_v28 = vmax.f32 %v423_v25, 0.0  ;;  %v735_v30 = vmax.f32 %v660_v27, 0.0 }
  0xae   : > { %v528_v33 = vpack.c.bf16 %v498_v28, %v497_v24  ;;  %v765_v36 = vpack.c.bf16 %v735_v30, %v734_v29  ;;  %v323_v28 = vld [vmem:[%s2903_s13 + $0xd0] sm:$0xff]  ;;  %v324_v29 = vld [vmem:[%s2903_s13 + $0xd8] sm:$0xff] }
  0xaf   : > { %v342_v34 = vpack.c.bf16 %v324_v29, %v323_v28 }
  0xb0   : > { %2586 = vmatmul.msk.bf16.gmra.mxu3 %vm796_vm2, %v528_v33  ;;  %2562 = vmatmul.msk.bf16.gmra.mxu2 %vm796_vm2, %v765_v36  ;;  %v592_v36 = vpack.c.bf16 %v574_v32, %v573_v31  ;;  %v2773_v32 = vld [vmem:[%s3631_s3 + $0x38] sm:$0xff] }
  0xb1   : > { %v425_v38 = vpop.f32.mrf.mxu0  ;;  %v662_v40 = vpop.f32.mrf.mxu1  ;;  %1804 = vmatpush.bf16.msrb.mxu3 %v2773_v32 }
  0xb2   : > { %v426_v41 = vadd.f32 %v2972_v0, %v425_v38  ;;  %v663_v42 = vadd.f32 %v2972_v0, %v662_v40 }
  0xb4   : > { %2531 = vmatmul.msk.bf16.gmra.mxu0 %vm353_vm1, %v339_v37  ;;  %2547 = vmatmul.msk.bf16.gmra.mxu1 %vm353_vm1, %v589_v39  ;;  %v499_v44 = vmax.f32 %v426_v41, 0.0  ;;  %v736_v49 = vmax.f32 %v663_v42, 0.0 }
  0xb9   : > { %v427_v43 = vpop.f32.mrf.mxu0  ;;  %v664_v46 = vpop.f32.mrf.mxu1 }
  0xba   : > { %v428_v45 = vadd.f32 %v2972_v0, %v427_v43  ;;  %v665_v47 = vadd.f32 %v2972_v0, %v664_v46 }
  0xbc   : > { %v500_v48 = vmax.f32 %v428_v45, 0.0  ;;  %v737_v50 = vmax.f32 %v665_v47, 0.0 }
  0xbe   : > { %v529_v53 = vpack.c.bf16 %v500_v48, %v499_v44  ;;  %v766_v56 = vpack.c.bf16 %v737_v50, %v736_v49  ;;  %v325_v48 = vld [vmem:[%s2903_s13 + $0xe0] sm:$0xff]  ;;  %v326_v49 = vld [vmem:[%s2903_s13 + $0xe8] sm:$0xff] }
  0xbf   : > { %v343_v54 = vpack.c.bf16 %v326_v49, %v325_v48 }
  0xc0   : > { %2587 = vmatmul.msk.bf16.gmra.mxu3 %vm796_vm2, %v529_v53  ;;  %2563 = vmatmul.msk.bf16.gmra.mxu2 %vm796_vm2, %v766_v56  ;;  %v593_v56 = vpack.c.bf16 %v576_v52, %v575_v51 }
  0xc1   : > { %v430_v58 = vpop.f32.mrf.mxu0  ;;  %v667_v60 = vpop.f32.mrf.mxu1 }
  0xc2   : > { %v431_v61 = vadd.f32 %v2972_v0, %v430_v58  ;;  %v668_v62 = vadd.f32 %v2972_v0, %v667_v60 }
  0xc4   : > { %2532 = vmatmul.msk.bf16.gmra.mxu0 %vm353_vm1, %v340_v57  ;;  %2548 = vmatmul.msk.bf16.gmra.mxu1 %vm353_vm1, %v590_v59  ;;  %v501_v1 = vmax.f32 %v431_v61, 0.0  ;;  %v738_v6 = vmax.f32 %v668_v62, 0.0 }
  0xc9   : > { %v432_v63 = vpop.f32.mrf.mxu0  ;;  %v669_v3 = vpop.f32.mrf.mxu1 }
  0xca   : > { %v433_v2 = vadd.f32 %v2972_v0, %v432_v63  ;;  %v670_v4 = vadd.f32 %v2972_v0, %v669_v3 }
  0xcc   : > { %v502_v5 = vmax.f32 %v433_v2, 0.0  ;;  %v739_v7 = vmax.f32 %v670_v4, 0.0 }
  0xce   : > { %v530_v10 = vpack.c.bf16 %v502_v5, %v501_v1  ;;  %v767_v13 = vpack.c.bf16 %v739_v7, %v738_v6  ;;  %v327_v5 = vld [vmem:[%s2903_s13 + $0xf0] sm:$0xff]  ;;  %v328_v6 = vld [vmem:[%s2903_s13 + $0xf8] sm:$0xff] }
  0xcf   : > { %v344_v11 = vpack.c.bf16 %v328_v6, %v327_v5  ;;  %v1088_v5 = vld [vmem:[%s2903_s13 + $0x228] sm:$0xff] }
  0xd0   : > { %2588 = vmatmul.msk.bf16.gmra.mxu3 %vm796_vm2, %v530_v10  ;;  %2564 = vmatmul.msk.bf16.gmra.mxu2 %vm796_vm2, %v767_v13  ;;  %v594_v13 = vpack.c.bf16 %v578_v9, %v577_v8 }
  0xd1   : > { %v435_v15 = vpop.f32.mrf.mxu0  ;;  %v672_v17 = vpop.f32.mrf.mxu1 }
  0xd2   : > { %v436_v18 = vadd.f32 %v2972_v0, %v435_v15  ;;  %v673_v19 = vadd.f32 %v2972_v0, %v672_v17 }
  0xd4   : > { %2533 = vmatmul.msk.bf16.gmra.mxu0 %vm353_vm1, %v341_v14  ;;  %2549 = vmatmul.msk.bf16.gmra.mxu1 %vm353_vm1, %v591_v16  ;;  %v503_v21 = vmax.f32 %v436_v18, 0.0  ;;  %v740_v26 = vmax.f32 %v673_v19, 0.0 }
  0xd9   : > { %v437_v20 = vpop.f32.mrf.mxu0  ;;  %v674_v23 = vpop.f32.mrf.mxu1 }
  0xda   : > { %v438_v22 = vadd.f32 %v2972_v0, %v437_v20  ;;  %v675_v24 = vadd.f32 %v2972_v0, %v674_v23 }
  0xdc   : > { %v504_v25 = vmax.f32 %v438_v22, 0.0  ;;  %v741_v27 = vmax.f32 %v675_v24, 0.0 }
  0xde   : > { %v531_v30 = vpack.c.bf16 %v504_v25, %v503_v21  ;;  %v768_v33 = vpack.c.bf16 %v741_v27, %v740_v26  ;;  %v1083_v25 = vld [vmem:[%s2903_s13 + $0x200] sm:$0xff]  ;;  %v1084_v26 = vld [vmem:[%s2903_s13 + $0x208] sm:$0xff] }
  0xdf   : > { %v1115_v29 = vpack.c.bf16 %v1084_v26, %v1083_v25 }
  0xe0   : > { %2589 = vmatmul.msk.bf16.gmra.mxu3 %vm796_vm2, %v531_v30  ;;  %2565 = vmatmul.msk.bf16.gmra.mxu2 %vm796_vm2, %v768_v33  ;;  %v2771_v33 = vld [vmem:[%s3631_s3 + $0x28] sm:$0xff] }
  0xe1   : > { %v440_v35 = vpop.f32.mrf.mxu0  ;;  %v677_v37 = vpop.f32.mrf.mxu1  ;;  %1386 = vmatpush.bf16.msrb.mxu1 %v2771_v33 }
  0xe2   : > { %v441_v38 = vadd.f32 %v2972_v0, %v440_v35  ;;  %v678_v39 = vadd.f32 %v2972_v0, %v677_v37 }
  0xe4   : > { %2534 = vmatmul.msk.bf16.gmra.mxu0 %vm353_vm1, %v342_v34  ;;  %2550 = vmatmul.msk.bf16.gmra.mxu1 %vm353_vm1, %v592_v36  ;;  %v505_v41 = vmax.f32 %v441_v38, 0.0  ;;  %v742_v46 = vmax.f32 %v678_v39, 0.0 }
  0xe9   : > { %v442_v40 = vpop.f32.mrf.mxu0  ;;  %v679_v43 = vpop.f32.mrf.mxu1 }
  0xea   : > { %v443_v42 = vadd.f32 %v2972_v0, %v442_v40  ;;  %v680_v44 = vadd.f32 %v2972_v0, %v679_v43 }
  0xec   : > { %v506_v45 = vmax.f32 %v443_v42, 0.0  ;;  %v743_v47 = vmax.f32 %v680_v44, 0.0  ;;  %v1085_v44 = vld [vmem:[%s2903_s13 + $0x210] sm:$0xff] }
  0xee   : > { %v532_v50 = vpack.c.bf16 %v506_v45, %v505_v41  ;;  %v769_v53 = vpack.c.bf16 %v743_v47, %v742_v46  ;;  %v1086_v45 = vld [vmem:[%s2903_s13 + $0x218] sm:$0xff] }
  0xef   : > { %v1116_v48 = vpack.c.bf16 %v1086_v45, %v1085_v44 }
  0xf0   : > { %2590 = vmatmul.msk.bf16.gmra.mxu3 %vm796_vm2, %v532_v50  ;;  %2566 = vmatmul.msk.bf16.gmra.mxu2 %vm796_vm2, %v769_v53 }
  0xf1   : > { %v445_v55 = vpop.f32.mrf.mxu0  ;;  %v682_v57 = vpop.f32.mrf.mxu1 }
  0xf2   : > { %v446_v58 = vadd.f32 %v2972_v0, %v445_v55  ;;  %v683_v59 = vadd.f32 %v2972_v0, %v682_v57 }
  0xf4   : > { %2535 = vmatmul.msk.bf16.gmra.mxu0 %vm353_vm1, %v343_v54  ;;  %2551 = vmatmul.msk.bf16.gmra.mxu1 %vm353_vm1, %v593_v56  ;;  %v507_v61 = vmax.f32 %v446_v58, 0.0  ;;  %v744_v3 = vmax.f32 %v683_v59, 0.0 }
  0xf9   : > { %v447_v60 = vpop.f32.mrf.mxu0  ;;  %v684_v63 = vpop.f32.mrf.mxu1 }
  0xfa   : > { %v448_v62 = vadd.f32 %v2972_v0, %v447_v60  ;;  %v685_v1 = vadd.f32 %v2972_v0, %v684_v63 }
  0xfc   : > { %v508_v2 = vmax.f32 %v448_v62, 0.0  ;;  %v745_v4 = vmax.f32 %v685_v1, 0.0 }
  0xfe   : > { %v533_v7 = vpack.c.bf16 %v508_v2, %v507_v61  ;;  %v770_v10 = vpack.c.bf16 %v745_v4, %v744_v3  ;;  %v1087_v4 = vld [vmem:[%s2903_s13 + $0x220] sm:$0xff] }
  0xff   : > { %v1117_v8 = vpack.c.bf16 %v1088_v5, %v1087_v4 }
 0x100   : > { %2591 = vmatmul.msk.bf16.gmra.mxu3 %vm796_vm2, %v533_v7  ;;  %2567 = vmatmul.msk.bf16.gmra.mxu2 %vm796_vm2, %v770_v10 }
 0x101   : > { %v450_v12 = vpop.f32.mrf.mxu0  ;;  %v687_v14 = vpop.f32.mrf.mxu1 }
 0x102   : > { %v451_v15 = vadd.f32 %v2972_v0, %v450_v12  ;;  %v688_v16 = vadd.f32 %v2972_v0, %v687_v14 }
 0x104   : > { %2536 = vmatmul.msk.bf16.gmra.mxu0 %vm353_vm1, %v344_v11  ;;  %2552 = vmatmul.msk.bf16.gmra.mxu1 %vm353_vm1, %v594_v13  ;;  %v509_v18 = vmax.f32 %v451_v15, 0.0  ;;  %v746_v23 = vmax.f32 %v688_v16, 0.0 }
 0x109   : > { %v452_v17 = vpop.f32.mrf.mxu0  ;;  %v689_v20 = vpop.f32.mrf.mxu1 }
 0x10a   : > { %v453_v19 = vadd.f32 %v2972_v0, %v452_v17  ;;  %v690_v21 = vadd.f32 %v2972_v0, %v689_v20 }
 0x10c   : > { %v510_v22 = vmax.f32 %v453_v19, 0.0  ;;  %v747_v24 = vmax.f32 %v690_v21, 0.0 }
 0x10e   : > { %v534_v27 = vpack.c.bf16 %v510_v22, %v509_v18  ;;  %v771_v28 = vpack.c.bf16 %v747_v24, %v746_v23 }
 0x110   : > { %2592 = vmatmul.msk.bf16.gmra.mxu3 %vm796_vm2, %v534_v27  ;;  %2568 = vmatmul.msk.bf16.gmra.mxu2 %vm796_vm2, %v771_v28  ;;  %v1089_v27 = vld [vmem:[%s2903_s13 + $0x230] sm:$0xff]  ;;  %v1090_v28 = vld [vmem:[%s2903_s13 + $0x238] sm:$0xff] }
 0x111   : > { %v455_v30 = vpop.f32.mrf.mxu0  ;;  %v692_v31 = vpop.f32.mrf.mxu1 }
 0x112   : > { %v456_v34 = vadd.f32 %v2972_v0, %v455_v30  ;;  %v693_v35 = vadd.f32 %v2972_v0, %v692_v31  ;;  %v1118_v31 = vpack.c.bf16 %v1090_v28, %v1089_v27 }
 0x114   : > { %2601 = vmatmul.msk.bf16.vlgmr.msrb.gmra.mxu0 %vm353_vm1, %v1115_v29  ;;  %v511_v37 = vmax.f32 %v456_v34, 0.0  ;;  %v748_v42 = vmax.f32 %v693_v35, 0.0 }
 0x119   : > { %v457_v36 = vpop.f32.mrf.mxu0  ;;  %v694_v39 = vpop.f32.mrf.mxu1 }
 0x11a   : > { %v458_v38 = vadd.f32 %v2972_v0, %v457_v36  ;;  %v695_v40 = vadd.f32 %v2972_v0, %v694_v39 }
 0x11c   : > { %v512_v41 = vmax.f32 %v458_v38, 0.0  ;;  %v749_v43 = vmax.f32 %v695_v40, 0.0 }
 0x11e   : > { %v535_v46 = vpack.c.bf16 %v512_v41, %v511_v37  ;;  %v772_v47 = vpack.c.bf16 %v749_v43, %v748_v42 }
 0x120   : > { %2593 = vmatmul.msk.bf16.gmra.mxu3 %vm796_vm2, %v535_v46  ;;  %2569 = vmatmul.msk.bf16.gmra.mxu2 %vm796_vm2, %v772_v47 }
 0x121   : > { %v460_v49 = vpop.f32.mrf.mxu0  ;;  %v697_v50 = vpop.f32.mrf.mxu1 }
 0x122   : > { %v461_v54 = vadd.f32 %v2972_v0, %v460_v49  ;;  %v698_v55 = vadd.f32 %v2972_v0, %v697_v50  ;;  %v1091_v50 = vld [vmem:[%s2903_s13 + $0x240] sm:$0xff] }
 0x123   : > { %v1003_v51 = vpop.f32.mrf.mxu3  ;;  %v854_v52 = vpop.f32.mrf.mxu2 }
 0x124   : > { %2602 = vmatmul.msk.bf16.gmra.mxu0 %vm353_vm1, %v1116_v48  ;;  %v3084_v53 = vadd.f32 %v1003_v51, %v854_v52  ;;  %v513_v57 = vmax.f32 %v461_v54, 0.0  ;;  %v750_v1 = vmax.f32 %v698_v55, 0.0  ;;  %v1092_v51 = vld [vmem:[%s2903_s13 + $0x248] sm:$0xff] }
 0x125   : > { %v1119_v55 = vpack.c.bf16 %v1092_v51, %v1091_v50 }
 0x129   : > { %v462_v56 = vpop.f32.mrf.mxu0  ;;  %v699_v59 = vpop.f32.mrf.mxu1 }
 0x12a   : > { %v463_v58 = vadd.f32 %v2972_v0, %v462_v56  ;;  %v700_v60 = vadd.f32 %v2972_v0, %v699_v59 }
 0x12b   : > { %v1005_v61 = vpop.f32.mrf.mxu3  ;;  %v856_v63 = vpop.f32.mrf.mxu2 }
 0x12c   : > { %v514_v62 = vmax.f32 %v463_v58, 0.0  ;;  %v751_v2 = vmax.f32 %v700_v60, 0.0  ;;  %v3090_v3 = vadd.f32 %v1005_v61, %v856_v63 }
 0x12e   : > { %v536_v6 = vpack.c.bf16 %v514_v62, %v513_v57  ;;  %v773_v7 = vpack.c.bf16 %v751_v2, %v750_v1 }
 0x130   : > { %2594 = vmatmul.msk.bf16.gmra.mxu3 %vm796_vm2, %v536_v6  ;;  %2570 = vmatmul.msk.bf16.gmra.mxu2 %vm796_vm2, %v773_v7 }
 0x131   : > { %v465_v9 = vpop.f32.mrf.mxu0  ;;  %v702_v10 = vpop.f32.mrf.mxu1 }
 0x132   : > { %v466_v14 = vadd.f32 %v2972_v0, %v465_v9  ;;  %v703_v15 = vadd.f32 %v2972_v0, %v702_v10 }
 0x133   : > { %v1008_v11 = vpop.f32.mrf.mxu3  ;;  %v859_v12 = vpop.f32.mrf.mxu2 }
 0x134   : > { %2603 = vmatmul.msk.bf16.gmra.mxu0 %vm353_vm1, %v1117_v8  ;;  %v3097_v13 = vadd.f32 %v1008_v11, %v859_v12  ;;  %v515_v17 = vmax.f32 %v466_v14, 0.0  ;;  %v752_v24 = vmax.f32 %v703_v15, 0.0  ;;  %v1093_v12 = vld [vmem:[%s2903_s13 + $0x250] sm:$0xff]  ;;  %v1094_v14 = vld [vmem:[%s2903_s13 + $0x258] sm:$0xff] }
 0x139   : > { %v467_v16 = vpop.f32.mrf.mxu0  ;;  %v704_v19 = vpop.f32.mrf.mxu1 }
 0x13a   : > { %v468_v18 = vadd.f32 %v2972_v0, %v467_v16  ;;  %v705_v20 = vadd.f32 %v2972_v0, %v704_v19 }
 0x13b   : > { %v1010_v21 = vpop.f32.mrf.mxu3  ;;  %v861_v23 = vpop.f32.mrf.mxu2 }
 0x13c   : > { %v516_v22 = vmax.f32 %v468_v18, 0.0  ;;  %v753_v25 = vmax.f32 %v705_v20, 0.0  ;;  %v3103_v26 = vadd.f32 %v1010_v21, %v861_v23 }
 0x13e   : > { %v537_v29 = vpack.c.bf16 %v516_v22, %v515_v17  ;;  %v774_v30 = vpack.c.bf16 %v753_v25, %v752_v24  ;;  %v1120_v17 = vpack.c.bf16 %v1094_v14, %v1093_v12 }
 0x140   : > { %2595 = vmatmul.msk.bf16.gmra.mxu3 %vm796_vm2, %v537_v29  ;;  %2571 = vmatmul.msk.bf16.gmra.mxu2 %vm796_vm2, %v774_v30 }
 0x141   : > { %v470_v32 = vpop.f32.mrf.mxu0  ;;  %v707_v33 = vpop.f32.mrf.mxu1 }
 0x142   : > { %v471_v37 = vadd.f32 %v2972_v0, %v470_v32  ;;  %v708_v38 = vadd.f32 %v2972_v0, %v707_v33 }
 0x143   : > { %v1013_v34 = vpop.f32.mrf.mxu3  ;;  %v864_v35 = vpop.f32.mrf.mxu2 }
 0x144   : > { %2604 = vmatmul.msk.bf16.gmra.mxu0 %vm353_vm1, %v1118_v31  ;;  %v3110_v36 = vadd.f32 %v1013_v34, %v864_v35  ;;  %v517_v40 = vmax.f32 %v471_v37, 0.0  ;;  %v754_v47 = vmax.f32 %v708_v38, 0.0  ;;  %v1095_v37 = vld [vmem:[%s2903_s13 + $0x260] sm:$0xff]  ;;  %v1096_v38 = vld [vmem:[%s2903_s13 + $0x268] sm:$0xff] }
 0x149   : > { %v472_v39 = vpop.f32.mrf.mxu0  ;;  %v709_v42 = vpop.f32.mrf.mxu1 }
 0x14a   : > { %v473_v41 = vadd.f32 %v2972_v0, %v472_v39  ;;  %v710_v43 = vadd.f32 %v2972_v0, %v709_v42 }
 0x14b   : > { %v1015_v44 = vpop.f32.mrf.mxu3  ;;  %v866_v46 = vpop.f32.mrf.mxu2 }
 0x14c   : > { %v518_v45 = vmax.f32 %v473_v41, 0.0  ;;  %v755_v48 = vmax.f32 %v710_v43, 0.0  ;;  %v3116_v49 = vadd.f32 %v1015_v44, %v866_v46  ;;  %v1121_v41 = vpack.c.bf16 %v1096_v38, %v1095_v37  ;;  %v2772_v38 = vld [vmem:[%s3631_s3 + $0x30] sm:$0xff] }
 0x14d   : > { %1805 = vmatpush.bf16.msrb.mxu3 %v2772_v38 }
 0x14e   : > { %v538_v52 = vpack.c.bf16 %v518_v45, %v517_v40  ;;  %v775_v54 = vpack.c.bf16 %v755_v48, %v754_v47 }
 0x150   : > { %2596 = vmatmul.msk.bf16.gmra.mxu3 %vm796_vm2, %v538_v52  ;;  %2572 = vmatmul.msk.bf16.gmra.mxu2 %vm796_vm2, %v775_v54 }
 0x151   : > { %v475_v56 = vpop.f32.mrf.mxu0  ;;  %v712_v57 = vpop.f32.mrf.mxu1 }
 0x152   : > { %v476_v61 = vadd.f32 %v2972_v0, %v475_v56  ;;  %v713_v62 = vadd.f32 %v2972_v0, %v712_v57 }
 0x153   : > { %v1018_v58 = vpop.f32.mrf.mxu3  ;;  %v869_v59 = vpop.f32.mrf.mxu2 }
 0x154   : > { %2605 = vmatmul.msk.bf16.gmra.mxu0 %vm353_vm1, %v1119_v55  ;;  %v3123_v60 = vadd.f32 %v1018_v58, %v869_v59  ;;  %v519_v1 = vmax.f32 %v476_v61, 0.0  ;;  %v756_v9 = vmax.f32 %v713_v62, 0.0  ;;  %v2770_v59 = vld [vmem:[%s3631_s3 + $0x20] sm:$0xff] }
 0x155   : > { %1387 = vmatpush.bf16.msrb.mxu1 %v2770_v59 }
 0x159   : > { %v477_v63 = vpop.f32.mrf.mxu0  ;;  %v714_v4 = vpop.f32.mrf.mxu1 }
 0x15a   : > { %v478_v2 = vadd.f32 %v2972_v0, %v477_v63  ;;  %v715_v5 = vadd.f32 %v2972_v0, %v714_v4  ;;  %v1097_v63 = vld [vmem:[%s2903_s13 + $0x270] sm:$0xff] }
 0x15b   : > { %v1020_v6 = vpop.f32.mrf.mxu3  ;;  %v871_v8 = vpop.f32.mrf.mxu2 }
 0x15c   : > { %v520_v7 = vmax.f32 %v478_v2, 0.0  ;;  %v757_v10 = vmax.f32 %v715_v5, 0.0  ;;  %v3129_v11 = vadd.f32 %v1020_v6, %v871_v8 }
 0x15e   : > { %v539_v15 = vpack.c.bf16 %v520_v7, %v519_v1  ;;  %v776_v16 = vpack.c.bf16 %v757_v10, %v756_v9  ;;  %v1098_v1 = vld [vmem:[%s2903_s13 + $0x278] sm:$0xff] }
 0x15f   : > { %v1122_v5 = vpack.c.bf16 %v1098_v1, %v1097_v63 }
 0x160   : > { %2597 = vmatmul.msk.bf16.gmra.mxu3 %vm796_vm2, %v539_v15  ;;  %2573 = vmatmul.msk.bf16.gmra.mxu2 %vm796_vm2, %v776_v16 }
 0x161   : > { %v480_v18 = vpop.f32.mrf.mxu0  ;;  %v717_v19 = vpop.f32.mrf.mxu1 }
 0x162   : > { %v481_v23 = vadd.f32 %v2972_v0, %v480_v18  ;;  %v718_v24 = vadd.f32 %v2972_v0, %v717_v19 }
 0x163   : > { %v1023_v20 = vpop.f32.mrf.mxu3  ;;  %v874_v21 = vpop.f32.mrf.mxu2 }
 0x164   : > { %2606 = vmatmul.msk.bf16.gmra.mxu0 %vm353_vm1, %v1120_v17  ;;  %v3136_v22 = vadd.f32 %v1023_v20, %v874_v21  ;;  %v521_v27 = vmax.f32 %v481_v23, 0.0  ;;  %v758_v34 = vmax.f32 %v718_v24, 0.0 }
 0x169   : > { %v482_v25 = vpop.f32.mrf.mxu0  ;;  %v719_v29 = vpop.f32.mrf.mxu1 }
 0x16a   : > { %v483_v28 = vadd.f32 %v2972_v0, %v482_v25  ;;  %v720_v30 = vadd.f32 %v2972_v0, %v719_v29 }
 0x16b   : > { %v3142_v31 = vpop.f32.mrf.mxu3  ;;  %v3144_v33 = vpop.f32.mrf.mxu2 }
 0x16c   : > { %v522_v32 = vmax.f32 %v483_v28, 0.0  ;;  %v759_v35 = vmax.f32 %v720_v30, 0.0  ;;  %v1100_v28 = vld [vmem:[%s2903_s13 + $0x288] sm:$0xff] }
 0x16e   : > { %v540_v39 = vpack.c.bf16 %v522_v32, %v521_v27  ;;  %v777_v40 = vpack.c.bf16 %v759_v35, %v758_v34  ;;  %v1099_v27 = vld [vmem:[%s2903_s13 + $0x280] sm:$0xff] }
 0x16f   : > { %v1123_v32 = vpack.c.bf16 %v1100_v28, %v1099_v27 }
 0x170   : > { %2598 = vmatmul.msk.bf16.gmra.mxu3 %vm796_vm2, %v540_v39  ;;  %2574 = vmatmul.msk.bf16.gmra.mxu2 %vm796_vm2, %v777_v40 }
 0x171   : > { %v485_v42 = vpop.f32.mrf.mxu0  ;;  %v722_v43 = vpop.f32.mrf.mxu1 }
 0x172   : > { %v486_v47 = vadd.f32 %v2972_v0, %v485_v42  ;;  %v723_v48 = vadd.f32 %v2972_v0, %v722_v43 }
 0x173   : > { %v1028_v44 = vpop.f32.mrf.mxu3  ;;  %v879_v45 = vpop.f32.mrf.mxu2 }
 0x174   : > { %2607 = vmatmul.msk.bf16.gmra.mxu0 %vm353_vm1, %v1121_v41  ;;  %v3151_v46 = vadd.f32 %v1028_v44, %v879_v45  ;;  %v523_v51 = vmax.f32 %v486_v47, 0.0  ;;  %v760_v61 = vmax.f32 %v723_v48, 0.0  ;;  %v1501_v44 = vld [vmem:[%s2903_s13 + $0x300] sm:$0xff]  ;;  %v1502_v45 = vld [vmem:[%s2903_s13 + $0x308] sm:$0xff] }
 0x179   : > { %v487_v50 = vpop.f32.mrf.mxu0  ;;  %v724_v54 = vpop.f32.mrf.mxu1 }
 0x17a   : > { %v488_v52 = vadd.f32 %v2972_v0, %v487_v50  ;;  %v725_v55 = vadd.f32 %v2972_v0, %v724_v54  ;;  %v1102_v54 = vld [vmem:[%s2903_s13 + $0x298] sm:$0xff] }
 0x17b   : > { %v3157_v56 = vpop.f32.mrf.mxu3  ;;  %v3159_v58 = vpop.f32.mrf.mxu2 }
 0x17c   : > { %v524_v57 = vmax.f32 %v488_v52, 0.0  ;;  %v761_v62 = vmax.f32 %v725_v55, 0.0  ;;  %v1101_v52 = vld [vmem:[%s2903_s13 + $0x290] sm:$0xff] }
 0x17e   : > { %v541_v2 = vpack.c.bf16 %v524_v57, %v523_v51  ;;  %v778_v4 = vpack.c.bf16 %v761_v62, %v760_v61  ;;  %v1533_v51 = vpack.c.bf16 %v1502_v45, %v1501_v44  ;;  %v1124_v57 = vpack.c.bf16 %v1102_v54, %v1101_v52 }
 0x180   : > { %2599 = vmatmul.msk.bf16.gmra.mxu3 %vm796_vm2, %v541_v2  ;;  %2575 = vmatmul.msk.bf16.gmra.mxu2 %vm796_vm2, %v778_v4 }
 0x181   : > { %v490_v6 = vpop.f32.mrf.mxu0  ;;  %v727_v7 = vpop.f32.mrf.mxu1 }
 0x182   : > { %v491_v12 = vadd.f32 %v2972_v0, %v490_v6  ;;  %v728_v14 = vadd.f32 %v2972_v0, %v727_v7  ;;  %v1503_v6 = vld [vmem:[%s2903_s13 + $0x310] sm:$0xff]  ;;  %v1504_v7 = vld [vmem:[%s2903_s13 + $0x318] sm:$0xff] }
 0x183   : > { %v1033_v8 = vpop.f32.mrf.mxu3  ;;  %v884_v9 = vpop.f32.mrf.mxu2 }
 0x184   : > { %2608 = vmatmul.msk.bf16.gmra.mxu0 %vm353_vm1, %v1122_v5  ;;  %v3169_v10 = vadd.f32 %v1033_v8, %v884_v9  ;;  %v525_v16 = vmax.f32 %v491_v12, 0.0  ;;  %v762_v24 = vmax.f32 %v728_v14, 0.0  ;;  %v1534_v14 = vpack.c.bf16 %v1504_v7, %v1503_v6  ;;  %v1107_v6 = vld [vmem:[%s2903_s13 + $0x2c0] sm:$0xff]  ;;  %v1108_v7 = vld [vmem:[%s2903_s13 + $0x2c8] sm:$0xff] }
 0x189   : > { %v492_v15 = vpop.f32.mrf.mxu0  ;;  %v729_v18 = vpop.f32.mrf.mxu1 }
 0x18a   : > { %v493_v17 = vadd.f32 %v2972_v0, %v492_v15  ;;  %v730_v19 = vadd.f32 %v2972_v0, %v729_v18  ;;  %v1103_v15 = vld [vmem:[%s2903_s13 + $0x2a0] sm:$0xff] }
 0x18b   : > { %v3175_v20 = vpop.f32.mrf.mxu3  ;;  %v3177_v23 = vpop.f32.mrf.mxu2 }
 0x18c   : > { %v526_v21 = vmax.f32 %v493_v17, 0.0  ;;  %v763_v25 = vmax.f32 %v730_v19, 0.0 }
 0x18e   : > { %v542_v29 = vpack.c.bf16 %v526_v21, %v525_v16  ;;  %v779_v30 = vpack.c.bf16 %v763_v25, %v762_v24  ;;  %v1104_v16 = vld [vmem:[%s2903_s13 + $0x2a8] sm:$0xff] }
 0x18f   : > { %v1125_v18 = vpack.c.bf16 %v1104_v16, %v1103_v15 }
 0x190   : > { %2600 = vmatmul.msk.bf16.gmra.mxu3 %vm796_vm2, %v542_v29  ;;  %2576 = vmatmul.msk.bf16.gmra.mxu2 %vm796_vm2, %v779_v30 }
 0x191   : > { %v1188_v34 = vpop.f32.mrf.mxu0 }
 0x192   : > { %v1189_v40 = vadd.f32 %v2972_v0, %v1188_v34  ;;  %v1506_v34 = vld [vmem:[%s2903_s13 + $0x328] sm:$0xff] }
 0x193   : > { %v1038_v35 = vpop.f32.mrf.mxu3  ;;  %v889_v37 = vpop.f32.mrf.mxu2 }
 0x194   : > { %2609 = vmatmul.msk.bf16.gmra.mxu0 %vm353_vm1, %v1123_v32  ;;  %v3187_v39 = vadd.f32 %v1038_v35, %v889_v37  ;;  %v1268_v42 = vmax.f32 %v1189_v40, 0.0  ;;  %v1505_v32 = vld [vmem:[%s2903_s13 + $0x320] sm:$0xff] }
 0x195   : > { %v1535_v40 = vpack.c.bf16 %v1506_v34, %v1505_v32 }
 0x199   : > { %v1190_v41 = vpop.f32.mrf.mxu0 }
 0x19a   : > { %v1191_v43 = vadd.f32 %v2972_v0, %v1190_v41  ;;  %v1105_v41 = vld [vmem:[%s2903_s13 + $0x2b0] sm:$0xff] }
 0x19b   : > { %v3193_v47 = vpop.f32.mrf.mxu3  ;;  %v3195_v50 = vpop.f32.mrf.mxu2 }
 0x19c   : > { %v1269_v48 = vmax.f32 %v1191_v43, 0.0 }
 0x19e   : > { %v1300_v55 = vpack.c.bf16 %v1269_v48, %v1268_v42  ;;  %v1106_v42 = vld [vmem:[%s2903_s13 + $0x2b8] sm:$0xff] }
 0x19f   : > { %v1126_v44 = vpack.c.bf16 %v1106_v42, %v1105_v41  ;;  %v1110_v41 = vld [vmem:[%s2903_s13 + $0x2d8] sm:$0xff] }
 0x1a0   : > { %2625 = vmatmul.msk.bf16.vlgmr.msrb.gmra.mxu1 %vm796_vm2, %v1300_v55  ;;  %2641 = vmatmul.msk.bf16.vlgmr.msrb.gmra.mxu2 %vm353_vm1, %v1533_v51 }
 0x1a1   : > { %v1193_v59 = vpop.f32.mrf.mxu0 }
 0x1a2   : > { %v1194_v1 = vadd.f32 %v2972_v0, %v1193_v59 }
 0x1a3   : > { %v1043_v61 = vpop.f32.mrf.mxu3  ;;  %v894_v62 = vpop.f32.mrf.mxu2 }
 0x1a4   : > { %2610 = vmatmul.msk.bf16.gmra.mxu0 %vm353_vm1, %v1124_v57  ;;  %v3202_v63 = vadd.f32 %v1043_v61, %v894_v62  ;;  %v1270_v4 = vmax.f32 %v1194_v1, 0.0  ;;  %v1507_v61 = vld [vmem:[%s2903_s13 + $0x330] sm:$0xff]  ;;  %v1508_v62 = vld [vmem:[%s2903_s13 + $0x338] sm:$0xff] }
 0x1a9   : > { %v1195_v2 = vpop.f32.mrf.mxu0 }
 0x1aa   : > { %v1196_v5 = vadd.f32 %v2972_v0, %v1195_v2 }
 0x1ab   : > { %v3208_v8 = vpop.f32.mrf.mxu3  ;;  %v3210_v12 = vpop.f32.mrf.mxu2 }
 0x1ac   : > { %v1271_v9 = vmax.f32 %v1196_v5, 0.0  ;;  %v1536_v5 = vpack.c.bf16 %v1508_v62, %v1507_v61  ;;  %v1511_v61 = vld [vmem:[%s2903_s13 + $0x350] sm:$0xff]  ;;  %v1512_v62 = vld [vmem:[%s2903_s13 + $0x358] sm:$0xff] }
 0x1ae   : > { %v1301_v17 = vpack.c.bf16 %v1271_v9, %v1270_v4 }
 0x1b0   : > { %2626 = vmatmul.msk.bf16.gmra.mxu1 %vm796_vm2, %v1301_v17  ;;  %2642 = vmatmul.msk.bf16.gmra.mxu2 %vm353_vm1, %v1534_v14  ;;  %v1127_v14 = vpack.c.bf16 %v1108_v7, %v1107_v6  ;;  %v1538_v7 = vpack.c.bf16 %v1512_v62, %v1511_v61 }
 0x1b1   : > { %v1198_v19 = vpop.f32.mrf.mxu0 }
 0x1b2   : > { %v1199_v27 = vadd.f32 %v2972_v0, %v1198_v19 }
 0x1b3   : > { %v1048_v21 = vpop.f32.mrf.mxu3  ;;  %v899_v24 = vpop.f32.mrf.mxu2 }
 0x1b4   : > { %2611 = vmatmul.msk.bf16.gmra.mxu0 %vm353_vm1, %v1125_v18  ;;  %v3217_v25 = vadd.f32 %v1048_v21, %v899_v24  ;;  %v1272_v29 = vmax.f32 %v1199_v27, 0.0 }
 0x1b9   : > { %v1200_v28 = vpop.f32.mrf.mxu0 }
 0x1ba   : > { %v1201_v30 = vadd.f32 %v2972_v0, %v1200_v28  ;;  %v1509_v28 = vld [vmem:[%s2903_s13 + $0x340] sm:$0xff] }
 0x1bb   : > { %v3223_v35 = vpop.f32.mrf.mxu3  ;;  %v3225_v38 = vpop.f32.mrf.mxu2 }
 0x1bc   : > { %v1273_v37 = vmax.f32 %v1201_v30, 0.0 }
 0x1be   : > { %v1302_v43 = vpack.c.bf16 %v1273_v37, %v1272_v29  ;;  %v1510_v29 = vld [vmem:[%s2903_s13 + $0x348] sm:$0xff] }
 0x1bf   : > { %v1537_v37 = vpack.c.bf16 %v1510_v29, %v1509_v28 }
 0x1c0   : > { %2627 = vmatmul.msk.bf16.gmra.mxu1 %vm796_vm2, %v1302_v43  ;;  %2643 = vmatmul.msk.bf16.gmra.mxu2 %vm353_vm1, %v1535_v40  ;;  %v1109_v40 = vld [vmem:[%s2903_s13 + $0x2d0] sm:$0xff] }
 0x1c1   : > { %v1203_v45 = vpop.f32.mrf.mxu0  ;;  %v1128_v43 = vpack.c.bf16 %v1110_v41, %v1109_v40  ;;  %v1514_v40 = vld [vmem:[%s2903_s13 + $0x368] sm:$0xff] }
 0x1c2   : > { %v1204_v54 = vadd.f32 %v2972_v0, %v1203_v45 }
 0x1c3   : > { %v1053_v48 = vpop.f32.mrf.mxu3  ;;  %v904_v51 = vpop.f32.mrf.mxu2 }
 0x1c4   : > { %2612 = vmatmul.msk.bf16.gmra.mxu0 %vm353_vm1, %v1126_v44  ;;  %v3232_v52 = vadd.f32 %v1053_v48, %v904_v51  ;;  %v1274_v57 = vmax.f32 %v1204_v54, 0.0 }
 0x1c9   : > { %v1205_v55 = vpop.f32.mrf.mxu0 }
 0x1ca   : > { %v1206_v59 = vadd.f32 %v2972_v0, %v1205_v55 }
 0x1cb   : > { %v3238_v1 = vpop.f32.mrf.mxu3  ;;  %v3240_v4 = vpop.f32.mrf.mxu2 }
 0x1cc   : > { %v1275_v2 = vmax.f32 %v1206_v59, 0.0 }
 0x1ce   : > { %v1303_v9 = vpack.c.bf16 %v1275_v2, %v1274_v57 }
 0x1d0   : > { %2628 = vmatmul.msk.bf16.gmra.mxu1 %vm796_vm2, %v1303_v9  ;;  %2644 = vmatmul.msk.bf16.gmra.mxu2 %vm353_vm1, %v1536_v5  ;;  %v1111_v9 = vld [vmem:[%s2903_s13 + $0x2e0] sm:$0xff] }
 0x1d1   : > { %v1208_v15 = vpop.f32.mrf.mxu0 }
 0x1d2   : > { %v1209_v19 = vadd.f32 %v2972_v0, %v1208_v15 }
 0x1d3   : > { %v1058_v16 = vpop.f32.mrf.mxu3  ;;  %v909_v17 = vpop.f32.mrf.mxu2 }
 0x1d4   : > { %2613 = vmatmul.msk.bf16.gmra.mxu0 %vm353_vm1, %v1127_v14  ;;  %v3247_v18 = vadd.f32 %v1058_v16, %v909_v17  ;;  %v1276_v24 = vmax.f32 %v1209_v19, 0.0  ;;  %v1112_v14 = vld [vmem:[%s2903_s13 + $0x2e8] sm:$0xff] }
 0x1d5   : > { %v1129_v16 = vpack.c.bf16 %v1112_v14, %v1111_v9 }
 0x1d9   : > { %v1210_v21 = vpop.f32.mrf.mxu0 }
 0x1da   : > { %v1211_v27 = vadd.f32 %v2972_v0, %v1210_v21 }
 0x1db   : > { %v3253_v30 = vpop.f32.mrf.mxu3  ;;  %v3255_v34 = vpop.f32.mrf.mxu2 }
 0x1dc   : > { %v1277_v32 = vmax.f32 %v1211_v27, 0.0 }
 0x1de   : > { %v1304_v42 = vpack.c.bf16 %v1277_v32, %v1276_v24  ;;  %v3280_v24 = vld [vmem:[%s2898_s10] ss:$0 sm:$0xff] }
 0x1e0   : > { %2629 = vmatmul.msk.bf16.gmra.mxu1 %vm796_vm2, %v1304_v42  ;;  %2645 = vmatmul.msk.bf16.gmra.mxu2 %vm353_vm1, %v1537_v37  ;;  %v1513_v37 = vld [vmem:[%s2903_s13 + $0x360] sm:$0xff] }
 0x1e1   : > { %v1213_v44 = vpop.f32.mrf.mxu0 }
 0x1e2   : > { %v1214_v54 = vadd.f32 %v2972_v0, %v1213_v44  ;;  %v1539_v44 = vpack.c.bf16 %v1514_v40, %v1513_v37 }
 0x1e3   : > { %v1063_v45 = vpop.f32.mrf.mxu3  ;;  %v914_v48 = vpop.f32.mrf.mxu2 }
 0x1e4   : > { %2614 = vmatmul.msk.bf16.gmra.mxu0 %vm353_vm1, %v1128_v43  ;;  %v3262_v51 = vadd.f32 %v1063_v45, %v914_v48  ;;  %v1278_v57 = vmax.f32 %v1214_v54, 0.0  ;;  %v1113_v45 = vld [vmem:[%s2903_s13 + $0x2f0] sm:$0xff]  ;;  %v1114_v48 = vld [vmem:[%s2903_s13 + $0x2f8] sm:$0xff] }
 0x1e9   : > { %v1215_v55 = vpop.f32.mrf.mxu0 }
 0x1ea   : > { %v1216_v59 = vadd.f32 %v2972_v0, %v1215_v55  ;;  %v1130_v55 = vpack.c.bf16 %v1114_v48, %v1113_v45 }
 0x1eb   : > { %v3268_v2 = vpop.f32.mrf.mxu3  ;;  %v3270_v6 = vpop.f32.mrf.mxu2 }
 0x1ec   : > { %v1279_v5 = vmax.f32 %v1216_v59, 0.0 }
 0x1ee   : > { %v1305_v15 = vpack.c.bf16 %v1279_v5, %v1278_v57 }
 0x1f0   : > { %2630 = vmatmul.msk.bf16.gmra.mxu1 %vm796_vm2, %v1305_v15  ;;  %2646 = vmatmul.msk.bf16.gmra.mxu2 %vm353_vm1, %v1538_v7  ;;  %v1515_v15 = vld [vmem:[%s2903_s13 + $0x370] sm:$0xff] }
 0x1f1   : > { %v1218_v0 = vpop.f32.mrf.mxu0 }
 0x1f2   : > { %v1219_v27 = vadd.f32 %v3280_v24, %v1218_v0 }
 0x1f3   : > { %v1068_v17 = vpop.f32.mrf.mxu3  ;;  %v919_v19 = vpop.f32.mrf.mxu2 }
 0x1f4   : > { %2615 = vmatmul.msk.bf16.gmra.mxu0 %vm353_vm1, %v1129_v16  ;;  %v3277_v21 = vadd.f32 %v1068_v17, %v919_v19  ;;  %v1280_v29 = vmax.f32 %v1219_v27, 0.0  ;;  %v1516_v16 = vld [vmem:[%s2903_s13 + $0x378] sm:$0xff] }
 0x1f5   : > { %v1540_v27 = vpack.c.bf16 %v1516_v16, %v1515_v15 }
 0x1f9   : > { %v1220_v28 = vpop.f32.mrf.mxu0 }
 0x1fa   : > { %v1221_v32 = vadd.f32 %v3280_v24, %v1220_v28 }
 0x1fb   : > { %v3286_v41 = vpop.f32.mrf.mxu3  ;;  %v3288_v43 = vpop.f32.mrf.mxu2 }
 0x1fc   : > { %v1281_v42 = vmax.f32 %v1221_v32, 0.0 }
 0x1fe   : > { %v1306_v54 = vpack.c.bf16 %v1281_v42, %v1280_v29 }
 0x200   : > { %2631 = vmatmul.msk.bf16.gmra.mxu1 %vm796_vm2, %v1306_v54  ;;  %2647 = vmatmul.msk.bf16.gmra.mxu2 %vm353_vm1, %v1539_v44  ;;  %v1517_v54 = vld [vmem:[%s2903_s13 + $0x380] sm:$0xff] }
 0x201   : > { %v1223_v57 = vpop.f32.mrf.mxu0 }
 0x202   : > { %v1224_v5 = vadd.f32 %v3280_v24, %v1223_v57 }
 0x203   : > { %v1073_v59 = vpop.f32.mrf.mxu3  ;;  %v924_v61 = vpop.f32.mrf.mxu2 }
 0x204   : > { %2616 = vmatmul.msk.bf16.gmra.mxu0 %vm353_vm1, %v1130_v55  ;;  %v3295_v62 = vadd.f32 %v1073_v59, %v924_v61  ;;  %v1282_v9 = vmax.f32 %v1224_v5, 0.0  ;;  %v1518_v55 = vld [vmem:[%s2903_s13 + $0x388] sm:$0xff] }
 0x205   : > { %v1541_v5 = vpack.c.bf16 %v1518_v55, %v1517_v54 }
 0x209   : > { %v1225_v7 = vpop.f32.mrf.mxu0 }
 0x20a   : > { %v1226_v14 = vadd.f32 %v3280_v24, %v1225_v7 }
 0x20b   : > { %v3301_v0 = vpop.f32.mrf.mxu3  ;;  %v3303_v19 = vpop.f32.mrf.mxu2 }
 0x20c   : > { %v1283_v17 = vmax.f32 %v1226_v14, 0.0 }
 0x20e   : > { %v1307_v28 = vpack.c.bf16 %v1283_v17, %v1282_v9 }
 0x210   : > { %2632 = vmatmul.msk.bf16.gmra.mxu1 %vm796_vm2, %v1307_v28  ;;  %2648 = vmatmul.msk.bf16.gmra.mxu2 %vm353_vm1, %v1540_v27 }
 0x211   : > { %v1228_v29 = vpop.f32.mrf.mxu0 }
 0x212   : > { %v1229_v42 = vadd.f32 %v3280_v24, %v1228_v29 }
 0x213   : > { %v1078_v32 = vpop.f32.mrf.mxu3  ;;  %v929_v37 = vpop.f32.mrf.mxu2 }
 0x214   : > { %v3307_v40 = vadd.f32 %v1078_v32, %v929_v37  ;;  %v1284_v45 = vmax.f32 %v1229_v42, 0.0  ;;  %v1519_v37 = vld [vmem:[%s2903_s13 + $0x390] sm:$0xff]  ;;  %v1520_v42 = vld [vmem:[%s2903_s13 + $0x398] sm:$0xff] }
 0x215   : > { %v1542_v55 = vpack.c.bf16 %v1520_v42, %v1519_v37  ;;  %v1521_v37 = vld [vmem:[%s2903_s13 + $0x3a0] sm:$0xff]  ;;  %v1522_v42 = vld [vmem:[%s2903_s13 + $0x3a8] sm:$0xff] }
 0x219   : > { %v1230_v44 = vpop.f32.mrf.mxu0 }
 0x21a   : > { %v1231_v48 = vadd.f32 %v3280_v24, %v1230_v44 }
 0x21b   : > { %v3313_v59 = vpop.f32.mrf.mxu2 }
 0x21c   : > { %v1285_v57 = vmax.f32 %v1231_v48, 0.0 }
 0x21d   : > { %v1389_v61 = vpop.f32.mrf.mxu1 }
 0x21e   : > { %v1308_v7 = vpack.c.bf16 %v1285_v57, %v1284_v45  ;;  %v3316_v9 = vadd.f32 %v1389_v61, %v3084_v53 }
 0x220   : > { %2633 = vmatmul.msk.bf16.gmra.mxu1 %vm796_vm2, %v1308_v7  ;;  %2649 = vmatmul.msk.bf16.gmra.mxu2 %vm353_vm1, %v1541_v5 }
 0x221   : > { %v1233_v14 = vpop.f32.mrf.mxu0 }
 0x222   : > { %v1234_v17 = vadd.f32 %v3280_v24, %v1233_v14 }
 0x223   : > { %v1606_v15 = vpop.f32.mrf.mxu2 }
 0x224   : > { %v1286_v29 = vmax.f32 %v1234_v17, 0.0  ;;  %v1607_v53 = vadd.f32 %v3280_v24, %v1606_v15 }
 0x225   : > { %v1391_v16 = vpop.f32.mrf.mxu1 }
 0x226   : > { %v3322_v27 = vadd.f32 %v1391_v16, %v3090_v3  ;;  %v1686_v3 = vmax.f32 %v1607_v53, 0.0 }
 0x229   : > { %v1235_v28 = vpop.f32.mrf.mxu0 }
 0x22a   : > { %v1236_v32 = vadd.f32 %v3280_v24, %v1235_v28 }
 0x22b   : > { %v1608_v45 = vpop.f32.mrf.mxu2 }
 0x22c   : > { %v1287_v44 = vmax.f32 %v1236_v32, 0.0  ;;  %v1609_v48 = vadd.f32 %v3280_v24, %v1608_v45 }
 0x22d   : > { %v1394_v54 = vpop.f32.mrf.mxu1 }
 0x22e   : > { %v1309_v57 = vpack.c.bf16 %v1287_v44, %v1286_v29  ;;  %v3330_v61 = vadd.f32 %v1394_v54, %v3097_v13  ;;  %v1687_v5 = vmax.f32 %v1609_v48, 0.0 }
 0x230   : > { %2634 = vmatmul.msk.bf16.gmra.mxu1 %vm796_vm2, %v1309_v57  ;;  %v1718_v7 = vpack.c.bf16 %v1687_v5, %v1686_v3  ;;  %2650 = vmatmul.msk.bf16.gmra.mxu2 %vm353_vm1, %v1542_v55  ;;  %v1543_v55 = vpack.c.bf16 %v1522_v42, %v1521_v37  ;;  %v1523_v37 = vld [vmem:[%s2903_s13 + $0x3b0] sm:$0xff]  ;;  %v1524_v42 = vld [vmem:[%s2903_s13 + $0x3b8] sm:$0xff] }
 0x231   : > { %v1238_v14 = vpop.f32.mrf.mxu0 }
 0x232   : > { %2665 = vmatmul.msk.bf16.vlgmr.msrb.gmra.mxu3 %vm796_vm2, %v1718_v7  ;;  %v1239_v17 = vadd.f32 %v3280_v24, %v1238_v14 }
 0x233   : > { %v1611_v15 = vpop.f32.mrf.mxu2 }
 0x234   : > { %v1288_v29 = vmax.f32 %v1239_v17, 0.0  ;;  %v1612_v53 = vadd.f32 %v3280_v24, %v1611_v15 }
 0x235   : > { %v1396_v16 = vpop.f32.mrf.mxu1 }
 0x236   : > { %v3337_v28 = vadd.f32 %v1396_v16, %v3103_v26  ;;  %v1688_v26 = vmax.f32 %v1612_v53, 0.0 }
 0x239   : > { %v1240_v13 = vpop.f32.mrf.mxu0 }
 0x23a   : > { %v1241_v32 = vadd.f32 %v3280_v24, %v1240_v13 }
 0x23b   : > { %v1613_v45 = vpop.f32.mrf.mxu2 }
 0x23c   : > { %v1289_v44 = vmax.f32 %v1241_v32, 0.0  ;;  %v1614_v48 = vadd.f32 %v3280_v24, %v1613_v45 }
 0x23d   : > { %v1399_v54 = vpop.f32.mrf.mxu1 }
 0x23e   : > { %v1310_v57 = vpack.c.bf16 %v1289_v44, %v1288_v29  ;;  %v3345_v3 = vadd.f32 %v1399_v54, %v3110_v36  ;;  %v1689_v5 = vmax.f32 %v1614_v48, 0.0 }
 0x240   : > { %2635 = vmatmul.msk.bf16.gmra.mxu1 %vm796_vm2, %v1310_v57  ;;  %v1719_v7 = vpack.c.bf16 %v1689_v5, %v1688_v26  ;;  %2651 = vmatmul.msk.bf16.gmra.mxu2 %vm353_vm1, %v1543_v55  ;;  %v1544_v55 = vpack.c.bf16 %v1524_v42, %v1523_v37  ;;  %v1525_v37 = vld [vmem:[%s2903_s13 + $0x3c0] sm:$0xff]  ;;  %v1526_v42 = vld [vmem:[%s2903_s13 + $0x3c8] sm:$0xff] }
 0x241   : > { %v1243_v14 = vpop.f32.mrf.mxu0 }
 0x242   : > { %2666 = vmatmul.msk.bf16.gmra.mxu3 %vm796_vm2, %v1719_v7  ;;  %v1244_v17 = vadd.f32 %v3280_v24, %v1243_v14 }
 0x243   : > { %v1616_v15 = vpop.f32.mrf.mxu2 }
 0x244   : > { %v1290_v29 = vmax.f32 %v1244_v17, 0.0  ;;  %v1617_v53 = vadd.f32 %v3280_v24, %v1616_v15 }
 0x245   : > { %v1401_v16 = vpop.f32.mrf.mxu1 }
 0x246   : > { %v3352_v13 = vadd.f32 %v1401_v16, %v3116_v49  ;;  %v1690_v49 = vmax.f32 %v1617_v53, 0.0 }
 0x249   : > { %v1245_v36 = vpop.f32.mrf.mxu0 }
 0x24a   : > { %v1246_v32 = vadd.f32 %v3280_v24, %v1245_v36 }
 0x24b   : > { %v1618_v45 = vpop.f32.mrf.mxu2 }
 0x24c   : > { %v1291_v44 = vmax.f32 %v1246_v32, 0.0  ;;  %v1619_v48 = vadd.f32 %v3280_v24, %v1618_v45 }
 0x24d   : > { %v1404_v54 = vpop.f32.mrf.mxu1 }
 0x24e   : > { %v1311_v57 = vpack.c.bf16 %v1291_v44, %v1290_v29  ;;  %v3360_v26 = vadd.f32 %v1404_v54, %v3123_v60  ;;  %v1691_v5 = vmax.f32 %v1619_v48, 0.0  ;;  %v1545_v54 = vpack.c.bf16 %v1526_v42, %v1525_v37 }
 0x250   : > { %2636 = vmatmul.msk.bf16.gmra.mxu1 %vm796_vm2, %v1311_v57  ;;  %v1720_v7 = vpack.c.bf16 %v1691_v5, %v1690_v49  ;;  %2652 = vmatmul.msk.bf16.gmra.mxu2 %vm353_vm1, %v1544_v55 }
 0x251   : > { %v1248_v14 = vpop.f32.mrf.mxu0 }
 0x252   : > { %2667 = vmatmul.msk.bf16.gmra.mxu3 %vm796_vm2, %v1720_v7  ;;  %v1249_v17 = vadd.f32 %v3280_v24, %v1248_v14 }
 0x253   : > { %v1621_v15 = vpop.f32.mrf.mxu2 }
 0x254   : > { %v1292_v29 = vmax.f32 %v1249_v17, 0.0  ;;  %v1622_v53 = vadd.f32 %v3280_v24, %v1621_v15  ;;  %v2785_v15 = vld [vmem:[%s3633_s5 + $0x58] sm:$0xff] }
 0x255   : > { %v1406_v16 = vpop.f32.mrf.mxu1  ;;  %2274 = vmatpush.bf16.msra.mxu2 %v2785_v15 }
 0x256   : > { %v3367_v36 = vadd.f32 %v1406_v16, %v3129_v11  ;;  %v1692_v57 = vmax.f32 %v1622_v53, 0.0 }
 0x259   : > { %v1250_v60 = vpop.f32.mrf.mxu0 }
 0x25a   : > { %v1251_v32 = vadd.f32 %v3280_v24, %v1250_v60 }
 0x25b   : > { %v1623_v45 = vpop.f32.mrf.mxu2 }
 0x25c   : > { %v1293_v44 = vmax.f32 %v1251_v32, 0.0  ;;  %v1624_v48 = vadd.f32 %v3280_v24, %v1623_v45  ;;  %v1528_v32 = vld [vmem:[%s2903_s13 + $0x3d8] sm:$0xff] }
 0x25e   : > { %v1312_v55 = vpack.c.bf16 %v1293_v44, %v1292_v29  ;;  %v1693_v49 = vmax.f32 %v1624_v48, 0.0  ;;  %v1527_v29 = vld [vmem:[%s2903_s13 + $0x3d0] sm:$0xff] }
 0x25f   : > { %v1546_v45 = vpack.c.bf16 %v1528_v32, %v1527_v29  ;;  %v1529_v29 = vld [vmem:[%s2903_s13 + $0x3e0] sm:$0xff]  ;;  %v1530_v32 = vld [vmem:[%s2903_s13 + $0x3e8] sm:$0xff] }
 0x260   : > { %2637 = vmatmul.msk.bf16.gmra.mxu1 %vm796_vm2, %v1312_v55  ;;  %v1721_v11 = vpack.c.bf16 %v1693_v49, %v1692_v57  ;;  %2653 = vmatmul.msk.bf16.gmra.mxu2 %vm353_vm1, %v1545_v54  ;;  %v2789_v54 = vld [vmem:[%s3633_s5 + $0x78] sm:$0xff] }
 0x261   : > { %v1253_v5 = vpop.f32.mrf.mxu0  ;;  %2375 = vmatpush.bf16.msra.mxu3 %v2789_v54 }
 0x262   : > { %2668 = vmatmul.msk.bf16.gmra.mxu3 %vm796_vm2, %v1721_v11  ;;  %v1254_v14 = vadd.f32 %v3280_v24, %v1253_v5  ;;  %v2781_v5 = vld [vmem:[%s3633_s5 + $0x38] sm:$0xff] }
 0x263   : > { %v1626_v7 = vpop.f32.mrf.mxu2  ;;  %2096 = vmatpush.bf16.msra.mxu0 %v2781_v5 }
 0x264   : > { %v1294_v17 = vmax.f32 %v1254_v14, 0.0  ;;  %v1627_v37 = vadd.f32 %v3280_v24, %v1626_v7  ;;  %v2777_v7 = vld [vmem:[%s3633_s5 + $0x18] sm:$0xff] }
 0x265   : > { %2181 = vmatpush.bf16.msra.mxu1 %v2777_v7 }
 0x266   : > { %v1694_v55 = vmax.f32 %v1627_v37, 0.0 }
 0x269   : > { %v1255_v16 = vpop.f32.mrf.mxu0 }
 0x26a   : > { %v1256_v60 = vadd.f32 %v3280_v24, %v1255_v16 }
 0x26b   : > { %v1628_v53 = vpop.f32.mrf.mxu2 }
 0x26c   : > { %v1295_v42 = vmax.f32 %v1256_v60, 0.0  ;;  %v1629_v44 = vadd.f32 %v3280_v24, %v1628_v53 }
 0x26e   : > { %v1313_v48 = vpack.c.bf16 %v1295_v42, %v1294_v17  ;;  %v1695_v57 = vmax.f32 %v1629_v44, 0.0 }
 0x270   : > { %2638 = vmatmul.msk.bf16.gmra.mxu1 %vm796_vm2, %v1313_v48  ;;  %v1722_v49 = vpack.c.bf16 %v1695_v57, %v1694_v55  ;;  %2654 = vmatmul.msk.bf16.gmra.mxu2 %vm353_vm1, %v1546_v45  ;;  %v1547_v45 = vpack.c.bf16 %v1530_v32, %v1529_v29 }
 0x271   : > { %v1258_v11 = vpop.f32.mrf.mxu0 }
 0x272   : > { %2669 = vmatmul.msk.bf16.gmra.mxu3 %vm796_vm2, %v1722_v49  ;;  %v1259_v15 = vadd.f32 %v3280_v24, %v1258_v11 }
 0x273   : > { %v1631_v14 = vpop.f32.mrf.mxu2 }
 0x274   : > { %v1296_v17 = vmax.f32 %v1259_v15, 0.0  ;;  %v1632_v37 = vadd.f32 %v3280_v24, %v1631_v14 }
 0x276   : > { %v1696_v54 = vmax.f32 %v1632_v37, 0.0 }
 0x279   : > { %v1260_v16 = vpop.f32.mrf.mxu0 }
 0x27a   : > { %v1261_v60 = vadd.f32 %v3280_v24, %v1260_v16  ;;  %v1531_v16 = vld [vmem:[%s2903_s13 + $0x3f0] sm:$0xff] }
 0x27b   : > { %v1633_v53 = vpop.f32.mrf.mxu2 }
 0x27c   : > { %v1297_v42 = vmax.f32 %v1261_v60, 0.0  ;;  %v1634_v44 = vadd.f32 %v3280_v24, %v1633_v53  ;;  %v1532_v60 = vld [vmem:[%s2903_s13 + $0x3f8] sm:$0xff] }
 0x27e   : > { %v1314_v48 = vpack.c.bf16 %v1297_v42, %v1296_v17  ;;  %v1697_v55 = vmax.f32 %v1634_v44, 0.0  ;;  %v1548_v42 = vpack.c.bf16 %v1532_v60, %v1531_v16  ;;  %v2774_v60 = vld [vmem:[%s3633_s5] sm:$0xff] }
 0x280   : > { %2639 = vmatmul.msk.bf16.gmra.mxu1 %vm796_vm2, %v1314_v48  ;;  %v1723_v57 = vpack.c.bf16 %v1697_v55, %v1696_v54  ;;  %2655 = vmatmul.msk.bf16.gmra.mxu2 %vm353_vm1, %v1547_v45 }
 0x281   : > { %v1263_v49 = vpop.f32.mrf.mxu0 }
 0x282   : > { %2670 = vmatmul.msk.bf16.gmra.mxu3 %vm796_vm2, %v1723_v57  ;;  %v1264_v5 = vadd.f32 %v3280_v24, %v1263_v49 }
 0x283   : > { %v1636_v11 = vpop.f32.mrf.mxu2 }
 0x284   : > { %v1298_v14 = vmax.f32 %v1264_v5, 0.0  ;;  %v1637_v17 = vadd.f32 %v3280_v24, %v1636_v11  ;;  %v2776_v11 = vld [vmem:[%s3633_s5 + $0x10] sm:$0xff] }
 0x285   : > { %2182 = vmatpush.bf16.msra.mxu1 %v2776_v11 }
 0x286   : > { %v1698_v44 = vmax.f32 %v1637_v17, 0.0 }
 0x289   : > { %v1265_v7 = vpop.f32.mrf.mxu0 }
 0x28a   : > { %v1266_v15 = vadd.f32 %v3280_v24, %v1265_v7 }
 0x28b   : > { %v1638_v32 = vpop.f32.mrf.mxu2 }
 0x28c   : > { %v1299_v29 = vmax.f32 %v1266_v15, 0.0  ;;  %v1639_v37 = vadd.f32 %v3280_v24, %v1638_v32  ;;  %v2775_v15 = vld [vmem:[%s3633_s5 + $0x8] sm:$0xff] }
 0x28d   : > { %2183 = vmatpush.bf16.msra.mxu1 %v2775_v15 }
 0x28e   : > { %v1315_v53 = vpack.c.bf16 %v1299_v29, %v1298_v14  ;;  %v1699_v45 = vmax.f32 %v1639_v37, 0.0  ;;  %v3430_v37 = vpop.f32.mrf.mxu3 }
 0x28f   : > { %3636 = vst [vmem:[#allocation2_spill] sm:$0xff] %v3430_v37 }
 0x290   : > { %2640 = vmatmul.msk.bf16.gmra.mxu1 %vm796_vm2, %v1315_v53  ;;  %v1724_v48 = vpack.c.bf16 %v1699_v45, %v1698_v44  ;;  %2656 = vmatmul.msk.bf16.gmra.mxu2 %vm353_vm1, %v1548_v42  ;;  %v2784_v44 = vld [vmem:[%s3633_s5 + $0x50] sm:$0xff] }
 0x291   : > { %2184 = vmatpush.bf16.msra.mxu1 %v2774_v60  ;;  %v2788_v45 = vld [vmem:[%s3633_s5 + $0x70] sm:$0xff]  ;;  %2275 = vmatpush.bf16.msra.mxu2 %v2784_v44 }
 0x292   : > { %2671 = vmatmul.msk.bf16.gmra.mxu3 %vm796_vm2, %v1724_v48 }
 0x293   : > { %v1641_v54 = vpop.f32.mrf.mxu2  ;;  %2376 = vmatpush.bf16.msra.mxu3 %v2788_v45 }
 0x294   : > { %v1642_v55 = vadd.f32 %v3280_v24, %v1641_v54  ;;  %v2780_v54 = vld [vmem:[%s3633_s5 + $0x30] sm:$0xff] }
 0x295   : > { %2097 = vmatpush.bf16.msra.mxu0 %v2780_v54 }
 0x296   : > { %v1700_v5 = vmax.f32 %v1642_v55, 0.0 }
 0x29b   : > { %v1643_v57 = vpop.f32.mrf.mxu2 }
 0x29c   : > { %v1644_v49 = vadd.f32 %v3280_v24, %v1643_v57  ;;  %v3442_v57 = vpop.f32.mrf.mxu1 }
 0x29e   : > { %v1701_v7 = vmax.f32 %v1644_v49, 0.0 }
 0x2a0   : > { %v1725_v14 = vpack.c.bf16 %v1701_v7, %v1700_v5  ;;  %v3448_v5 = vld [vmem:[%s3632_s4] ss:$0 sm:$0xff] }
 0x2a2   : > { %2672 = vmatmul.msk.bf16.gmra.mxu3 %vm796_vm2, %v1725_v14 }
 0x2a3   : > { %v1646_v16 = vpop.f32.mrf.mxu2 }
 0x2a4   : > { %v1647_v17 = vadd.f32 %v3280_v24, %v1646_v16 }
 0x2a6   : > { %v1702_v42 = vmax.f32 %v1647_v17, 0.0  ;;  %v3453_v17 = vpop.f32.mrf.mxu1 }
 0x2ab   : > { %v1648_v29 = vpop.f32.mrf.mxu2 }
 0x2ac   : > { %v1649_v32 = vadd.f32 %v3280_v24, %v1648_v29 }
 0x2ae   : > { %v1703_v53 = vmax.f32 %v1649_v32, 0.0 }
 0x2b0   : > { %v1726_v48 = vpack.c.bf16 %v1703_v53, %v1702_v42 }
 0x2b2   : > { %2673 = vmatmul.msk.bf16.gmra.mxu3 %vm796_vm2, %v1726_v48 }
 0x2b3   : > { %v1651_v55 = vpop.f32.mrf.mxu2 }
 0x2b4   : > { %v1652_v7 = vadd.f32 %v3280_v24, %v1651_v55 }
 0x2b5   : > { %v1807_v49 = vpop.f32.mrf.mxu3 }
 0x2b6   : > { %v1887_v11 = vadd.f32 %v1807_v49, %v3316_v9  ;;  %v1704_v29 = vmax.f32 %v1652_v7, 0.0  ;;  %v3459_v7 = vpop.f32.mrf.mxu1 }
 0x2b8   : > { %v1923_v14 = vadd.f32 %v3448_v5, %v1887_v11 }
 0x2ba   : > { %v1955_v32 = vmax.f32 %v1923_v14, 0.0 }
 0x2bb   : > { %v1653_v15 = vpop.f32.mrf.mxu2 }
 0x2bc   : > { %v1654_v16 = vadd.f32 %v3280_v24, %v1653_v15  ;;  %v1987_v45 = vpack.c.bf16 %v1955_v32, %v1955_v32 }
 0x2bd   : > { %v1809_v60 = vpop.f32.mrf.mxu3 }
 0x2be   : > { %v1705_v42 = vmax.f32 %v1654_v16, 0.0  ;;  %v1888_v9 = vadd.f32 %v1809_v60, %v3322_v27  ;;  %v2129_v11 = vunpack.c.l.b16 %v1987_v45 }
 0x2c0   : > { %v1727_v53 = vpack.c.bf16 %v1705_v42, %v1704_v29  ;;  %v1924_v44 = vadd.f32 %v3448_v5, %v1888_v9 }
 0x2c2   : > { %v1956_v48 = vmax.f32 %v1924_v44, 0.0  ;;  %2674 = vmatmul.msk.bf16.gmra.mxu3 %vm796_vm2, %v1727_v53 }
 0x2c3   : > { %v1656_v54 = vpop.f32.mrf.mxu2 }
 0x2c4   : > { %v1988_v55 = vpack.c.bf16 %v1956_v48, %v1956_v48  ;;  %v1657_v27 = vadd.f32 %v3280_v24, %v1656_v54  ;;  %v3467_v48 = vpop.f32.mrf.mxu1 }
 0x2c5   : > { %v1812_v49 = vpop.f32.mrf.mxu3 }
 0x2c6   : > { %v2130_v15 = vunpack.c.l.b16 %v1988_v55  ;;  %v1889_v37 = vadd.f32 %v1812_v49, %v3330_v61  ;;  %v1706_v42 = vmax.f32 %v1657_v27, 0.0 }
 0x2c8   : > { %v2137_v14 = vpack.c.b16 %v2130_v15, %v2129_v11  ;;  %v1925_v16 = vadd.f32 %v3448_v5, %v1889_v37 }
 0x2ca   : > { %2717 = vmatmul.msk.bf16.vlgmr.msra.gmra.mxu1 %vm2079_vm3, %v2137_v14  ;;  %v1957_v9 = vmax.f32 %v1925_v16, 0.0 }
 0x2cb   : > { %v1658_v60 = vpop.f32.mrf.mxu2 }
 0x2cc   : > { %v1659_v29 = vadd.f32 %v3280_v24, %v1658_v60  ;;  %v1989_v55 = vpack.c.bf16 %v1957_v9, %v1957_v9 }
 0x2cd   : > { %v1814_v32 = vpop.f32.mrf.mxu3 }
 0x2ce   : > { %v1707_v53 = vmax.f32 %v1659_v29, 0.0  ;;  %v1890_v44 = vadd.f32 %v1814_v32, %v3337_v28  ;;  %v2131_v15 = vunpack.c.l.b16 %v1989_v55  ;;  %v3474_v32 = vpop.f32.mrf.mxu1 }
 0x2d0   : > { %v1728_v61 = vpack.c.bf16 %v1707_v53, %v1706_v42  ;;  %v1926_v45 = vadd.f32 %v3448_v5, %v1890_v44 }
 0x2d2   : > { %v1958_v54 = vmax.f32 %v1926_v45, 0.0  ;;  %2675 = vmatmul.msk.bf16.gmra.mxu3 %vm796_vm2, %v1728_v61 }
 0x2d3   : > { %v1661_v37 = vpop.f32.mrf.mxu2 }
 0x2d4   : > { %v1990_v49 = vpack.c.bf16 %v1958_v54, %v1958_v54  ;;  %v1662_v60 = vadd.f32 %v3280_v24, %v1661_v37  ;;  %v2779_v54 = vld [vmem:[%s3633_s5 + $0x28] sm:$0xff] }
 0x2d5   : > { %v1817_v11 = vpop.f32.mrf.mxu3  ;;  %2098 = vmatpush.bf16.msra.mxu0 %v2779_v54 }
 0x2d6   : > { %v2132_v14 = vunpack.c.l.b16 %v1990_v49  ;;  %v1891_v27 = vadd.f32 %v1817_v11, %v3345_v3  ;;  %v1708_v53 = vmax.f32 %v1662_v60, 0.0 }
 0x2d8   : > { %v2138_v16 = vpack.c.b16 %v2132_v14, %v2131_v15  ;;  %v1927_v28 = vadd.f32 %v3448_v5, %v1891_v27  ;;  %v2778_v27 = vld [vmem:[%s3633_s5 + $0x20] sm:$0xff] }
 0x2d9   : > { %2099 = vmatpush.bf16.msra.mxu0 %v2778_v27 }
 0x2da   : > { %2718 = vmatmul.msk.bf16.gmra.mxu1 %vm2079_vm3, %v2138_v16  ;;  %v1959_v44 = vmax.f32 %v1927_v28, 0.0 }
 0x2db   : > { %v1663_v29 = vpop.f32.mrf.mxu2 }
 0x2dc   : > { %v1664_v42 = vadd.f32 %v3280_v24, %v1663_v29  ;;  %v1991_v37 = vpack.c.bf16 %v1959_v44, %v1959_v44 }
 0x2dd   : > { %v1819_v9 = vpop.f32.mrf.mxu3 }
 0x2de   : > { %v1709_v61 = vmax.f32 %v1664_v42, 0.0  ;;  %v1892_v45 = vadd.f32 %v1819_v9, %v3352_v13  ;;  %v3486_v13 = vpop.f32.mrf.mxu1  ;;  %v2133_v16 = vunpack.c.l.b16 %v1991_v37  ;;  %v2787_v37 = vld [vmem:[%s3633_s5 + $0x68] sm:$0xff] }
 0x2df   : > { %2377 = vmatpush.bf16.msra.mxu3 %v2787_v37 }
 0x2e0   : > { %v1729_v55 = vpack.c.bf16 %v1709_v61, %v1708_v53  ;;  %v1928_v3 = vadd.f32 %v3448_v5, %v1892_v45 }
 0x2e2   : > { %v1960_v49 = vmax.f32 %v1928_v3, 0.0  ;;  %2676 = vmatmul.msk.bf16.gmra.mxu3 %vm796_vm2, %v1729_v55 }
 0x2e3   : > { %v1666_v11 = vpop.f32.mrf.mxu2 }
 0x2e4   : > { %v1992_v15 = vpack.c.bf16 %v1960_v49, %v1960_v49  ;;  %v1667_v42 = vadd.f32 %v3280_v24, %v1666_v11 }
 0x2e5   : > { %v1822_v14 = vpop.f32.mrf.mxu3 }
 0x2e6   : > { %v2134_v60 = vunpack.c.l.b16 %v1992_v15  ;;  %v1893_v28 = vadd.f32 %v1822_v14, %v3360_v26  ;;  %v1710_v45 = vmax.f32 %v1667_v42, 0.0  ;;  %v2783_v26 = vld [vmem:[%s3633_s5 + $0x48] sm:$0xff]  ;;  %v3500_v49 = vpop.f32.mrf.mxu1 }
 0x2e7   : > { %2276 = vmatpush.bf16.msra.mxu2 %v2783_v26 }
 0x2e8   : > { %v2139_v29 = vpack.c.b16 %v2134_v60, %v2133_v16  ;;  %v1929_v9 = vadd.f32 %v3448_v5, %v1893_v28  ;;  %v1477_v16 = vadd.f32 %v3442_v57, %v3136_v22 }
 0x2ea   : > { %2719 = vmatmul.msk.bf16.gmra.mxu1 %vm2079_vm3, %v2139_v29  ;;  %v1961_v55 = vmax.f32 %v1929_v9, 0.0 }
 0x2eb   : > { %v1668_v53 = vpop.f32.mrf.mxu2 }
 0x2ec   : > { %v1669_v44 = vadd.f32 %v3280_v24, %v1668_v53  ;;  %v1993_v14 = vpack.c.bf16 %v1961_v55, %v1961_v55 }
 0x2ed   : > { %v1824_v61 = vpop.f32.mrf.mxu3 }
 0x2ee   : > { %v1711_v3 = vmax.f32 %v1669_v44, 0.0  ;;  %v1894_v54 = vadd.f32 %v1824_v61, %v3367_v36  ;;  %v2135_v29 = vunpack.c.l.b16 %v1993_v14  ;;  %v1026_v44 = vadd.f32 %v3142_v31, %v3144_v33  ;;  %v3508_v61 = vpop.f32.mrf.mxu1 }
 0x2f0   : > { %v1730_v11 = vpack.c.bf16 %v1711_v3, %v1710_v45  ;;  %v1930_v15 = vadd.f32 %v3448_v5, %v1894_v54  ;;  %v1478_v22 = vadd.f32 %v3453_v17, %v1026_v44 }
 0x2f2   : > { %v1962_v27 = vmax.f32 %v1930_v15, 0.0  ;;  %2677 = vmatmul.msk.bf16.gmra.mxu3 %vm796_vm2, %v1730_v11 }
 0x2f3   : > { %v1671_v36 = vpop.f32.mrf.mxu2 }
 0x2f4   : > { %v1994_v60 = vpack.c.bf16 %v1962_v27, %v1962_v27  ;;  %v1672_v45 = vadd.f32 %v3280_v24, %v1671_v36 }
 0x2f5   : > { %v1827_v28 = vpop.f32.mrf.mxu3 }
 0x2f6   : > { %v2136_v42 = vunpack.c.l.b16 %v1994_v60  ;;  %v1895_v9 = vadd.f32 %v1827_v28, %v1477_v16  ;;  %v1712_v26 = vmax.f32 %v1672_v45, 0.0  ;;  %v1479_v16 = vadd.f32 %v3459_v7, %v3151_v46 }
 0x2f8   : > { %v2140_v53 = vpack.c.b16 %v2136_v42, %v2135_v29  ;;  %v1931_v55 = vadd.f32 %v3448_v5, %v1895_v9 }
 0x2fa   : > { %2720 = vmatmul.msk.bf16.gmra.mxu1 %vm2079_vm3, %v2140_v53  ;;  %v1963_v37 = vmax.f32 %v1931_v55, 0.0  ;;  %v1031_v53 = vadd.f32 %v3157_v56, %v3159_v58 }
 0x2fb   : > { %v1673_v3 = vpop.f32.mrf.mxu2 }
 0x2fc   : > { %v1674_v57 = vadd.f32 %v3280_v24, %v1673_v3  ;;  %v1995_v33 = vpack.c.bf16 %v1963_v37, %v1963_v37  ;;  %v1480_v3 = vadd.f32 %v3467_v48, %v1031_v53 }
 0x2fd   : > { %v1829_v54 = vpop.f32.mrf.mxu3 }
 0x2fe   : > { %v1713_v11 = vmax.f32 %v1674_v57, 0.0  ;;  %v1896_v15 = vadd.f32 %v1829_v54, %v1478_v22  ;;  %v2043_v28 = vunpack.c.l.b16 %v1995_v33 }
 0x300   : > { %v1731_v14 = vpack.c.bf16 %v1713_v11, %v1712_v26  ;;  %v1932_v31 = vadd.f32 %v3448_v5, %v1896_v15  ;;  %v1429_v15 = vpop.f32.mrf.mxu1 }
 0x302   : > { %v1964_v27 = vmax.f32 %v1932_v31, 0.0  ;;  %2678 = vmatmul.msk.bf16.gmra.mxu3 %vm796_vm2, %v1731_v14  ;;  %v1481_v31 = vadd.f32 %v3474_v32, %v3169_v10 }
 0x303   : > { %v1676_v36 = vpop.f32.mrf.mxu2 }
 0x304   : > { %v1996_v60 = vpack.c.bf16 %v1964_v27, %v1964_v27  ;;  %v1677_v44 = vadd.f32 %v3280_v24, %v1676_v36 }
 0x305   : > { %v1832_v17 = vpop.f32.mrf.mxu3 }
 0x306   : > { %v2044_v29 = vunpack.c.l.b16 %v1996_v60  ;;  %v1897_v42 = vadd.f32 %v1832_v17, %v1479_v16  ;;  %v1714_v22 = vmax.f32 %v1677_v44, 0.0  ;;  %v1036_v17 = vadd.f32 %v3175_v20, %v3177_v23 }
 0x308   : > { %v2051_v9 = vpack.c.b16 %v2044_v29, %v2043_v28  ;;  %v1933_v45 = vadd.f32 %v3448_v5, %v1897_v42  ;;  %v1431_v32 = vpop.f32.mrf.mxu1 }
 0x30a   : > { %2697 = vmatmul.msk.bf16.vlgmr.msra.gmra.mxu0 %vm2079_vm3, %v2051_v9  ;;  %v1965_v57 = vmax.f32 %v1933_v45, 0.0  ;;  %v1482_v9 = vadd.f32 %v3486_v13, %v1036_v17 }
 0x30b   : > { %v1678_v55 = vpop.f32.mrf.mxu2 }
 0x30c   : > { %v1679_v46 = vadd.f32 %v3280_v24, %v1678_v55  ;;  %v1997_v56 = vpack.c.bf16 %v1965_v57, %v1965_v57 }
 0x30d   : > { %v1834_v7 = vpop.f32.mrf.mxu3 }
 0x30e   : > { %v1715_v54 = vmax.f32 %v1679_v46, 0.0  ;;  %v1898_v26 = vadd.f32 %v1834_v7, %v1480_v3  ;;  %v2045_v27 = vunpack.c.l.b16 %v1997_v56 }
 0x310   : > { %v1732_v37 = vpack.c.bf16 %v1715_v54, %v1714_v22  ;;  %v1934_v11 = vadd.f32 %v3448_v5, %v1898_v26  ;;  %v1483_v22 = vadd.f32 %v3500_v49, %v3187_v39 }
 0x312   : > { %v1966_v58 = vmax.f32 %v1934_v11, 0.0  ;;  %2679 = vmatmul.msk.bf16.gmra.mxu3 %vm796_vm2, %v1732_v37  ;;  %v1434_v11 = vpop.f32.mrf.mxu1 }
 0x313   : > { %v1681_v14 = vpop.f32.mrf.mxu2 }
 0x314   : > { %v1998_v48 = vpack.c.bf16 %v1966_v58, %v1966_v58  ;;  %v1682_v28 = vadd.f32 %v3280_v24, %v1681_v14  ;;  %v1041_v58 = vadd.f32 %v3193_v47, %v3195_v50  ;;  %v1485_v47 = vadd.f32 %v1429_v15, %v3202_v63 }
 0x315   : > { %v1837_v33 = vpop.f32.mrf.mxu3 }
 0x316   : > { %v2046_v36 = vunpack.c.l.b16 %v1998_v48  ;;  %v1899_v16 = vadd.f32 %v1837_v33, %v1481_v31  ;;  %v1716_v44 = vmax.f32 %v1682_v28, 0.0  ;;  %v1484_v39 = vadd.f32 %v3508_v61, %v1041_v58  ;;  %v2786_v33 = vld [vmem:[%s3633_s5 + $0x60] sm:$0xff] }
 0x317   : > { %2378 = vmatpush.bf16.msra.mxu3 %v2786_v33 }
 0x318   : > { %v2052_v60 = vpack.c.b16 %v2046_v36, %v2045_v27  ;;  %v1935_v29 = vadd.f32 %v3448_v5, %v1899_v16 }
 0x31a   : > { %2698 = vmatmul.msk.bf16.gmra.mxu0 %vm2079_vm3, %v2052_v60  ;;  %v1967_v45 = vmax.f32 %v1935_v29, 0.0  ;;  %v1436_v36 = vpop.f32.mrf.mxu1 }
 0x31b   : > { %v1683_v42 = vpop.f32.mrf.mxu2 }
 0x31c   : > { %v1684_v10 = vadd.f32 %v3280_v24, %v1683_v42  ;;  %v1999_v23 = vpack.c.bf16 %v1967_v45, %v1967_v45  ;;  %v2782_v24 = vld [vmem:[%s3633_s5 + $0x40] sm:$0xff] }
 0x31d   : > { %v1839_v53 = vpop.f32.mrf.mxu3  ;;  %2277 = vmatpush.bf16.msra.mxu2 %v2782_v24  ;;  %v1051_v24 = vadd.f32 %v3223_v35, %v3225_v38 }
 0x31e   : > { %v1717_v55 = vmax.f32 %v1684_v10, 0.0  ;;  %v1900_v3 = vadd.f32 %v1839_v53, %v1482_v9  ;;  %v2047_v54 = vunpack.c.l.b16 %v1999_v23  ;;  %v1046_v9 = vadd.f32 %v3208_v8, %v3210_v12 }
 0x320   : > { %v1733_v46 = vpack.c.bf16 %v1717_v55, %v1716_v44  ;;  %v1936_v20 = vadd.f32 %v3448_v5, %v1900_v3  ;;  %v1486_v44 = vadd.f32 %v1431_v32, %v1046_v9 }
 0x322   : > { %v1968_v7 = vmax.f32 %v1936_v20, 0.0  ;;  %2680 = vmatmul.msk.bf16.gmra.mxu3 %vm796_vm2, %v1733_v46  ;;  %v1439_v53 = vpop.f32.mrf.mxu1  ;;  %v1487_v20 = vadd.f32 %v1434_v11, %v3217_v25 }
 0x324   : > { %v2000_v57 = vpack.c.bf16 %v1968_v7, %v1968_v7 }
 0x325   : > { %v1842_v13 = vpop.f32.mrf.mxu3 }
 0x326   : > { %v2048_v26 = vunpack.c.l.b16 %v2000_v57  ;;  %v1901_v37 = vadd.f32 %v1842_v13, %v1483_v22 }
 0x328   : > { %v2053_v56 = vpack.c.b16 %v2048_v26, %v2047_v54  ;;  %v1937_v14 = vadd.f32 %v3448_v5, %v1901_v37  ;;  %v1488_v54 = vadd.f32 %v1436_v36, %v1051_v24  ;;  %v1056_v36 = vadd.f32 %v3238_v1, %v3240_v4 }
 0x32a   : > { %2699 = vmatmul.msk.bf16.gmra.mxu0 %vm2079_vm3, %v2053_v56  ;;  %v1969_v31 = vmax.f32 %v1937_v14, 0.0  ;;  %v1441_v7 = vpop.f32.mrf.mxu1 }
 0x32c   : > { %v2001_v16 = vpack.c.bf16 %v1969_v31, %v1969_v31 }
 0x32d   : > { %v1844_v49 = vpop.f32.mrf.mxu3 }
 0x32e   : > { %v1902_v48 = vadd.f32 %v1844_v49, %v1484_v39  ;;  %v2049_v28 = vunpack.c.l.b16 %v2001_v16  ;;  %v1489_v39 = vadd.f32 %v1439_v53, %v3232_v52 }
 0x330   : > { %v1938_v27 = vadd.f32 %v3448_v5, %v1902_v48 }
 0x332   : > { %v1970_v60 = vmax.f32 %v1938_v27, 0.0  ;;  %v1444_v58 = vpop.f32.mrf.mxu1 }
 0x334   : > { %v2002_v50 = vpack.c.bf16 %v1970_v60, %v1970_v60  ;;  %v1490_v60 = vadd.f32 %v1441_v7, %v1056_v36 }
 0x335   : > { %v1847_v17 = vpop.f32.mrf.mxu3 }
 0x336   : > { %v2050_v29 = vunpack.c.l.b16 %v2002_v50  ;;  %v1903_v61 = vadd.f32 %v1847_v17, %v1485_v47 }
 0x338   : > { %v2054_v42 = vpack.c.b16 %v2050_v29, %v2049_v28  ;;  %v1939_v10 = vadd.f32 %v3448_v5, %v1903_v61 }
 0x33a   : > { %2700 = vmatmul.msk.bf16.gmra.mxu0 %vm2079_vm3, %v2054_v42  ;;  %v1971_v55 = vmax.f32 %v1939_v10, 0.0  ;;  %v1446_v27 = vpop.f32.mrf.mxu1  ;;  %v1491_v42 = vadd.f32 %v1444_v58, %v3247_v18 }
 0x33c   : > { %v2003_v15 = vpack.c.bf16 %v1971_v55, %v1971_v55 }
 0x33d   : > { %v1849_v45 = vpop.f32.mrf.mxu3 }
 0x33e   : > { %v1904_v3 = vadd.f32 %v1849_v45, %v1486_v44  ;;  %v2222_v57 = vunpack.c.l.b16 %v2003_v15  ;;  %v1061_v45 = vadd.f32 %v3253_v30, %v3255_v34 }
 0x340   : > { %v1940_v63 = vadd.f32 %v3448_v5, %v1904_v3  ;;  %v1492_v3 = vadd.f32 %v1446_v27, %v1061_v45 }
 0x342   : > { %v1972_v46 = vmax.f32 %v1940_v63, 0.0  ;;  %v1449_v61 = vpop.f32.mrf.mxu1 }
 0x344   : > { %v2004_v23 = vpack.c.bf16 %v1972_v46, %v1972_v46 }
 0x345   : > { %v1852_v22 = vpop.f32.mrf.mxu3 }
 0x346   : > { %v2223_v8 = vunpack.c.l.b16 %v2004_v23  ;;  %v1905_v12 = vadd.f32 %v1852_v22, %v1487_v20  ;;  %v1493_v22 = vadd.f32 %v1449_v61, %v3262_v51 }
 0x348   : > { %v2230_v13 = vpack.c.b16 %v2223_v8, %v2222_v57  ;;  %v1941_v32 = vadd.f32 %v3448_v5, %v1905_v12 }
 0x34a   : > { %2737 = vmatmul.msk.bf16.vlgmr.msra.gmra.mxu2 %vm2079_vm3, %v2230_v13  ;;  %v1973_v37 = vmax.f32 %v1941_v32, 0.0  ;;  %v1451_v63 = vpop.f32.mrf.mxu1  ;;  %v1066_v32 = vadd.f32 %v3268_v2, %v3270_v6 }
 0x34c   : > { %v2005_v11 = vpack.c.bf16 %v1973_v37, %v1973_v37 }
 0x34d   : > { %v1854_v26 = vpop.f32.mrf.mxu3 }
 0x34e   : > { %v1906_v56 = vadd.f32 %v1854_v26, %v1488_v54  ;;  %v2224_v48 = vunpack.c.l.b16 %v2005_v11  ;;  %v1494_v26 = vadd.f32 %v1451_v63, %v1066_v32 }
 0x350   : > { %v1942_v25 = vadd.f32 %v3448_v5, %v1906_v56 }
 0x352   : > { %v1974_v14 = vmax.f32 %v1942_v25, 0.0  ;;  %v1454_v34 = vpop.f32.mrf.mxu1 }
 0x354   : > { %v2006_v49 = vpack.c.bf16 %v1974_v14, %v1974_v14 }
 0x355   : > { %v1857_v31 = vpop.f32.mrf.mxu3 }
 0x356   : > { %v2225_v33 = vunpack.c.l.b16 %v2006_v49  ;;  %v1907_v35 = vadd.f32 %v1857_v31, %v1489_v39  ;;  %v1495_v39 = vadd.f32 %v1454_v34, %v3277_v21 }
 0x358   : > { %v2231_v38 = vpack.c.b16 %v2225_v33, %v2224_v48  ;;  %v1943_v16 = vadd.f32 %v3448_v5, %v1907_v35  ;;  %v1071_v35 = vadd.f32 %v3286_v41, %v3288_v43 }
 0x35a   : > { %2738 = vmatmul.msk.bf16.gmra.mxu2 %vm2079_vm3, %v2231_v38  ;;  %v1975_v50 = vmax.f32 %v1943_v16, 0.0  ;;  %v1456_v25 = vpop.f32.mrf.mxu1 }
 0x35b   : > { %v1496_v36 = vadd.f32 %v1456_v25, %v1071_v35  ;;  %v3605_v35 = vld [vmem:[%s3634_s6] ss:$0 sm:$0xff] }
 0x35c   : > { %v2007_v28 = vpack.c.bf16 %v1975_v50, %v1975_v50 }
 0x35d   : > { %v1859_v47 = vpop.f32.mrf.mxu3 }
 0x35e   : > { %v1908_v17 = vadd.f32 %v1859_v47, %v1490_v60  ;;  %v2226_v53 = vunpack.c.l.b16 %v2007_v28 }
 0x360   : > { %v1944_v52 = vadd.f32 %v3448_v5, %v1908_v17 }
 0x362   : > { %v1976_v29 = vmax.f32 %v1944_v52, 0.0  ;;  %v1459_v27 = vpop.f32.mrf.mxu1 }
 0x363   : > { %v1497_v52 = vadd.f32 %v1459_v27, %v3295_v62 }
 0x364   : > { %v2008_v9 = vpack.c.bf16 %v1976_v29, %v1976_v29 }
 0x365   : > { %v1862_v10 = vpop.f32.mrf.mxu3 }
 0x366   : > { %v2227_v44 = vunpack.c.l.b16 %v2008_v9  ;;  %v1909_v1 = vadd.f32 %v1862_v10, %v1491_v42  ;;  %v1076_v10 = vadd.f32 %v3301_v0, %v3303_v19 }
 0x368   : > { %v2232_v4 = vpack.c.b16 %v2227_v44, %v2226_v53  ;;  %v1945_v55 = vadd.f32 %v3448_v5, %v1909_v1 }
 0x36a   : > { %2739 = vmatmul.msk.bf16.gmra.mxu2 %vm2079_vm3, %v2232_v4  ;;  %v1977_v46 = vmax.f32 %v1945_v55, 0.0  ;;  %v1461_v29 = vpop.f32.mrf.mxu1 }
 0x36b   : > { %v1498_v44 = vadd.f32 %v1461_v29, %v1076_v10 }
 0x36c   : > { %v2009_v23 = vpack.c.bf16 %v1977_v46, %v1977_v46 }
 0x36d   : > { %v1864_v15 = vpop.f32.mrf.mxu3 }
 0x36e   : > { %v1910_v20 = vadd.f32 %v1864_v15, %v1492_v3  ;;  %v2228_v12 = vunpack.c.l.b16 %v2009_v23 }
 0x370   : > { %v1946_v18 = vadd.f32 %v3448_v5, %v1910_v20 }
 0x372   : > { %v1978_v7 = vmax.f32 %v1946_v18, 0.0  ;;  %v1464_v55 = vpop.f32.mrf.mxu1 }
 0x373   : > { %v1499_v15 = vadd.f32 %v1464_v55, %v3307_v40 }
 0x374   : > { %v2010_v57 = vpack.c.bf16 %v1978_v7, %v1978_v7 }
 0x375   : > { %v1867_v8 = vpop.f32.mrf.mxu3 }
 0x376   : > { %v2229_v13 = vunpack.c.l.b16 %v2010_v57  ;;  %v1911_v30 = vadd.f32 %v1867_v8, %v1493_v22  ;;  %v3637_v22 = vld [vmem:[#allocation2_spill] sm:$0xff] }
 0x377   : > { %v1081_v57 = vadd.f32 %v3637_v22, %v3313_v59 }
 0x378   : > { %v2233_v24 = vpack.c.b16 %v2229_v13, %v2228_v12  ;;  %v1947_v54 = vadd.f32 %v3448_v5, %v1911_v30 }
 0x37a   : > { %2740 = vmatmul.msk.bf16.gmra.mxu2 %vm2079_vm3, %v2233_v24  ;;  %v1979_v56 = vmax.f32 %v1947_v54, 0.0  ;;  %v1466_v7 = vpop.f32.mrf.mxu1 }
 0x37b   : > { %v1500_v12 = vadd.f32 %v1466_v7, %v1081_v57 }
 0x37c   : > { %v2011_v11 = vpack.c.bf16 %v1979_v56, %v1979_v56 }
 0x37d   : > { %v1869_v37 = vpop.f32.mrf.mxu3 }
 0x37e   : > { %v1912_v58 = vadd.f32 %v1869_v37, %v1494_v26  ;;  %v2323_v48 = vunpack.c.l.b16 %v2011_v11 }
 0x380   : > { %v1948_v51 = vadd.f32 %v3448_v5, %v1912_v58 }
 0x382   : > { %v1980_v14 = vmax.f32 %v1948_v51, 0.0  ;;  %v2186_v59 = vpop.f32.mrf.mxu1 }
 0x384   : > { %v2012_v49 = vpack.c.bf16 %v1980_v14, %v1980_v14 }
 0x385   : > { %v1872_v31 = vpop.f32.mrf.mxu3 }
 0x386   : > { %v2324_v33 = vunpack.c.l.b16 %v2012_v49  ;;  %v1913_v2 = vadd.f32 %v1872_v31, %v1495_v39 }
 0x387   : > { %v2101_v58 = vpop.f32.mrf.mxu0 }
 0x388   : > { %v2331_v6 = vpack.c.b16 %v2324_v33, %v2323_v48  ;;  %v1949_v38 = vadd.f32 %v3448_v5, %v1913_v2  ;;  %v2187_v48 = vadd.f32 %v2186_v59, %v2101_v58 }
 0x38a   : > { %2757 = vmatmul.msk.bf16.vlgmr.msra.gmra.mxu3 %vm2079_vm3, %v2331_v6  ;;  %v1981_v60 = vmax.f32 %v1949_v38, 0.0  ;;  %v2188_v11 = vpop.f32.mrf.mxu1 }
 0x38c   : > { %v2013_v50 = vpack.c.bf16 %v1981_v60, %v1981_v60 }
 0x38d   : > { %v1874_v16 = vpop.f32.mrf.mxu3 }
 0x38e   : > { %v1914_v47 = vadd.f32 %v1874_v16, %v1496_v36  ;;  %v2325_v42 = vunpack.c.l.b16 %v2013_v50 }
 0x38f   : > { %v2103_v25 = vpop.f32.mrf.mxu0 }
 0x390   : > { %v1950_v21 = vadd.f32 %v3448_v5, %v1914_v47  ;;  %v2189_v2 = vadd.f32 %v2188_v11, %v2103_v25 }
 0x392   : > { %v1982_v17 = vmax.f32 %v1950_v21, 0.0  ;;  %v2191_v31 = vpop.f32.mrf.mxu1 }
 0x394   : > { %v2014_v28 = vpack.c.bf16 %v1982_v17, %v1982_v17 }
 0x395   : > { %v1877_v61 = vpop.f32.mrf.mxu3 }
 0x396   : > { %v2326_v41 = vunpack.c.l.b16 %v2014_v28  ;;  %v1915_v43 = vadd.f32 %v1877_v61, %v1497_v52 }
 0x397   : > { %v2106_v39 = vpop.f32.mrf.mxu0 }
 0x398   : > { %v2332_v9 = vpack.c.b16 %v2326_v41, %v2325_v42  ;;  %v1951_v53 = vadd.f32 %v3448_v5, %v1915_v43  ;;  %v2192_v61 = vadd.f32 %v2191_v31, %v2106_v39 }
 0x39a   : > { %2758 = vmatmul.msk.bf16.gmra.mxu3 %vm2079_vm3, %v2332_v9  ;;  %v1983_v4 = vmax.f32 %v1951_v53, 0.0  ;;  %v2193_v47 = vpop.f32.mrf.mxu1 }
 0x39c   : > { %v2015_v3 = vpack.c.bf16 %v1983_v4, %v1983_v4 }
 0x39d   : > { %v1879_v1 = vpop.f32.mrf.mxu3 }
 0x39e   : > { %v1916_v45 = vadd.f32 %v1879_v1, %v1498_v44  ;;  %v2327_v18 = vunpack.c.l.b16 %v2015_v3 }
 0x39f   : > { %v2108_v60 = vpop.f32.mrf.mxu0 }
 0x3a0   : > { %v1952_v62 = vadd.f32 %v3448_v5, %v1916_v45  ;;  %v2194_v9 = vadd.f32 %v2193_v47, %v2108_v60 }
 0x3a2   : > { %v1984_v63 = vmax.f32 %v1952_v62, 0.0  ;;  %v2196_v43 = vpop.f32.mrf.mxu1 }
 0x3a4   : > { %v2016_v46 = vpack.c.bf16 %v1984_v63, %v1984_v63 }
 0x3a5   : > { %v1882_v20 = vpop.f32.mrf.mxu3 }
 0x3a6   : > { %v2328_v23 = vunpack.c.l.b16 %v2016_v46  ;;  %v1917_v0 = vadd.f32 %v1882_v20, %v1499_v15 }
 0x3a7   : > { %v2111_v41 = vpop.f32.mrf.mxu0 }
 0x3a8   : > { %v2333_v19 = vpack.c.b16 %v2328_v23, %v2327_v18  ;;  %v1953_v8 = vadd.f32 %v3448_v5, %v1917_v0  ;;  %v2197_v23 = vadd.f32 %v2196_v43, %v2111_v41 }
 0x3aa   : > { %2759 = vmatmul.msk.bf16.gmra.mxu3 %vm2079_vm3, %v2333_v19  ;;  %v1985_v30 = vmax.f32 %v1953_v8, 0.0  ;;  %v2198_v15 = vpop.f32.mrf.mxu1 }
 0x3ac   : > { %v2017_v24 = vpack.c.bf16 %v1985_v30, %v1985_v30 }
 0x3ad   : > { %v1884_v13 = vpop.f32.mrf.mxu3 }
 0x3ae   : > { %v1918_v34 = vadd.f32 %v1884_v13, %v1500_v12  ;;  %v2329_v26 = vunpack.c.l.b16 %v2017_v24 }
 0x3af   : > { %v2113_v63 = vpop.f32.mrf.mxu0 }
 0x3b0   : > { %v1954_v40 = vadd.f32 %v3448_v5, %v1918_v34  ;;  %v2199_v19 = vadd.f32 %v2198_v15, %v2113_v63 }
 0x3b2   : > { %v1986_v32 = vmax.f32 %v1954_v40, 0.0  ;;  %v2201_v30 = vpop.f32.mrf.mxu1 }
 0x3b4   : > { %v2018_v54 = vpack.c.bf16 %v1986_v32, %v1986_v32 }
 0x3b6   : > { %v2330_v37 = vunpack.c.l.b16 %v2018_v54 }
 0x3b7   : > { %v2116_v57 = vpop.f32.mrf.mxu0 }
 0x3b8   : > { %v2334_v56 = vpack.c.b16 %v2330_v37, %v2329_v26  ;;  %v2202_v37 = vadd.f32 %v2201_v30, %v2116_v57 }
 0x3ba   : > { %2760 = vmatmul.msk.bf16.gmra.mxu3 %vm2079_vm3, %v2334_v56  ;;  %v2203_v59 = vpop.f32.mrf.mxu1 }
 0x3bf   : > { %v2118_v56 = vpop.f32.mrf.mxu0 }
 0x3c0   : > { %v2204_v25 = vadd.f32 %v2203_v59, %v2118_v56 }
 0x3cd   : > { %v2279_v51 = vpop.f32.mrf.mxu2 }
 0x3ce   : > { %v2299_v33 = vadd.f32 %v2279_v51, %v2187_v48 }
 0x3d5   : > { %v2281_v14 = vpop.f32.mrf.mxu2 }
 0x3d6   : > { %v2300_v38 = vadd.f32 %v2281_v14, %v2189_v2 }
 0x3dd   : > { %v2284_v5 = vpop.f32.mrf.mxu2 }
 0x3de   : > { %v2301_v42 = vadd.f32 %v2284_v5, %v2192_v61 }
 0x3e5   : > { %v2286_v50 = vpop.f32.mrf.mxu2 }
 0x3e6   : > { %v2302_v44 = vadd.f32 %v2286_v50, %v2194_v9 }
 0x3ed   : > { %v2289_v53 = vpop.f32.mrf.mxu2 }
 0x3ee   : > { %v2303_v0 = vadd.f32 %v2289_v53, %v2197_v23 }
 0x3f5   : > { %v2291_v20 = vpop.f32.mrf.mxu2 }
 0x3f6   : > { %v2304_v22 = vadd.f32 %v2291_v20, %v2199_v19 }
 0x3fd   : > { %v2294_v34 = vpop.f32.mrf.mxu2 }
 0x3fe   : > { %v2305_v58 = vadd.f32 %v2294_v34, %v2202_v37 }
 0x405   : > { %v2296_v51 = vpop.f32.mrf.mxu2 }
 0x406   : > { %v2306_v14 = vadd.f32 %v2296_v51, %v2204_v25 }
 0x40d   : > { %v2380_v49 = vpop.f32.mrf.mxu3 }
 0x40e   : > { %v2400_v6 = vadd.f32 %v2380_v49, %v2299_v33 }
 0x410   : > { %v2412_v36 = vadd.f32 %v3605_v35, %v2400_v6 }
 0x412   : > { %v2420_v17 = vmax.f32 %v2412_v36, 0.0 }
 0x415   : > { %v2382_v27 = vpop.f32.mrf.mxu3 }
 0x416   : > { %v2401_v16 = vadd.f32 %v2382_v27, %v2300_v38 }
 0x418   : > { %v2413_v21 = vadd.f32 %v3605_v35, %v2401_v16 }
 0x41a   : > { %v2421_v52 = vmax.f32 %v2413_v21, 0.0 }
 0x41c   : > { %v2793_v28 = vpack.c.bf16 %v2421_v52, %v2420_v17 }
 0x41d   : > { %v2385_v29 = vpop.f32.mrf.mxu3 }
 0x41e   : > { %2794 = vst [vmem:[%s3613_s29] sm:$0xff] %v2793_v28   ;;  %v2402_v10 = vadd.f32 %v2385_v29, %v2301_v42 }
 0x420   : > { %v2414_v4 = vadd.f32 %v3605_v35, %v2402_v10 }
 0x422   : > { %v2422_v62 = vmax.f32 %v2414_v4, 0.0 }
 0x425   : > { %v2387_v1 = vpop.f32.mrf.mxu3 }
 0x426   : > { %v2403_v45 = vadd.f32 %v2387_v1, %v2302_v44 }
 0x428   : > { %v2415_v55 = vadd.f32 %v3605_v35, %v2403_v45 }
 0x42a   : > { %v2423_v3 = vmax.f32 %v2415_v55, 0.0 }
 0x42c   : > { %v2798_v46 = vpack.c.bf16 %v2423_v3, %v2422_v62 }
 0x42d   : > { %v2390_v18 = vpop.f32.mrf.mxu3 }
 0x42e   : > { %2810 = vst [vmem:[%s3613_s29 + $0x8] sm:$0xff] %v2798_v46   ;;  %v2404_v7 = vadd.f32 %v2390_v18, %v2303_v0 }
 0x430   : > { %v2416_v12 = vadd.f32 %v3605_v35, %v2404_v7 }
 0x432   : > { %v2424_v24 = vmax.f32 %v2416_v12, 0.0 }
 0x435   : > { %v2392_v8 = vpop.f32.mrf.mxu3 }
 0x436   : > { %v2405_v13 = vadd.f32 %v2392_v8, %v2304_v22 }
 0x438   : > { %v2417_v40 = vadd.f32 %v3605_v35, %v2405_v13 }
 0x43a   : > { %v2425_v32 = vmax.f32 %v2417_v40, 0.0 }
 0x43c   : > { %v2803_v54 = vpack.c.bf16 %v2425_v32, %v2424_v24 }
 0x43d   : > { %v2395_v26 = vpop.f32.mrf.mxu3 }
 0x43e   : > { %2811 = vst [vmem:[%s3613_s29 + $0x10] sm:$0xff] %v2803_v54   ;;  %v2406_v11 = vadd.f32 %v2395_v26, %v2305_v58 }
 0x440   : > { %v2418_v49 = vadd.f32 %v3605_v35, %v2406_v11 }
 0x442   : > { %v2426_v5 = vmax.f32 %v2418_v49, 0.0 }
 0x445   : > { %v2397_v39 = vpop.f32.mrf.mxu3 }
 0x446   : > { %v2407_v31 = vadd.f32 %v2397_v39, %v2306_v14 }
 0x448   : > { %v2419_v48 = vadd.f32 %v3605_v35, %v2407_v31 }
 0x44a   : > { %v2427_v33 = vmax.f32 %v2419_v48, 0.0 }
 0x44c   : > { %v2808_v2 = vpack.c.bf16 %v2427_v33, %v2426_v5 }
 0x44e   : > { %2812 = vst [vmem:[%s3613_s29 + $0x18] sm:$0xff] %v2808_v2  }
 0x44f PF: > { %s17_s24 = sadd.s32 1, %s2831_s24  }
 0x450   : > { %p14_p4 = scmp.ge.s32.totalorder %s17_s24, 4  }
 0x452   :  { %16 = sbr.rel (!%p14_p4) target bundleno = 1 (0x1), region = 81 }

// kernel: pyramid_forward.3
= control target key start
LH: loop header
LB: loop body
LE: loop exit
PB: predicated region body
PF: predicated region fallthrough
CT: control target
= control target key end

     0   :  { %s8468_s12 = smov 0   ;;  %s8470_s13 = smov 0   ;;  %s9868_s0 = inlined_call_operand.vmem [shape: bf16[2,8192], index: 0, kind: input, shape index: {}]   ;;  %s9869_s1 = inlined_call_operand.vmem [shape: bf16[8192,256], index: 1, kind: input, shape index: {}]   ;;  %s9870_s2 = inlined_call_operand.vmem [shape: f32[1,256], index: 2, kind: input, shape index: {}]   ;;  %s9871_s3 = inlined_call_operand.vmem [shape: f32[2,256], index: 3, kind: output, shape index: {}]  }
   0x1   :  { %s8472_s14 = smov 0   ;;  %s8474_s15 = smov 0  }
   0x2   :  { %s8476_s16 = smov 0   ;;  %s8478_s17 = smov 0  }
   0x3   :  { %s8480_s18 = smov 0  }
   0x4 LB: > { %s22_s19 = sadd.s32 1, %s8438_s16  ;;  %s25_s20 = sadd.s32 1, %s8442_s17  ;;  %s8446_s18 = sphi %s8480_s18, %s13_s18   ;;  %s8442_s17 = sphi %s8478_s17, %s9877_s17   ;;  %s8438_s16 = sphi %s8476_s16, %s9876_s16   ;;  %s8434_s15 = sphi %s8474_s15, %s9875_s15   ;;  %s8430_s14 = sphi %s8472_s14, %s9874_s14   ;;  %s8426_s13 = sphi %s8470_s13, %s9873_s13   ;;  %s8422_s12 = sphi %s8468_s12, %s9872_s12  }
   0x5   : > { %p23_p0 = scmp.ge.s32.totalorder %s22_s19, 2  ;;  %p67_p1 = scmp.ne.s32.totalorder %s8426_s13, %s8422_s12 }
   0x6   : > { %p68_p2 = scmp.eq.s32.totalorder %s8446_s18, 0  ;;  %s60_s24 = sadd.s32 1, %s8426_s13 }
   0x7   : > { %s9879_s19 = smov (%p23_p0, %s22_s19), 0  ;;  %s9881_s20 = smov (!%p23_p0, %s25_s20), %s8442_s17 }
   0x8   : > { %p69_p3 = por %p68_p2, %p67_p1  ;;  %p27_p4 = scmp.ge.s32.totalorder %s9881_s20, 2 }
   0x9   : > { %s55_s21 = ssub.s32 %s8438_s16, %s9879_s19  ;;  %p7041_p6 = scmp.ge.s32.totalorder %s8446_s18, 4 }
   0xa   : > { %s9883_s20 = smov (%p27_p4, %s9881_s20), 0 }
   0xb   : > { %s56_s22 = ssub.s32 %s8442_s17, %s9883_s20  ;;  %145 = sbr.rel (%p7041_p6) target bundleno = 534 (0x216), region = 16 }
   0xc   : > { %s57_s23 = sor.u32 %s56_s22, %s55_s21 }
   0xd   : > { %p58_p5 = scmp.eq.s32.totalorder %s57_s23, 0 }
   0xf   : > { %s8519_s25 = scalar_select %p58_p5, %s8426_s13, %s60_s24  }
  0x10   : > { %156 = sbr.rel (!%p69_p3) target bundleno = 534 (0x216), region = 24  ;;  %s158_s26 = sand.u32 (%p69_p3), 1, %s8426_s13  }
  0x11   : > { %s8078_s27 = sshll.u32 (%p69_p3), %s8438_s16, 10  ;;  %s7042_s28 = sshll.u32 (%p69_p3), %s158_s26, 11 }
  0x12   : > { %s163_s29 = sadd.s32 (%p69_p3), %s8442_s17, %s8078_s27  ;;  %s8533_s7 = scalar_lea.vmem (%p69_p3), [#allocation2], %s7042_s28 }
  0x13   : > { %s7045_s30 = sshll.u32 (%p69_p3), %s163_s29, 2 }
  0x14   : > { %s8528_s6 = scalar_lea.vmem (%p69_p3), %s9869_s1, %s7045_s30 }
  0x15   : > { %v182_v0 = vld [vmem:[%s8528_s6] sm:$0xf]  ;;  %v184_v1 = vld [vmem:[%s8528_s6 + $0x8] sm:$0xf]  ;;  %v186_v2 = vld [vmem:[%s8528_s6 + $0x10] sm:$0xf] }
  0x16   : > { %183 = vst [vmem:[%s8533_s7] sm:$0xf] %v182_v0  ;;  %v188_v3 = vld [vmem:[%s8528_s6 + $0x18] sm:$0xf]  ;;  %v190_v4 = vld [vmem:[%s8528_s6 + $0x20] sm:$0xf] }
  0x17   : > { %185 = vst [vmem:[%s8533_s7 + $0x4] sm:$0xf] %v184_v1  ;;  %v192_v5 = vld [vmem:[%s8528_s6 + $0x28] sm:$0xf]  ;;  %v194_v6 = vld [vmem:[%s8528_s6 + $0x30] sm:$0xf] }
  0x18   : > { %187 = vst [vmem:[%s8533_s7 + $0x8] sm:$0xf] %v186_v2  ;;  %v196_v7 = vld [vmem:[%s8528_s6 + $0x38] sm:$0xf]  ;;  %v198_v8 = vld [vmem:[%s8528_s6 + $0x40] sm:$0xf] }
  0x19   : > { %189 = vst [vmem:[%s8533_s7 + $0xc] sm:$0xf] %v188_v3  ;;  %v200_v9 = vld [vmem:[%s8528_s6 + $0x48] sm:$0xf]  ;;  %v202_v10 = vld [vmem:[%s8528_s6 + $0x50] sm:$0xf] }
  0x1a   : > { %191 = vst [vmem:[%s8533_s7 + $0x10] sm:$0xf] %v190_v4  ;;  %v204_v11 = vld [vmem:[%s8528_s6 + $0x58] sm:$0xf]  ;;  %v206_v12 = vld [vmem:[%s8528_s6 + $0x60] sm:$0xf] }
  0x1b   : > { %193 = vst [vmem:[%s8533_s7 + $0x14] sm:$0xf] %v192_v5  ;;  %v208_v13 = vld [vmem:[%s8528_s6 + $0x68] sm:$0xf]  ;;  %v210_v14 = vld [vmem:[%s8528_s6 + $0x70] sm:$0xf] }
  0x1c   : > { %195 = vst [vmem:[%s8533_s7 + $0x18] sm:$0xf] %v194_v6  ;;  %v212_v15 = vld [vmem:[%s8528_s6 + $0x78] sm:$0xf]  ;;  %v214_v16 = vld [vmem:[%s8528_s6 + $0x80] sm:$0xf] }
  0x1d   : > { %197 = vst [vmem:[%s8533_s7 + $0x1c] sm:$0xf] %v196_v7  ;;  %v216_v17 = vld [vmem:[%s8528_s6 + $0x88] sm:$0xf]  ;;  %v218_v18 = vld [vmem:[%s8528_s6 + $0x90] sm:$0xf] }
  0x1e   : > { %199 = vst [vmem:[%s8533_s7 + $0x20] sm:$0xf] %v198_v8  ;;  %v220_v19 = vld [vmem:[%s8528_s6 + $0x98] sm:$0xf]  ;;  %v222_v20 = vld [vmem:[%s8528_s6 + $0xa0] sm:$0xf] }
  0x1f   : > { %201 = vst [vmem:[%s8533_s7 + $0x24] sm:$0xf] %v200_v9  ;;  %v224_v21 = vld [vmem:[%s8528_s6 + $0xa8] sm:$0xf]  ;;  %v226_v22 = vld [vmem:[%s8528_s6 + $0xb0] sm:$0xf] }
  0x20   : > { %203 = vst [vmem:[%s8533_s7 + $0x28] sm:$0xf] %v202_v10  ;;  %v228_v23 = vld [vmem:[%s8528_s6 + $0xb8] sm:$0xf]  ;;  %v230_v24 = vld [vmem:[%s8528_s6 + $0xc0] sm:$0xf] }
  0x21   : > { %205 = vst [vmem:[%s8533_s7 + $0x2c] sm:$0xf] %v204_v11  ;;  %v232_v25 = vld [vmem:[%s8528_s6 + $0xc8] sm:$0xf]  ;;  %v234_v26 = vld [vmem:[%s8528_s6 + $0xd0] sm:$0xf] }
  0x22   : > { %207 = vst [vmem:[%s8533_s7 + $0x30] sm:$0xf] %v206_v12  ;;  %v236_v27 = vld [vmem:[%s8528_s6 + $0xd8] sm:$0xf]  ;;  %v238_v28 = vld [vmem:[%s8528_s6 + $0xe0] sm:$0xf] }
  0x23   : > { %209 = vst [vmem:[%s8533_s7 + $0x34] sm:$0xf] %v208_v13  ;;  %v240_v29 = vld [vmem:[%s8528_s6 + $0xe8] sm:$0xf]  ;;  %v242_v30 = vld [vmem:[%s8528_s6 + $0xf0] sm:$0xf] }
  0x24   : > { %211 = vst [vmem:[%s8533_s7 + $0x38] sm:$0xf] %v210_v14  ;;  %v244_v31 = vld [vmem:[%s8528_s6 + $0xf8] sm:$0xf]  ;;  %v246_v32 = vld [vmem:[%s8528_s6 + $0x100] sm:$0xf] }
  0x25   : > { %213 = vst [vmem:[%s8533_s7 + $0x3c] sm:$0xf] %v212_v15  ;;  %v248_v33 = vld [vmem:[%s8528_s6 + $0x108] sm:$0xf]  ;;  %v250_v34 = vld [vmem:[%s8528_s6 + $0x110] sm:$0xf] }
  0x26   : > { %215 = vst [vmem:[%s8533_s7 + $0x40] sm:$0xf] %v214_v16  ;;  %v252_v35 = vld [vmem:[%s8528_s6 + $0x118] sm:$0xf]  ;;  %v254_v36 = vld [vmem:[%s8528_s6 + $0x120] sm:$0xf] }
  0x27   : > { %217 = vst [vmem:[%s8533_s7 + $0x44] sm:$0xf] %v216_v17  ;;  %v256_v37 = vld [vmem:[%s8528_s6 + $0x128] sm:$0xf]  ;;  %v258_v38 = vld [vmem:[%s8528_s6 + $0x130] sm:$0xf] }
  0x28   : > { %219 = vst [vmem:[%s8533_s7 + $0x48] sm:$0xf] %v218_v18  ;;  %v260_v39 = vld [vmem:[%s8528_s6 + $0x138] sm:$0xf]  ;;  %v262_v40 = vld [vmem:[%s8528_s6 + $0x140] sm:$0xf] }
  0x29   : > { %221 = vst [vmem:[%s8533_s7 + $0x4c] sm:$0xf] %v220_v19  ;;  %v264_v41 = vld [vmem:[%s8528_s6 + $0x148] sm:$0xf]  ;;  %v266_v42 = vld [vmem:[%s8528_s6 + $0x150] sm:$0xf] }
  0x2a   : > { %223 = vst [vmem:[%s8533_s7 + $0x50] sm:$0xf] %v222_v20  ;;  %v268_v43 = vld [vmem:[%s8528_s6 + $0x158] sm:$0xf]  ;;  %v270_v44 = vld [vmem:[%s8528_s6 + $0x160] sm:$0xf] }
  0x2b   : > { %225 = vst [vmem:[%s8533_s7 + $0x54] sm:$0xf] %v224_v21  ;;  %v272_v45 = vld [vmem:[%s8528_s6 + $0x168] sm:$0xf]  ;;  %v274_v46 = vld [vmem:[%s8528_s6 + $0x170] sm:$0xf] }
  0x2c   : > { %227 = vst [vmem:[%s8533_s7 + $0x58] sm:$0xf] %v226_v22  ;;  %v276_v47 = vld [vmem:[%s8528_s6 + $0x178] sm:$0xf]  ;;  %v278_v48 = vld [vmem:[%s8528_s6 + $0x180] sm:$0xf] }
  0x2d   : > { %229 = vst [vmem:[%s8533_s7 + $0x5c] sm:$0xf] %v228_v23  ;;  %v280_v49 = vld [vmem:[%s8528_s6 + $0x188] sm:$0xf]  ;;  %v282_v50 = vld [vmem:[%s8528_s6 + $0x190] sm:$0xf] }
  0x2e   : > { %231 = vst [vmem:[%s8533_s7 + $0x60] sm:$0xf] %v230_v24  ;;  %v284_v51 = vld [vmem:[%s8528_s6 + $0x198] sm:$0xf]  ;;  %v286_v52 = vld [vmem:[%s8528_s6 + $0x1a0] sm:$0xf] }
  0x2f   : > { %233 = vst [vmem:[%s8533_s7 + $0x64] sm:$0xf] %v232_v25  ;;  %v288_v53 = vld [vmem:[%s8528_s6 + $0x1a8] sm:$0xf]  ;;  %v290_v54 = vld [vmem:[%s8528_s6 + $0x1b0] sm:$0xf] }
  0x30   : > { %235 = vst [vmem:[%s8533_s7 + $0x68] sm:$0xf] %v234_v26  ;;  %v292_v55 = vld [vmem:[%s8528_s6 + $0x1b8] sm:$0xf]  ;;  %v294_v56 = vld [vmem:[%s8528_s6 + $0x1c0] sm:$0xf] }
  0x31   : > { %237 = vst [vmem:[%s8533_s7 + $0x6c] sm:$0xf] %v236_v27  ;;  %v296_v57 = vld [vmem:[%s8528_s6 + $0x1c8] sm:$0xf]  ;;  %v298_v58 = vld [vmem:[%s8528_s6 + $0x1d0] sm:$0xf] }
  0x32   : > { %239 = vst [vmem:[%s8533_s7 + $0x70] sm:$0xf] %v238_v28  ;;  %v300_v59 = vld [vmem:[%s8528_s6 + $0x1d8] sm:$0xf]  ;;  %v302_v60 = vld [vmem:[%s8528_s6 + $0x1e0] sm:$0xf] }
  0x33   : > { %241 = vst [vmem:[%s8533_s7 + $0x74] sm:$0xf] %v240_v29  ;;  %v304_v61 = vld [vmem:[%s8528_s6 + $0x1e8] sm:$0xf]  ;;  %v306_v62 = vld [vmem:[%s8528_s6 + $0x1f0] sm:$0xf] }
  0x34   : > { %243 = vst [vmem:[%s8533_s7 + $0x78] sm:$0xf] %v242_v30  ;;  %v308_v63 = vld [vmem:[%s8528_s6 + $0x1f8] sm:$0xf]  ;;  %v310_v0 = vld [vmem:[%s8528_s6 + $0x200] sm:$0xf] }
  0x35   : > { %245 = vst [vmem:[%s8533_s7 + $0x7c] sm:$0xf] %v244_v31  ;;  %v312_v1 = vld [vmem:[%s8528_s6 + $0x208] sm:$0xf]  ;;  %v314_v2 = vld [vmem:[%s8528_s6 + $0x210] sm:$0xf] }
  0x36   : > { %247 = vst [vmem:[%s8533_s7 + $0x80] sm:$0xf] %v246_v32  ;;  %v316_v3 = vld [vmem:[%s8528_s6 + $0x218] sm:$0xf]  ;;  %v318_v4 = vld [vmem:[%s8528_s6 + $0x220] sm:$0xf] }
  0x37   : > { %249 = vst [vmem:[%s8533_s7 + $0x84] sm:$0xf] %v248_v33  ;;  %v320_v5 = vld [vmem:[%s8528_s6 + $0x228] sm:$0xf]  ;;  %v322_v6 = vld [vmem:[%s8528_s6 + $0x230] sm:$0xf] }
  0x38   : > { %251 = vst [vmem:[%s8533_s7 + $0x88] sm:$0xf] %v250_v34  ;;  %v324_v7 = vld [vmem:[%s8528_s6 + $0x238] sm:$0xf]  ;;  %v326_v8 = vld [vmem:[%s8528_s6 + $0x240] sm:$0xf] }
  0x39   : > { %253 = vst [vmem:[%s8533_s7 + $0x8c] sm:$0xf] %v252_v35  ;;  %v328_v9 = vld [vmem:[%s8528_s6 + $0x248] sm:$0xf]  ;;  %v330_v10 = vld [vmem:[%s8528_s6 + $0x250] sm:$0xf] }
  0x3a   : > { %255 = vst [vmem:[%s8533_s7 + $0x90] sm:$0xf] %v254_v36  ;;  %v332_v11 = vld [vmem:[%s8528_s6 + $0x258] sm:$0xf]  ;;  %v334_v12 = vld [vmem:[%s8528_s6 + $0x260] sm:$0xf] }
  0x3b   : > { %257 = vst [vmem:[%s8533_s7 + $0x94] sm:$0xf] %v256_v37  ;;  %v336_v13 = vld [vmem:[%s8528_s6 + $0x268] sm:$0xf]  ;;  %v338_v14 = vld [vmem:[%s8528_s6 + $0x270] sm:$0xf] }
  0x3c   : > { %259 = vst [vmem:[%s8533_s7 + $0x98] sm:$0xf] %v258_v38  ;;  %v340_v15 = vld [vmem:[%s8528_s6 + $0x278] sm:$0xf]  ;;  %v342_v16 = vld [vmem:[%s8528_s6 + $0x280] sm:$0xf] }
  0x3d   : > { %261 = vst [vmem:[%s8533_s7 + $0x9c] sm:$0xf] %v260_v39  ;;  %v344_v17 = vld [vmem:[%s8528_s6 + $0x288] sm:$0xf]  ;;  %v346_v18 = vld [vmem:[%s8528_s6 + $0x290] sm:$0xf] }
  0x3e   : > { %263 = vst [vmem:[%s8533_s7 + $0xa0] sm:$0xf] %v262_v40  ;;  %v348_v19 = vld [vmem:[%s8528_s6 + $0x298] sm:$0xf]  ;;  %v350_v20 = vld [vmem:[%s8528_s6 + $0x2a0] sm:$0xf] }
  0x3f   : > { %265 = vst [vmem:[%s8533_s7 + $0xa4] sm:$0xf] %v264_v41  ;;  %v352_v21 = vld [vmem:[%s8528_s6 + $0x2a8] sm:$0xf]  ;;  %v354_v22 = vld [vmem:[%s8528_s6 + $0x2b0] sm:$0xf] }
  0x40   : > { %267 = vst [vmem:[%s8533_s7 + $0xa8] sm:$0xf] %v266_v42  ;;  %v356_v23 = vld [vmem:[%s8528_s6 + $0x2b8] sm:$0xf]  ;;  %v358_v24 = vld [vmem:[%s8528_s6 + $0x2c0] sm:$0xf] }
  0x41   : > { %269 = vst [vmem:[%s8533_s7 + $0xac] sm:$0xf] %v268_v43  ;;  %v360_v25 = vld [vmem:[%s8528_s6 + $0x2c8] sm:$0xf]  ;;  %v362_v26 = vld [vmem:[%s8528_s6 + $0x2d0] sm:$0xf] }
  0x42   : > { %271 = vst [vmem:[%s8533_s7 + $0xb0] sm:$0xf] %v270_v44  ;;  %v364_v27 = vld [vmem:[%s8528_s6 + $0x2d8] sm:$0xf]  ;;  %v366_v28 = vld [vmem:[%s8528_s6 + $0x2e0] sm:$0xf] }
  0x43   : > { %273 = vst [vmem:[%s8533_s7 + $0xb4] sm:$0xf] %v272_v45  ;;  %v368_v29 = vld [vmem:[%s8528_s6 + $0x2e8] sm:$0xf]  ;;  %v370_v30 = vld [vmem:[%s8528_s6 + $0x2f0] sm:$0xf] }
  0x44   : > { %275 = vst [vmem:[%s8533_s7 + $0xb8] sm:$0xf] %v274_v46  ;;  %v372_v31 = vld [vmem:[%s8528_s6 + $0x2f8] sm:$0xf]  ;;  %v374_v32 = vld [vmem:[%s8528_s6 + $0x300] sm:$0xf] }
  0x45   : > { %277 = vst [vmem:[%s8533_s7 + $0xbc] sm:$0xf] %v276_v47  ;;  %v376_v33 = vld [vmem:[%s8528_s6 + $0x308] sm:$0xf]  ;;  %v378_v34 = vld [vmem:[%s8528_s6 + $0x310] sm:$0xf] }
  0x46   : > { %279 = vst [vmem:[%s8533_s7 + $0xc0] sm:$0xf] %v278_v48  ;;  %v380_v35 = vld [vmem:[%s8528_s6 + $0x318] sm:$0xf]  ;;  %v382_v36 = vld [vmem:[%s8528_s6 + $0x320] sm:$0xf] }
  0x47   : > { %281 = vst [vmem:[%s8533_s7 + $0xc4] sm:$0xf] %v280_v49  ;;  %v384_v37 = vld [vmem:[%s8528_s6 + $0x328] sm:$0xf]  ;;  %v386_v38 = vld [vmem:[%s8528_s6 + $0x330] sm:$0xf] }
  0x48   : > { %283 = vst [vmem:[%s8533_s7 + $0xc8] sm:$0xf] %v282_v50  ;;  %v388_v39 = vld [vmem:[%s8528_s6 + $0x338] sm:$0xf]  ;;  %v390_v40 = vld [vmem:[%s8528_s6 + $0x340] sm:$0xf] }
  0x49   : > { %285 = vst [vmem:[%s8533_s7 + $0xcc] sm:$0xf] %v284_v51  ;;  %v392_v41 = vld [vmem:[%s8528_s6 + $0x348] sm:$0xf]  ;;  %v394_v42 = vld [vmem:[%s8528_s6 + $0x350] sm:$0xf] }
  0x4a   : > { %287 = vst [vmem:[%s8533_s7 + $0xd0] sm:$0xf] %v286_v52  ;;  %v396_v43 = vld [vmem:[%s8528_s6 + $0x358] sm:$0xf]  ;;  %v398_v44 = vld [vmem:[%s8528_s6 + $0x360] sm:$0xf] }
  0x4b   : > { %289 = vst [vmem:[%s8533_s7 + $0xd4] sm:$0xf] %v288_v53  ;;  %v400_v45 = vld [vmem:[%s8528_s6 + $0x368] sm:$0xf]  ;;  %v402_v46 = vld [vmem:[%s8528_s6 + $0x370] sm:$0xf] }
  0x4c   : > { %291 = vst [vmem:[%s8533_s7 + $0xd8] sm:$0xf] %v290_v54  ;;  %v404_v47 = vld [vmem:[%s8528_s6 + $0x378] sm:$0xf]  ;;  %v406_v48 = vld [vmem:[%s8528_s6 + $0x380] sm:$0xf] }
  0x4d   : > { %293 = vst [vmem:[%s8533_s7 + $0xdc] sm:$0xf] %v292_v55  ;;  %v408_v49 = vld [vmem:[%s8528_s6 + $0x388] sm:$0xf]  ;;  %v410_v50 = vld [vmem:[%s8528_s6 + $0x390] sm:$0xf] }
  0x4e   : > { %295 = vst [vmem:[%s8533_s7 + $0xe0] sm:$0xf] %v294_v56  ;;  %v412_v51 = vld [vmem:[%s8528_s6 + $0x398] sm:$0xf]  ;;  %v414_v52 = vld [vmem:[%s8528_s6 + $0x3a0] sm:$0xf] }
  0x4f   : > { %297 = vst [vmem:[%s8533_s7 + $0xe4] sm:$0xf] %v296_v57  ;;  %v416_v53 = vld [vmem:[%s8528_s6 + $0x3a8] sm:$0xf]  ;;  %v418_v54 = vld [vmem:[%s8528_s6 + $0x3b0] sm:$0xf] }
  0x50   : > { %299 = vst [vmem:[%s8533_s7 + $0xe8] sm:$0xf] %v298_v58  ;;  %v420_v55 = vld [vmem:[%s8528_s6 + $0x3b8] sm:$0xf]  ;;  %v422_v56 = vld [vmem:[%s8528_s6 + $0x3c0] sm:$0xf] }
  0x51   : > { %301 = vst [vmem:[%s8533_s7 + $0xec] sm:$0xf] %v300_v59  ;;  %v424_v57 = vld [vmem:[%s8528_s6 + $0x3c8] sm:$0xf]  ;;  %v426_v58 = vld [vmem:[%s8528_s6 + $0x3d0] sm:$0xf] }
  0x52   : > { %303 = vst [vmem:[%s8533_s7 + $0xf0] sm:$0xf] %v302_v60  ;;  %v428_v59 = vld [vmem:[%s8528_s6 + $0x3d8] sm:$0xf]  ;;  %v430_v60 = vld [vmem:[%s8528_s6 + $0x3e0] sm:$0xf] }
  0x53   : > { %305 = vst [vmem:[%s8533_s7 + $0xf4] sm:$0xf] %v304_v61  ;;  %v432_v61 = vld [vmem:[%s8528_s6 + $0x3e8] sm:$0xf] }
  0x54   : > { %307 = vst [vmem:[%s8533_s7 + $0xf8] sm:$0xf] %v306_v62  ;;  %v434_v62 = vld [vmem:[%s8528_s6 + $0x3f0] sm:$0xf] }
  0x55   : > { %309 = vst [vmem:[%s8533_s7 + $0xfc] sm:$0xf] %v308_v63  ;;  %v436_v63 = vld [vmem:[%s8528_s6 + $0x3f8] sm:$0xf] }
  0x56   : > { %311 = vst [vmem:[%s8533_s7 + $0x100] sm:$0xf] %v310_v0  ;;  %v438_v0 = vld [vmem:[%s8528_s6 + $0x400] sm:$0xf] }
  0x57   : > { %313 = vst [vmem:[%s8533_s7 + $0x104] sm:$0xf] %v312_v1  ;;  %v440_v1 = vld [vmem:[%s8528_s6 + $0x408] sm:$0xf] }
  0x58   : > { %315 = vst [vmem:[%s8533_s7 + $0x108] sm:$0xf] %v314_v2  ;;  %v442_v2 = vld [vmem:[%s8528_s6 + $0x410] sm:$0xf] }
  0x59   : > { %317 = vst [vmem:[%s8533_s7 + $0x10c] sm:$0xf] %v316_v3  ;;  %v444_v3 = vld [vmem:[%s8528_s6 + $0x418] sm:$0xf] }
  0x5a   : > { %319 = vst [vmem:[%s8533_s7 + $0x110] sm:$0xf] %v318_v4  ;;  %v446_v4 = vld [vmem:[%s8528_s6 + $0x420] sm:$0xf] }
  0x5b   : > { %321 = vst [vmem:[%s8533_s7 + $0x114] sm:$0xf] %v320_v5  ;;  %v448_v5 = vld [vmem:[%s8528_s6 + $0x428] sm:$0xf] }
  0x5c   : > { %323 = vst [vmem:[%s8533_s7 + $0x118] sm:$0xf] %v322_v6  ;;  %v450_v6 = vld [vmem:[%s8528_s6 + $0x430] sm:$0xf] }
  0x5d   : > { %325 = vst [vmem:[%s8533_s7 + $0x11c] sm:$0xf] %v324_v7  ;;  %v452_v7 = vld [vmem:[%s8528_s6 + $0x438] sm:$0xf] }
  0x5e   : > { %327 = vst [vmem:[%s8533_s7 + $0x120] sm:$0xf] %v326_v8  ;;  %v454_v8 = vld [vmem:[%s8528_s6 + $0x440] sm:$0xf] }
  0x5f   : > { %329 = vst [vmem:[%s8533_s7 + $0x124] sm:$0xf] %v328_v9  ;;  %v456_v9 = vld [vmem:[%s8528_s6 + $0x448] sm:$0xf] }
  0x60   : > { %331 = vst [vmem:[%s8533_s7 + $0x128] sm:$0xf] %v330_v10  ;;  %v458_v10 = vld [vmem:[%s8528_s6 + $0x450] sm:$0xf] }
  0x61   : > { %333 = vst [vmem:[%s8533_s7 + $0x12c] sm:$0xf] %v332_v11  ;;  %v460_v11 = vld [vmem:[%s8528_s6 + $0x458] sm:$0xf] }
  0x62   : > { %335 = vst [vmem:[%s8533_s7 + $0x130] sm:$0xf] %v334_v12  ;;  %v462_v12 = vld [vmem:[%s8528_s6 + $0x460] sm:$0xf] }
  0x63   : > { %337 = vst [vmem:[%s8533_s7 + $0x134] sm:$0xf] %v336_v13  ;;  %v464_v13 = vld [vmem:[%s8528_s6 + $0x468] sm:$0xf] }
  0x64   : > { %339 = vst [vmem:[%s8533_s7 + $0x138] sm:$0xf] %v338_v14  ;;  %v466_v14 = vld [vmem:[%s8528_s6 + $0x470] sm:$0xf] }
  0x65   : > { %341 = vst [vmem:[%s8533_s7 + $0x13c] sm:$0xf] %v340_v15  ;;  %v468_v15 = vld [vmem:[%s8528_s6 + $0x478] sm:$0xf] }
  0x66   : > { %343 = vst [vmem:[%s8533_s7 + $0x140] sm:$0xf] %v342_v16  ;;  %v470_v16 = vld [vmem:[%s8528_s6 + $0x480] sm:$0xf] }
  0x67   : > { %345 = vst [vmem:[%s8533_s7 + $0x144] sm:$0xf] %v344_v17  ;;  %v472_v17 = vld [vmem:[%s8528_s6 + $0x488] sm:$0xf] }
  0x68   : > { %347 = vst [vmem:[%s8533_s7 + $0x148] sm:$0xf] %v346_v18  ;;  %v474_v18 = vld [vmem:[%s8528_s6 + $0x490] sm:$0xf] }
  0x69   : > { %349 = vst [vmem:[%s8533_s7 + $0x14c] sm:$0xf] %v348_v19  ;;  %v476_v19 = vld [vmem:[%s8528_s6 + $0x498] sm:$0xf] }
  0x6a   : > { %351 = vst [vmem:[%s8533_s7 + $0x150] sm:$0xf] %v350_v20  ;;  %v478_v20 = vld [vmem:[%s8528_s6 + $0x4a0] sm:$0xf] }
  0x6b   : > { %353 = vst [vmem:[%s8533_s7 + $0x154] sm:$0xf] %v352_v21  ;;  %v480_v21 = vld [vmem:[%s8528_s6 + $0x4a8] sm:$0xf] }
  0x6c   : > { %355 = vst [vmem:[%s8533_s7 + $0x158] sm:$0xf] %v354_v22  ;;  %v482_v22 = vld [vmem:[%s8528_s6 + $0x4b0] sm:$0xf] }
  0x6d   : > { %357 = vst [vmem:[%s8533_s7 + $0x15c] sm:$0xf] %v356_v23  ;;  %v484_v23 = vld [vmem:[%s8528_s6 + $0x4b8] sm:$0xf] }
  0x6e   : > { %359 = vst [vmem:[%s8533_s7 + $0x160] sm:$0xf] %v358_v24  ;;  %v486_v24 = vld [vmem:[%s8528_s6 + $0x4c0] sm:$0xf] }
  0x6f   : > { %361 = vst [vmem:[%s8533_s7 + $0x164] sm:$0xf] %v360_v25  ;;  %v488_v25 = vld [vmem:[%s8528_s6 + $0x4c8] sm:$0xf] }
  0x70   : > { %363 = vst [vmem:[%s8533_s7 + $0x168] sm:$0xf] %v362_v26  ;;  %v490_v26 = vld [vmem:[%s8528_s6 + $0x4d0] sm:$0xf] }
  0x71   : > { %365 = vst [vmem:[%s8533_s7 + $0x16c] sm:$0xf] %v364_v27  ;;  %v492_v27 = vld [vmem:[%s8528_s6 + $0x4d8] sm:$0xf] }
  0x72   : > { %367 = vst [vmem:[%s8533_s7 + $0x170] sm:$0xf] %v366_v28  ;;  %v494_v28 = vld [vmem:[%s8528_s6 + $0x4e0] sm:$0xf] }
  0x73   : > { %369 = vst [vmem:[%s8533_s7 + $0x174] sm:$0xf] %v368_v29  ;;  %v496_v29 = vld [vmem:[%s8528_s6 + $0x4e8] sm:$0xf] }
  0x74   : > { %371 = vst [vmem:[%s8533_s7 + $0x178] sm:$0xf] %v370_v30  ;;  %v498_v30 = vld [vmem:[%s8528_s6 + $0x4f0] sm:$0xf] }
  0x75   : > { %373 = vst [vmem:[%s8533_s7 + $0x17c] sm:$0xf] %v372_v31  ;;  %v500_v31 = vld [vmem:[%s8528_s6 + $0x4f8] sm:$0xf] }
  0x76   : > { %375 = vst [vmem:[%s8533_s7 + $0x180] sm:$0xf] %v374_v32  ;;  %v502_v32 = vld [vmem:[%s8528_s6 + $0x500] sm:$0xf] }
  0x77   : > { %377 = vst [vmem:[%s8533_s7 + $0x184] sm:$0xf] %v376_v33  ;;  %v504_v33 = vld [vmem:[%s8528_s6 + $0x508] sm:$0xf] }
  0x78   : > { %379 = vst [vmem:[%s8533_s7 + $0x188] sm:$0xf] %v378_v34  ;;  %v506_v34 = vld [vmem:[%s8528_s6 + $0x510] sm:$0xf] }
  0x79   : > { %381 = vst [vmem:[%s8533_s7 + $0x18c] sm:$0xf] %v380_v35  ;;  %v508_v35 = vld [vmem:[%s8528_s6 + $0x518] sm:$0xf] }
  0x7a   : > { %383 = vst [vmem:[%s8533_s7 + $0x190] sm:$0xf] %v382_v36  ;;  %v510_v36 = vld [vmem:[%s8528_s6 + $0x520] sm:$0xf] }
  0x7b   : > { %385 = vst [vmem:[%s8533_s7 + $0x194] sm:$0xf] %v384_v37  ;;  %v512_v37 = vld [vmem:[%s8528_s6 + $0x528] sm:$0xf] }
  0x7c   : > { %387 = vst [vmem:[%s8533_s7 + $0x198] sm:$0xf] %v386_v38  ;;  %v514_v38 = vld [vmem:[%s8528_s6 + $0x530] sm:$0xf] }
  0x7d   : > { %389 = vst [vmem:[%s8533_s7 + $0x19c] sm:$0xf] %v388_v39  ;;  %v516_v39 = vld [vmem:[%s8528_s6 + $0x538] sm:$0xf] }
  0x7e   : > { %391 = vst [vmem:[%s8533_s7 + $0x1a0] sm:$0xf] %v390_v40  ;;  %v518_v40 = vld [vmem:[%s8528_s6 + $0x540] sm:$0xf] }
  0x7f   : > { %393 = vst [vmem:[%s8533_s7 + $0x1a4] sm:$0xf] %v392_v41  ;;  %v520_v41 = vld [vmem:[%s8528_s6 + $0x548] sm:$0xf] }
  0x80   : > { %395 = vst [vmem:[%s8533_s7 + $0x1a8] sm:$0xf] %v394_v42  ;;  %v522_v42 = vld [vmem:[%s8528_s6 + $0x550] sm:$0xf] }
  0x81   : > { %397 = vst [vmem:[%s8533_s7 + $0x1ac] sm:$0xf] %v396_v43  ;;  %v524_v43 = vld [vmem:[%s8528_s6 + $0x558] sm:$0xf] }
  0x82   : > { %399 = vst [vmem:[%s8533_s7 + $0x1b0] sm:$0xf] %v398_v44  ;;  %v526_v44 = vld [vmem:[%s8528_s6 + $0x560] sm:$0xf] }
  0x83   : > { %401 = vst [vmem:[%s8533_s7 + $0x1b4] sm:$0xf] %v400_v45  ;;  %v528_v45 = vld [vmem:[%s8528_s6 + $0x568] sm:$0xf] }
  0x84   : > { %403 = vst [vmem:[%s8533_s7 + $0x1b8] sm:$0xf] %v402_v46  ;;  %v530_v46 = vld [vmem:[%s8528_s6 + $0x570] sm:$0xf] }
  0x85   : > { %405 = vst [vmem:[%s8533_s7 + $0x1bc] sm:$0xf] %v404_v47  ;;  %v532_v47 = vld [vmem:[%s8528_s6 + $0x578] sm:$0xf] }
  0x86   : > { %407 = vst [vmem:[%s8533_s7 + $0x1c0] sm:$0xf] %v406_v48  ;;  %v534_v48 = vld [vmem:[%s8528_s6 + $0x580] sm:$0xf] }
  0x87   : > { %409 = vst [vmem:[%s8533_s7 + $0x1c4] sm:$0xf] %v408_v49  ;;  %v536_v49 = vld [vmem:[%s8528_s6 + $0x588] sm:$0xf] }
  0x88   : > { %411 = vst [vmem:[%s8533_s7 + $0x1c8] sm:$0xf] %v410_v50  ;;  %v538_v50 = vld [vmem:[%s8528_s6 + $0x590] sm:$0xf] }
  0x89   : > { %413 = vst [vmem:[%s8533_s7 + $0x1cc] sm:$0xf] %v412_v51  ;;  %v540_v51 = vld [vmem:[%s8528_s6 + $0x598] sm:$0xf] }
  0x8a   : > { %415 = vst [vmem:[%s8533_s7 + $0x1d0] sm:$0xf] %v414_v52  ;;  %v542_v52 = vld [vmem:[%s8528_s6 + $0x5a0] sm:$0xf] }
  0x8b   : > { %417 = vst [vmem:[%s8533_s7 + $0x1d4] sm:$0xf] %v416_v53  ;;  %v544_v53 = vld [vmem:[%s8528_s6 + $0x5a8] sm:$0xf] }
  0x8c   : > { %419 = vst [vmem:[%s8533_s7 + $0x1d8] sm:$0xf] %v418_v54  ;;  %v546_v54 = vld [vmem:[%s8528_s6 + $0x5b0] sm:$0xf] }
  0x8d   : > { %421 = vst [vmem:[%s8533_s7 + $0x1dc] sm:$0xf] %v420_v55  ;;  %v548_v55 = vld [vmem:[%s8528_s6 + $0x5b8] sm:$0xf] }
  0x8e   : > { %423 = vst [vmem:[%s8533_s7 + $0x1e0] sm:$0xf] %v422_v56  ;;  %v550_v56 = vld [vmem:[%s8528_s6 + $0x5c0] sm:$0xf] }
  0x8f   : > { %425 = vst [vmem:[%s8533_s7 + $0x1e4] sm:$0xf] %v424_v57  ;;  %v552_v57 = vld [vmem:[%s8528_s6 + $0x5c8] sm:$0xf] }
  0x90   : > { %427 = vst [vmem:[%s8533_s7 + $0x1e8] sm:$0xf] %v426_v58  ;;  %v554_v58 = vld [vmem:[%s8528_s6 + $0x5d0] sm:$0xf] }
  0x91   : > { %429 = vst [vmem:[%s8533_s7 + $0x1ec] sm:$0xf] %v428_v59  ;;  %v556_v59 = vld [vmem:[%s8528_s6 + $0x5d8] sm:$0xf] }
  0x92   : > { %431 = vst [vmem:[%s8533_s7 + $0x1f0] sm:$0xf] %v430_v60  ;;  %v558_v60 = vld [vmem:[%s8528_s6 + $0x5e0] sm:$0xf] }
  0x93   : > { %433 = vst [vmem:[%s8533_s7 + $0x1f4] sm:$0xf] %v432_v61  ;;  %v560_v61 = vld [vmem:[%s8528_s6 + $0x5e8] sm:$0xf] }
  0x94   : > { %435 = vst [vmem:[%s8533_s7 + $0x1f8] sm:$0xf] %v434_v62  ;;  %v562_v62 = vld [vmem:[%s8528_s6 + $0x5f0] sm:$0xf] }
  0x95   : > { %437 = vst [vmem:[%s8533_s7 + $0x1fc] sm:$0xf] %v436_v63  ;;  %v564_v63 = vld [vmem:[%s8528_s6 + $0x5f8] sm:$0xf] }
  0x96   : > { %439 = vst [vmem:[%s8533_s7 + $0x200] sm:$0xf] %v438_v0  ;;  %v566_v0 = vld [vmem:[%s8528_s6 + $0x600] sm:$0xf] }
  0x97   : > { %441 = vst [vmem:[%s8533_s7 + $0x204] sm:$0xf] %v440_v1  ;;  %v568_v1 = vld [vmem:[%s8528_s6 + $0x608] sm:$0xf] }
  0x98   : > { %443 = vst [vmem:[%s8533_s7 + $0x208] sm:$0xf] %v442_v2  ;;  %v570_v2 = vld [vmem:[%s8528_s6 + $0x610] sm:$0xf] }
  0x99   : > { %445 = vst [vmem:[%s8533_s7 + $0x20c] sm:$0xf] %v444_v3  ;;  %v572_v3 = vld [vmem:[%s8528_s6 + $0x618] sm:$0xf] }
  0x9a   : > { %447 = vst [vmem:[%s8533_s7 + $0x210] sm:$0xf] %v446_v4  ;;  %v574_v4 = vld [vmem:[%s8528_s6 + $0x620] sm:$0xf] }
  0x9b   : > { %449 = vst [vmem:[%s8533_s7 + $0x214] sm:$0xf] %v448_v5  ;;  %v576_v5 = vld [vmem:[%s8528_s6 + $0x628] sm:$0xf] }
  0x9c   : > { %451 = vst [vmem:[%s8533_s7 + $0x218] sm:$0xf] %v450_v6  ;;  %v578_v6 = vld [vmem:[%s8528_s6 + $0x630] sm:$0xf] }
  0x9d   : > { %453 = vst [vmem:[%s8533_s7 + $0x21c] sm:$0xf] %v452_v7  ;;  %v580_v7 = vld [vmem:[%s8528_s6 + $0x638] sm:$0xf] }
  0x9e   : > { %455 = vst [vmem:[%s8533_s7 + $0x220] sm:$0xf] %v454_v8  ;;  %v582_v8 = vld [vmem:[%s8528_s6 + $0x640] sm:$0xf] }
  0x9f   : > { %457 = vst [vmem:[%s8533_s7 + $0x224] sm:$0xf] %v456_v9  ;;  %v584_v9 = vld [vmem:[%s8528_s6 + $0x648] sm:$0xf] }
  0xa0   : > { %459 = vst [vmem:[%s8533_s7 + $0x228] sm:$0xf] %v458_v10  ;;  %v586_v10 = vld [vmem:[%s8528_s6 + $0x650] sm:$0xf] }
  0xa1   : > { %461 = vst [vmem:[%s8533_s7 + $0x22c] sm:$0xf] %v460_v11  ;;  %v588_v11 = vld [vmem:[%s8528_s6 + $0x658] sm:$0xf] }
  0xa2   : > { %463 = vst [vmem:[%s8533_s7 + $0x230] sm:$0xf] %v462_v12  ;;  %v590_v12 = vld [vmem:[%s8528_s6 + $0x660] sm:$0xf] }
  0xa3   : > { %465 = vst [vmem:[%s8533_s7 + $0x234] sm:$0xf] %v464_v13  ;;  %v592_v13 = vld [vmem:[%s8528_s6 + $0x668] sm:$0xf] }
  0xa4   : > { %467 = vst [vmem:[%s8533_s7 + $0x238] sm:$0xf] %v466_v14  ;;  %v594_v14 = vld [vmem:[%s8528_s6 + $0x670] sm:$0xf] }
  0xa5   : > { %469 = vst [vmem:[%s8533_s7 + $0x23c] sm:$0xf] %v468_v15  ;;  %v596_v15 = vld [vmem:[%s8528_s6 + $0x678] sm:$0xf] }
  0xa6   : > { %471 = vst [vmem:[%s8533_s7 + $0x240] sm:$0xf] %v470_v16  ;;  %v598_v16 = vld [vmem:[%s8528_s6 + $0x680] sm:$0xf] }
  0xa7   : > { %473 = vst [vmem:[%s8533_s7 + $0x244] sm:$0xf] %v472_v17  ;;  %v600_v17 = vld [vmem:[%s8528_s6 + $0x688] sm:$0xf] }
  0xa8   : > { %475 = vst [vmem:[%s8533_s7 + $0x248] sm:$0xf] %v474_v18  ;;  %v602_v18 = vld [vmem:[%s8528_s6 + $0x690] sm:$0xf] }
  0xa9   : > { %477 = vst [vmem:[%s8533_s7 + $0x24c] sm:$0xf] %v476_v19  ;;  %v604_v19 = vld [vmem:[%s8528_s6 + $0x698] sm:$0xf] }
  0xaa   : > { %479 = vst [vmem:[%s8533_s7 + $0x250] sm:$0xf] %v478_v20  ;;  %v606_v20 = vld [vmem:[%s8528_s6 + $0x6a0] sm:$0xf] }
  0xab   : > { %481 = vst [vmem:[%s8533_s7 + $0x254] sm:$0xf] %v480_v21  ;;  %v608_v21 = vld [vmem:[%s8528_s6 + $0x6a8] sm:$0xf] }
  0xac   : > { %483 = vst [vmem:[%s8533_s7 + $0x258] sm:$0xf] %v482_v22  ;;  %v610_v22 = vld [vmem:[%s8528_s6 + $0x6b0] sm:$0xf] }
  0xad   : > { %485 = vst [vmem:[%s8533_s7 + $0x25c] sm:$0xf] %v484_v23  ;;  %v612_v23 = vld [vmem:[%s8528_s6 + $0x6b8] sm:$0xf] }
  0xae   : > { %487 = vst [vmem:[%s8533_s7 + $0x260] sm:$0xf] %v486_v24  ;;  %v614_v24 = vld [vmem:[%s8528_s6 + $0x6c0] sm:$0xf] }
  0xaf   : > { %489 = vst [vmem:[%s8533_s7 + $0x264] sm:$0xf] %v488_v25  ;;  %v616_v25 = vld [vmem:[%s8528_s6 + $0x6c8] sm:$0xf] }
  0xb0   : > { %491 = vst [vmem:[%s8533_s7 + $0x268] sm:$0xf] %v490_v26  ;;  %v618_v26 = vld [vmem:[%s8528_s6 + $0x6d0] sm:$0xf] }
  0xb1   : > { %493 = vst [vmem:[%s8533_s7 + $0x26c] sm:$0xf] %v492_v27  ;;  %v620_v27 = vld [vmem:[%s8528_s6 + $0x6d8] sm:$0xf] }
  0xb2   : > { %495 = vst [vmem:[%s8533_s7 + $0x270] sm:$0xf] %v494_v28  ;;  %v622_v28 = vld [vmem:[%s8528_s6 + $0x6e0] sm:$0xf] }
  0xb3   : > { %497 = vst [vmem:[%s8533_s7 + $0x274] sm:$0xf] %v496_v29  ;;  %v624_v29 = vld [vmem:[%s8528_s6 + $0x6e8] sm:$0xf] }
  0xb4   : > { %499 = vst [vmem:[%s8533_s7 + $0x278] sm:$0xf] %v498_v30  ;;  %v626_v30 = vld [vmem:[%s8528_s6 + $0x6f0] sm:$0xf] }
  0xb5   : > { %501 = vst [vmem:[%s8533_s7 + $0x27c] sm:$0xf] %v500_v31  ;;  %v628_v31 = vld [vmem:[%s8528_s6 + $0x6f8] sm:$0xf] }
  0xb6   : > { %503 = vst [vmem:[%s8533_s7 + $0x280] sm:$0xf] %v502_v32  ;;  %v630_v32 = vld [vmem:[%s8528_s6 + $0x700] sm:$0xf] }
  0xb7   : > { %505 = vst [vmem:[%s8533_s7 + $0x284] sm:$0xf] %v504_v33  ;;  %v632_v33 = vld [vmem:[%s8528_s6 + $0x708] sm:$0xf] }
  0xb8   : > { %507 = vst [vmem:[%s8533_s7 + $0x288] sm:$0xf] %v506_v34  ;;  %v634_v34 = vld [vmem:[%s8528_s6 + $0x710] sm:$0xf] }
  0xb9   : > { %509 = vst [vmem:[%s8533_s7 + $0x28c] sm:$0xf] %v508_v35  ;;  %v636_v35 = vld [vmem:[%s8528_s6 + $0x718] sm:$0xf] }
  0xba   : > { %511 = vst [vmem:[%s8533_s7 + $0x290] sm:$0xf] %v510_v36  ;;  %v638_v36 = vld [vmem:[%s8528_s6 + $0x720] sm:$0xf] }
  0xbb   : > { %513 = vst [vmem:[%s8533_s7 + $0x294] sm:$0xf] %v512_v37  ;;  %v640_v37 = vld [vmem:[%s8528_s6 + $0x728] sm:$0xf] }
  0xbc   : > { %515 = vst [vmem:[%s8533_s7 + $0x298] sm:$0xf] %v514_v38  ;;  %v642_v38 = vld [vmem:[%s8528_s6 + $0x730] sm:$0xf] }
  0xbd   : > { %517 = vst [vmem:[%s8533_s7 + $0x29c] sm:$0xf] %v516_v39  ;;  %v644_v39 = vld [vmem:[%s8528_s6 + $0x738] sm:$0xf] }
  0xbe   : > { %519 = vst [vmem:[%s8533_s7 + $0x2a0] sm:$0xf] %v518_v40  ;;  %v646_v40 = vld [vmem:[%s8528_s6 + $0x740] sm:$0xf] }
  0xbf   : > { %521 = vst [vmem:[%s8533_s7 + $0x2a4] sm:$0xf] %v520_v41  ;;  %v648_v41 = vld [vmem:[%s8528_s6 + $0x748] sm:$0xf] }
  0xc0   : > { %523 = vst [vmem:[%s8533_s7 + $0x2a8] sm:$0xf] %v522_v42  ;;  %v650_v42 = vld [vmem:[%s8528_s6 + $0x750] sm:$0xf] }
  0xc1   : > { %525 = vst [vmem:[%s8533_s7 + $0x2ac] sm:$0xf] %v524_v43  ;;  %v652_v43 = vld [vmem:[%s8528_s6 + $0x758] sm:$0xf] }
  0xc2   : > { %527 = vst [vmem:[%s8533_s7 + $0x2b0] sm:$0xf] %v526_v44  ;;  %v654_v44 = vld [vmem:[%s8528_s6 + $0x760] sm:$0xf] }
  0xc3   : > { %529 = vst [vmem:[%s8533_s7 + $0x2b4] sm:$0xf] %v528_v45  ;;  %v656_v45 = vld [vmem:[%s8528_s6 + $0x768] sm:$0xf] }
  0xc4   : > { %531 = vst [vmem:[%s8533_s7 + $0x2b8] sm:$0xf] %v530_v46  ;;  %v658_v46 = vld [vmem:[%s8528_s6 + $0x770] sm:$0xf] }
  0xc5   : > { %533 = vst [vmem:[%s8533_s7 + $0x2bc] sm:$0xf] %v532_v47  ;;  %v660_v47 = vld [vmem:[%s8528_s6 + $0x778] sm:$0xf] }
  0xc6   : > { %535 = vst [vmem:[%s8533_s7 + $0x2c0] sm:$0xf] %v534_v48  ;;  %v662_v48 = vld [vmem:[%s8528_s6 + $0x780] sm:$0xf] }
  0xc7   : > { %537 = vst [vmem:[%s8533_s7 + $0x2c4] sm:$0xf] %v536_v49  ;;  %v664_v49 = vld [vmem:[%s8528_s6 + $0x788] sm:$0xf] }
  0xc8   : > { %539 = vst [vmem:[%s8533_s7 + $0x2c8] sm:$0xf] %v538_v50  ;;  %v666_v50 = vld [vmem:[%s8528_s6 + $0x790] sm:$0xf] }
  0xc9   : > { %541 = vst [vmem:[%s8533_s7 + $0x2cc] sm:$0xf] %v540_v51  ;;  %v668_v51 = vld [vmem:[%s8528_s6 + $0x798] sm:$0xf] }
  0xca   : > { %543 = vst [vmem:[%s8533_s7 + $0x2d0] sm:$0xf] %v542_v52  ;;  %v670_v52 = vld [vmem:[%s8528_s6 + $0x7a0] sm:$0xf] }
  0xcb   : > { %545 = vst [vmem:[%s8533_s7 + $0x2d4] sm:$0xf] %v544_v53  ;;  %v672_v53 = vld [vmem:[%s8528_s6 + $0x7a8] sm:$0xf] }
  0xcc   : > { %547 = vst [vmem:[%s8533_s7 + $0x2d8] sm:$0xf] %v546_v54  ;;  %v674_v54 = vld [vmem:[%s8528_s6 + $0x7b0] sm:$0xf] }
  0xcd   : > { %549 = vst [vmem:[%s8533_s7 + $0x2dc] sm:$0xf] %v548_v55  ;;  %v676_v55 = vld [vmem:[%s8528_s6 + $0x7b8] sm:$0xf] }
  0xce   : > { %551 = vst [vmem:[%s8533_s7 + $0x2e0] sm:$0xf] %v550_v56  ;;  %v678_v56 = vld [vmem:[%s8528_s6 + $0x7c0] sm:$0xf] }
  0xcf   : > { %553 = vst [vmem:[%s8533_s7 + $0x2e4] sm:$0xf] %v552_v57  ;;  %v680_v57 = vld [vmem:[%s8528_s6 + $0x7c8] sm:$0xf] }
  0xd0   : > { %555 = vst [vmem:[%s8533_s7 + $0x2e8] sm:$0xf] %v554_v58  ;;  %v682_v58 = vld [vmem:[%s8528_s6 + $0x7d0] sm:$0xf] }
  0xd1   : > { %557 = vst [vmem:[%s8533_s7 + $0x2ec] sm:$0xf] %v556_v59  ;;  %v684_v59 = vld [vmem:[%s8528_s6 + $0x7d8] sm:$0xf] }
  0xd2   : > { %559 = vst [vmem:[%s8533_s7 + $0x2f0] sm:$0xf] %v558_v60  ;;  %v686_v60 = vld [vmem:[%s8528_s6 + $0x7e0] sm:$0xf] }
  0xd3   : > { %561 = vst [vmem:[%s8533_s7 + $0x2f4] sm:$0xf] %v560_v61  ;;  %v688_v61 = vld [vmem:[%s8528_s6 + $0x7e8] sm:$0xf] }
  0xd4   : > { %563 = vst [vmem:[%s8533_s7 + $0x2f8] sm:$0xf] %v562_v62  ;;  %v690_v62 = vld [vmem:[%s8528_s6 + $0x7f0] sm:$0xf] }
  0xd5   : > { %565 = vst [vmem:[%s8533_s7 + $0x2fc] sm:$0xf] %v564_v63  ;;  %v692_v63 = vld [vmem:[%s8528_s6 + $0x7f8] sm:$0xf] }
  0xd6   : > { %567 = vst [vmem:[%s8533_s7 + $0x300] sm:$0xf] %v566_v0  ;;  %v694_v0 = vld [vmem:[%s8528_s6 + $0x800] sm:$0xf] }
  0xd7   : > { %569 = vst [vmem:[%s8533_s7 + $0x304] sm:$0xf] %v568_v1  ;;  %v696_v1 = vld [vmem:[%s8528_s6 + $0x808] sm:$0xf] }
  0xd8   : > { %571 = vst [vmem:[%s8533_s7 + $0x308] sm:$0xf] %v570_v2  ;;  %v698_v2 = vld [vmem:[%s8528_s6 + $0x810] sm:$0xf] }
  0xd9   : > { %573 = vst [vmem:[%s8533_s7 + $0x30c] sm:$0xf] %v572_v3  ;;  %v700_v3 = vld [vmem:[%s8528_s6 + $0x818] sm:$0xf] }
  0xda   : > { %575 = vst [vmem:[%s8533_s7 + $0x310] sm:$0xf] %v574_v4  ;;  %v702_v4 = vld [vmem:[%s8528_s6 + $0x820] sm:$0xf] }
  0xdb   : > { %577 = vst [vmem:[%s8533_s7 + $0x314] sm:$0xf] %v576_v5  ;;  %v704_v5 = vld [vmem:[%s8528_s6 + $0x828] sm:$0xf] }
  0xdc   : > { %579 = vst [vmem:[%s8533_s7 + $0x318] sm:$0xf] %v578_v6  ;;  %v706_v6 = vld [vmem:[%s8528_s6 + $0x830] sm:$0xf] }
  0xdd   : > { %581 = vst [vmem:[%s8533_s7 + $0x31c] sm:$0xf] %v580_v7  ;;  %v708_v7 = vld [vmem:[%s8528_s6 + $0x838] sm:$0xf] }
  0xde   : > { %583 = vst [vmem:[%s8533_s7 + $0x320] sm:$0xf] %v582_v8  ;;  %v710_v8 = vld [vmem:[%s8528_s6 + $0x840] sm:$0xf] }
  0xdf   : > { %585 = vst [vmem:[%s8533_s7 + $0x324] sm:$0xf] %v584_v9  ;;  %v712_v9 = vld [vmem:[%s8528_s6 + $0x848] sm:$0xf] }
  0xe0   : > { %587 = vst [vmem:[%s8533_s7 + $0x328] sm:$0xf] %v586_v10  ;;  %v714_v10 = vld [vmem:[%s8528_s6 + $0x850] sm:$0xf] }
  0xe1   : > { %589 = vst [vmem:[%s8533_s7 + $0x32c] sm:$0xf] %v588_v11  ;;  %v716_v11 = vld [vmem:[%s8528_s6 + $0x858] sm:$0xf] }
  0xe2   : > { %591 = vst [vmem:[%s8533_s7 + $0x330] sm:$0xf] %v590_v12  ;;  %v718_v12 = vld [vmem:[%s8528_s6 + $0x860] sm:$0xf] }
  0xe3   : > { %593 = vst [vmem:[%s8533_s7 + $0x334] sm:$0xf] %v592_v13  ;;  %v720_v13 = vld [vmem:[%s8528_s6 + $0x868] sm:$0xf] }
  0xe4   : > { %595 = vst [vmem:[%s8533_s7 + $0x338] sm:$0xf] %v594_v14  ;;  %v722_v14 = vld [vmem:[%s8528_s6 + $0x870] sm:$0xf] }
  0xe5   : > { %597 = vst [vmem:[%s8533_s7 + $0x33c] sm:$0xf] %v596_v15  ;;  %v724_v15 = vld [vmem:[%s8528_s6 + $0x878] sm:$0xf] }
  0xe6   : > { %599 = vst [vmem:[%s8533_s7 + $0x340] sm:$0xf] %v598_v16  ;;  %v726_v16 = vld [vmem:[%s8528_s6 + $0x880] sm:$0xf] }
  0xe7   : > { %601 = vst [vmem:[%s8533_s7 + $0x344] sm:$0xf] %v600_v17  ;;  %v728_v17 = vld [vmem:[%s8528_s6 + $0x888] sm:$0xf] }
  0xe8   : > { %603 = vst [vmem:[%s8533_s7 + $0x348] sm:$0xf] %v602_v18  ;;  %v730_v18 = vld [vmem:[%s8528_s6 + $0x890] sm:$0xf] }
  0xe9   : > { %605 = vst [vmem:[%s8533_s7 + $0x34c] sm:$0xf] %v604_v19  ;;  %v732_v19 = vld [vmem:[%s8528_s6 + $0x898] sm:$0xf] }
  0xea   : > { %607 = vst [vmem:[%s8533_s7 + $0x350] sm:$0xf] %v606_v20  ;;  %v734_v20 = vld [vmem:[%s8528_s6 + $0x8a0] sm:$0xf] }
  0xeb   : > { %609 = vst [vmem:[%s8533_s7 + $0x354] sm:$0xf] %v608_v21  ;;  %v736_v21 = vld [vmem:[%s8528_s6 + $0x8a8] sm:$0xf] }
  0xec   : > { %611 = vst [vmem:[%s8533_s7 + $0x358] sm:$0xf] %v610_v22  ;;  %v738_v22 = vld [vmem:[%s8528_s6 + $0x8b0] sm:$0xf] }
  0xed   : > { %613 = vst [vmem:[%s8533_s7 + $0x35c] sm:$0xf] %v612_v23  ;;  %v740_v23 = vld [vmem:[%s8528_s6 + $0x8b8] sm:$0xf] }
  0xee   : > { %615 = vst [vmem:[%s8533_s7 + $0x360] sm:$0xf] %v614_v24  ;;  %v742_v24 = vld [vmem:[%s8528_s6 + $0x8c0] sm:$0xf] }
  0xef   : > { %617 = vst [vmem:[%s8533_s7 + $0x364] sm:$0xf] %v616_v25  ;;  %v744_v25 = vld [vmem:[%s8528_s6 + $0x8c8] sm:$0xf] }
  0xf0   : > { %619 = vst [vmem:[%s8533_s7 + $0x368] sm:$0xf] %v618_v26  ;;  %v746_v26 = vld [vmem:[%s8528_s6 + $0x8d0] sm:$0xf] }
  0xf1   : > { %621 = vst [vmem:[%s8533_s7 + $0x36c] sm:$0xf] %v620_v27  ;;  %v748_v27 = vld [vmem:[%s8528_s6 + $0x8d8] sm:$0xf] }
  0xf2   : > { %623 = vst [vmem:[%s8533_s7 + $0x370] sm:$0xf] %v622_v28  ;;  %v750_v28 = vld [vmem:[%s8528_s6 + $0x8e0] sm:$0xf] }
  0xf3   : > { %625 = vst [vmem:[%s8533_s7 + $0x374] sm:$0xf] %v624_v29  ;;  %v752_v29 = vld [vmem:[%s8528_s6 + $0x8e8] sm:$0xf] }
  0xf4   : > { %627 = vst [vmem:[%s8533_s7 + $0x378] sm:$0xf] %v626_v30  ;;  %v754_v30 = vld [vmem:[%s8528_s6 + $0x8f0] sm:$0xf] }
  0xf5   : > { %629 = vst [vmem:[%s8533_s7 + $0x37c] sm:$0xf] %v628_v31  ;;  %v756_v31 = vld [vmem:[%s8528_s6 + $0x8f8] sm:$0xf] }
  0xf6   : > { %631 = vst [vmem:[%s8533_s7 + $0x380] sm:$0xf] %v630_v32  ;;  %v758_v32 = vld [vmem:[%s8528_s6 + $0x900] sm:$0xf] }
  0xf7   : > { %633 = vst [vmem:[%s8533_s7 + $0x384] sm:$0xf] %v632_v33  ;;  %v760_v33 = vld [vmem:[%s8528_s6 + $0x908] sm:$0xf] }
  0xf8   : > { %635 = vst [vmem:[%s8533_s7 + $0x388] sm:$0xf] %v634_v34  ;;  %v762_v34 = vld [vmem:[%s8528_s6 + $0x910] sm:$0xf] }
  0xf9   : > { %637 = vst [vmem:[%s8533_s7 + $0x38c] sm:$0xf] %v636_v35  ;;  %v764_v35 = vld [vmem:[%s8528_s6 + $0x918] sm:$0xf] }
  0xfa   : > { %639 = vst [vmem:[%s8533_s7 + $0x390] sm:$0xf] %v638_v36  ;;  %v766_v36 = vld [vmem:[%s8528_s6 + $0x920] sm:$0xf] }
  0xfb   : > { %641 = vst [vmem:[%s8533_s7 + $0x394] sm:$0xf] %v640_v37  ;;  %v768_v37 = vld [vmem:[%s8528_s6 + $0x928] sm:$0xf] }
  0xfc   : > { %643 = vst [vmem:[%s8533_s7 + $0x398] sm:$0xf] %v642_v38  ;;  %v770_v38 = vld [vmem:[%s8528_s6 + $0x930] sm:$0xf] }
  0xfd   : > { %645 = vst [vmem:[%s8533_s7 + $0x39c] sm:$0xf] %v644_v39  ;;  %v772_v39 = vld [vmem:[%s8528_s6 + $0x938] sm:$0xf] }
  0xfe   : > { %647 = vst [vmem:[%s8533_s7 + $0x3a0] sm:$0xf] %v646_v40  ;;  %v774_v40 = vld [vmem:[%s8528_s6 + $0x940] sm:$0xf] }
  0xff   : > { %649 = vst [vmem:[%s8533_s7 + $0x3a4] sm:$0xf] %v648_v41  ;;  %v776_v41 = vld [vmem:[%s8528_s6 + $0x948] sm:$0xf] }
 0x100   : > { %651 = vst [vmem:[%s8533_s7 + $0x3a8] sm:$0xf] %v650_v42  ;;  %v778_v42 = vld [vmem:[%s8528_s6 + $0x950] sm:$0xf] }
 0x101   : > { %653 = vst [vmem:[%s8533_s7 + $0x3ac] sm:$0xf] %v652_v43  ;;  %v780_v43 = vld [vmem:[%s8528_s6 + $0x958] sm:$0xf] }
 0x102   : > { %655 = vst [vmem:[%s8533_s7 + $0x3b0] sm:$0xf] %v654_v44  ;;  %v782_v44 = vld [vmem:[%s8528_s6 + $0x960] sm:$0xf] }
 0x103   : > { %657 = vst [vmem:[%s8533_s7 + $0x3b4] sm:$0xf] %v656_v45  ;;  %v784_v45 = vld [vmem:[%s8528_s6 + $0x968] sm:$0xf] }
 0x104   : > { %659 = vst [vmem:[%s8533_s7 + $0x3b8] sm:$0xf] %v658_v46  ;;  %v786_v46 = vld [vmem:[%s8528_s6 + $0x970] sm:$0xf] }
 0x105   : > { %661 = vst [vmem:[%s8533_s7 + $0x3bc] sm:$0xf] %v660_v47  ;;  %v788_v47 = vld [vmem:[%s8528_s6 + $0x978] sm:$0xf] }
 0x106   : > { %663 = vst [vmem:[%s8533_s7 + $0x3c0] sm:$0xf] %v662_v48  ;;  %v790_v48 = vld [vmem:[%s8528_s6 + $0x980] sm:$0xf] }
 0x107   : > { %665 = vst [vmem:[%s8533_s7 + $0x3c4] sm:$0xf] %v664_v49  ;;  %v792_v49 = vld [vmem:[%s8528_s6 + $0x988] sm:$0xf] }
 0x108   : > { %667 = vst [vmem:[%s8533_s7 + $0x3c8] sm:$0xf] %v666_v50  ;;  %v794_v50 = vld [vmem:[%s8528_s6 + $0x990] sm:$0xf] }
 0x109   : > { %669 = vst [vmem:[%s8533_s7 + $0x3cc] sm:$0xf] %v668_v51  ;;  %v796_v51 = vld [vmem:[%s8528_s6 + $0x998] sm:$0xf] }
 0x10a   : > { %671 = vst [vmem:[%s8533_s7 + $0x3d0] sm:$0xf] %v670_v52  ;;  %v798_v52 = vld [vmem:[%s8528_s6 + $0x9a0] sm:$0xf] }
 0x10b   : > { %673 = vst [vmem:[%s8533_s7 + $0x3d4] sm:$0xf] %v672_v53  ;;  %v800_v53 = vld [vmem:[%s8528_s6 + $0x9a8] sm:$0xf] }
 0x10c   : > { %675 = vst [vmem:[%s8533_s7 + $0x3d8] sm:$0xf] %v674_v54  ;;  %v802_v54 = vld [vmem:[%s8528_s6 + $0x9b0] sm:$0xf] }
 0x10d   : > { %677 = vst [vmem:[%s8533_s7 + $0x3dc] sm:$0xf] %v676_v55  ;;  %v804_v55 = vld [vmem:[%s8528_s6 + $0x9b8] sm:$0xf] }
 0x10e   : > { %679 = vst [vmem:[%s8533_s7 + $0x3e0] sm:$0xf] %v678_v56  ;;  %v806_v56 = vld [vmem:[%s8528_s6 + $0x9c0] sm:$0xf] }
 0x10f   : > { %681 = vst [vmem:[%s8533_s7 + $0x3e4] sm:$0xf] %v680_v57  ;;  %v808_v57 = vld [vmem:[%s8528_s6 + $0x9c8] sm:$0xf] }
 0x110   : > { %683 = vst [vmem:[%s8533_s7 + $0x3e8] sm:$0xf] %v682_v58  ;;  %v810_v58 = vld [vmem:[%s8528_s6 + $0x9d0] sm:$0xf] }
 0x111   : > { %685 = vst [vmem:[%s8533_s7 + $0x3ec] sm:$0xf] %v684_v59  ;;  %v812_v59 = vld [vmem:[%s8528_s6 + $0x9d8] sm:$0xf] }
 0x112   : > { %687 = vst [vmem:[%s8533_s7 + $0x3f0] sm:$0xf] %v686_v60  ;;  %v814_v60 = vld [vmem:[%s8528_s6 + $0x9e0] sm:$0xf] }
 0x113   : > { %689 = vst [vmem:[%s8533_s7 + $0x3f4] sm:$0xf] %v688_v61  ;;  %v816_v61 = vld [vmem:[%s8528_s6 + $0x9e8] sm:$0xf] }
 0x114   : > { %691 = vst [vmem:[%s8533_s7 + $0x3f8] sm:$0xf] %v690_v62  ;;  %v818_v62 = vld [vmem:[%s8528_s6 + $0x9f0] sm:$0xf] }
 0x115   : > { %693 = vst [vmem:[%s8533_s7 + $0x3fc] sm:$0xf] %v692_v63  ;;  %v820_v63 = vld [vmem:[%s8528_s6 + $0x9f8] sm:$0xf] }
 0x116   : > { %695 = vst [vmem:[%s8533_s7 + $0x400] sm:$0xf] %v694_v0  ;;  %v822_v0 = vld [vmem:[%s8528_s6 + $0xa00] sm:$0xf] }
 0x117   : > { %697 = vst [vmem:[%s8533_s7 + $0x404] sm:$0xf] %v696_v1  ;;  %v824_v1 = vld [vmem:[%s8528_s6 + $0xa08] sm:$0xf] }
 0x118   : > { %699 = vst [vmem:[%s8533_s7 + $0x408] sm:$0xf] %v698_v2  ;;  %v826_v2 = vld [vmem:[%s8528_s6 + $0xa10] sm:$0xf] }
 0x119   : > { %701 = vst [vmem:[%s8533_s7 + $0x40c] sm:$0xf] %v700_v3  ;;  %v828_v3 = vld [vmem:[%s8528_s6 + $0xa18] sm:$0xf] }
 0x11a   : > { %703 = vst [vmem:[%s8533_s7 + $0x410] sm:$0xf] %v702_v4  ;;  %v830_v4 = vld [vmem:[%s8528_s6 + $0xa20] sm:$0xf] }
 0x11b   : > { %705 = vst [vmem:[%s8533_s7 + $0x414] sm:$0xf] %v704_v5  ;;  %v832_v5 = vld [vmem:[%s8528_s6 + $0xa28] sm:$0xf] }
 0x11c   : > { %707 = vst [vmem:[%s8533_s7 + $0x418] sm:$0xf] %v706_v6  ;;  %v834_v6 = vld [vmem:[%s8528_s6 + $0xa30] sm:$0xf] }
 0x11d   : > { %709 = vst [vmem:[%s8533_s7 + $0x41c] sm:$0xf] %v708_v7  ;;  %v836_v7 = vld [vmem:[%s8528_s6 + $0xa38] sm:$0xf] }
 0x11e   : > { %711 = vst [vmem:[%s8533_s7 + $0x420] sm:$0xf] %v710_v8  ;;  %v838_v8 = vld [vmem:[%s8528_s6 + $0xa40] sm:$0xf] }
 0x11f   : > { %713 = vst [vmem:[%s8533_s7 + $0x424] sm:$0xf] %v712_v9  ;;  %v840_v9 = vld [vmem:[%s8528_s6 + $0xa48] sm:$0xf] }
 0x120   : > { %715 = vst [vmem:[%s8533_s7 + $0x428] sm:$0xf] %v714_v10  ;;  %v842_v10 = vld [vmem:[%s8528_s6 + $0xa50] sm:$0xf] }
 0x121   : > { %717 = vst [vmem:[%s8533_s7 + $0x42c] sm:$0xf] %v716_v11  ;;  %v844_v11 = vld [vmem:[%s8528_s6 + $0xa58] sm:$0xf] }
 0x122   : > { %719 = vst [vmem:[%s8533_s7 + $0x430] sm:$0xf] %v718_v12  ;;  %v846_v12 = vld [vmem:[%s8528_s6 + $0xa60] sm:$0xf] }
 0x123   : > { %721 = vst [vmem:[%s8533_s7 + $0x434] sm:$0xf] %v720_v13  ;;  %v848_v13 = vld [vmem:[%s8528_s6 + $0xa68] sm:$0xf] }
 0x124   : > { %723 = vst [vmem:[%s8533_s7 + $0x438] sm:$0xf] %v722_v14  ;;  %v850_v14 = vld [vmem:[%s8528_s6 + $0xa70] sm:$0xf] }
 0x125   : > { %725 = vst [vmem:[%s8533_s7 + $0x43c] sm:$0xf] %v724_v15  ;;  %v852_v15 = vld [vmem:[%s8528_s6 + $0xa78] sm:$0xf] }
 0x126   : > { %727 = vst [vmem:[%s8533_s7 + $0x440] sm:$0xf] %v726_v16  ;;  %v854_v16 = vld [vmem:[%s8528_s6 + $0xa80] sm:$0xf] }
 0x127   : > { %729 = vst [vmem:[%s8533_s7 + $0x444] sm:$0xf] %v728_v17  ;;  %v856_v17 = vld [vmem:[%s8528_s6 + $0xa88] sm:$0xf] }
 0x128   : > { %731 = vst [vmem:[%s8533_s7 + $0x448] sm:$0xf] %v730_v18  ;;  %v858_v18 = vld [vmem:[%s8528_s6 + $0xa90] sm:$0xf] }
 0x129   : > { %733 = vst [vmem:[%s8533_s7 + $0x44c] sm:$0xf] %v732_v19  ;;  %v860_v19 = vld [vmem:[%s8528_s6 + $0xa98] sm:$0xf] }
 0x12a   : > { %735 = vst [vmem:[%s8533_s7 + $0x450] sm:$0xf] %v734_v20  ;;  %v862_v20 = vld [vmem:[%s8528_s6 + $0xaa0] sm:$0xf] }
 0x12b   : > { %737 = vst [vmem:[%s8533_s7 + $0x454] sm:$0xf] %v736_v21  ;;  %v864_v21 = vld [vmem:[%s8528_s6 + $0xaa8] sm:$0xf] }
 0x12c   : > { %739 = vst [vmem:[%s8533_s7 + $0x458] sm:$0xf] %v738_v22  ;;  %v866_v22 = vld [vmem:[%s8528_s6 + $0xab0] sm:$0xf] }
 0x12d   : > { %741 = vst [vmem:[%s8533_s7 + $0x45c] sm:$0xf] %v740_v23  ;;  %v868_v23 = vld [vmem:[%s8528_s6 + $0xab8] sm:$0xf] }
 0x12e   : > { %743 = vst [vmem:[%s8533_s7 + $0x460] sm:$0xf] %v742_v24  ;;  %v870_v24 = vld [vmem:[%s8528_s6 + $0xac0] sm:$0xf] }
 0x12f   : > { %745 = vst [vmem:[%s8533_s7 + $0x464] sm:$0xf] %v744_v25  ;;  %v872_v25 = vld [vmem:[%s8528_s6 + $0xac8] sm:$0xf] }
 0x130   : > { %747 = vst [vmem:[%s8533_s7 + $0x468] sm:$0xf] %v746_v26  ;;  %v874_v26 = vld [vmem:[%s8528_s6 + $0xad0] sm:$0xf] }
 0x131   : > { %749 = vst [vmem:[%s8533_s7 + $0x46c] sm:$0xf] %v748_v27  ;;  %v876_v27 = vld [vmem:[%s8528_s6 + $0xad8] sm:$0xf] }
 0x132   : > { %751 = vst [vmem:[%s8533_s7 + $0x470] sm:$0xf] %v750_v28  ;;  %v878_v28 = vld [vmem:[%s8528_s6 + $0xae0] sm:$0xf] }
 0x133   : > { %753 = vst [vmem:[%s8533_s7 + $0x474] sm:$0xf] %v752_v29  ;;  %v880_v29 = vld [vmem:[%s8528_s6 + $0xae8] sm:$0xf] }
 0x134   : > { %755 = vst [vmem:[%s8533_s7 + $0x478] sm:$0xf] %v754_v30  ;;  %v882_v30 = vld [vmem:[%s8528_s6 + $0xaf0] sm:$0xf] }
 0x135   : > { %757 = vst [vmem:[%s8533_s7 + $0x47c] sm:$0xf] %v756_v31  ;;  %v884_v31 = vld [vmem:[%s8528_s6 + $0xaf8] sm:$0xf] }
 0x136   : > { %759 = vst [vmem:[%s8533_s7 + $0x480] sm:$0xf] %v758_v32  ;;  %v886_v32 = vld [vmem:[%s8528_s6 + $0xb00] sm:$0xf] }
 0x137   : > { %761 = vst [vmem:[%s8533_s7 + $0x484] sm:$0xf] %v760_v33  ;;  %v888_v33 = vld [vmem:[%s8528_s6 + $0xb08] sm:$0xf] }
 0x138   : > { %763 = vst [vmem:[%s8533_s7 + $0x488] sm:$0xf] %v762_v34  ;;  %v890_v34 = vld [vmem:[%s8528_s6 + $0xb10] sm:$0xf] }
 0x139   : > { %765 = vst [vmem:[%s8533_s7 + $0x48c] sm:$0xf] %v764_v35  ;;  %v892_v35 = vld [vmem:[%s8528_s6 + $0xb18] sm:$0xf] }
 0x13a   : > { %767 = vst [vmem:[%s8533_s7 + $0x490] sm:$0xf] %v766_v36  ;;  %v894_v36 = vld [vmem:[%s8528_s6 + $0xb20] sm:$0xf] }
 0x13b   : > { %769 = vst [vmem:[%s8533_s7 + $0x494] sm:$0xf] %v768_v37  ;;  %v896_v37 = vld [vmem:[%s8528_s6 + $0xb28] sm:$0xf] }
 0x13c   : > { %771 = vst [vmem:[%s8533_s7 + $0x498] sm:$0xf] %v770_v38  ;;  %v898_v38 = vld [vmem:[%s8528_s6 + $0xb30] sm:$0xf] }
 0x13d   : > { %773 = vst [vmem:[%s8533_s7 + $0x49c] sm:$0xf] %v772_v39  ;;  %v900_v39 = vld [vmem:[%s8528_s6 + $0xb38] sm:$0xf] }
 0x13e   : > { %775 = vst [vmem:[%s8533_s7 + $0x4a0] sm:$0xf] %v774_v40  ;;  %v902_v40 = vld [vmem:[%s8528_s6 + $0xb40] sm:$0xf] }
 0x13f   : > { %777 = vst [vmem:[%s8533_s7 + $0x4a4] sm:$0xf] %v776_v41  ;;  %v904_v41 = vld [vmem:[%s8528_s6 + $0xb48] sm:$0xf] }
 0x140   : > { %779 = vst [vmem:[%s8533_s7 + $0x4a8] sm:$0xf] %v778_v42  ;;  %v906_v42 = vld [vmem:[%s8528_s6 + $0xb50] sm:$0xf] }
 0x141   : > { %781 = vst [vmem:[%s8533_s7 + $0x4ac] sm:$0xf] %v780_v43  ;;  %v908_v43 = vld [vmem:[%s8528_s6 + $0xb58] sm:$0xf] }
 0x142   : > { %783 = vst [vmem:[%s8533_s7 + $0x4b0] sm:$0xf] %v782_v44  ;;  %v910_v44 = vld [vmem:[%s8528_s6 + $0xb60] sm:$0xf] }
 0x143   : > { %785 = vst [vmem:[%s8533_s7 + $0x4b4] sm:$0xf] %v784_v45  ;;  %v912_v45 = vld [vmem:[%s8528_s6 + $0xb68] sm:$0xf] }
 0x144   : > { %787 = vst [vmem:[%s8533_s7 + $0x4b8] sm:$0xf] %v786_v46  ;;  %v914_v46 = vld [vmem:[%s8528_s6 + $0xb70] sm:$0xf] }
 0x145   : > { %789 = vst [vmem:[%s8533_s7 + $0x4bc] sm:$0xf] %v788_v47  ;;  %v916_v47 = vld [vmem:[%s8528_s6 + $0xb78] sm:$0xf] }
 0x146   : > { %791 = vst [vmem:[%s8533_s7 + $0x4c0] sm:$0xf] %v790_v48  ;;  %v918_v48 = vld [vmem:[%s8528_s6 + $0xb80] sm:$0xf] }
 0x147   : > { %793 = vst [vmem:[%s8533_s7 + $0x4c4] sm:$0xf] %v792_v49  ;;  %v920_v49 = vld [vmem:[%s8528_s6 + $0xb88] sm:$0xf] }
 0x148   : > { %795 = vst [vmem:[%s8533_s7 + $0x4c8] sm:$0xf] %v794_v50  ;;  %v922_v50 = vld [vmem:[%s8528_s6 + $0xb90] sm:$0xf] }
 0x149   : > { %797 = vst [vmem:[%s8533_s7 + $0x4cc] sm:$0xf] %v796_v51  ;;  %v924_v51 = vld [vmem:[%s8528_s6 + $0xb98] sm:$0xf] }
 0x14a   : > { %799 = vst [vmem:[%s8533_s7 + $0x4d0] sm:$0xf] %v798_v52  ;;  %v926_v52 = vld [vmem:[%s8528_s6 + $0xba0] sm:$0xf] }
 0x14b   : > { %801 = vst [vmem:[%s8533_s7 + $0x4d4] sm:$0xf] %v800_v53  ;;  %v928_v53 = vld [vmem:[%s8528_s6 + $0xba8] sm:$0xf] }
 0x14c   : > { %803 = vst [vmem:[%s8533_s7 + $0x4d8] sm:$0xf] %v802_v54  ;;  %v930_v54 = vld [vmem:[%s8528_s6 + $0xbb0] sm:$0xf] }
 0x14d   : > { %805 = vst [vmem:[%s8533_s7 + $0x4dc] sm:$0xf] %v804_v55  ;;  %v932_v55 = vld [vmem:[%s8528_s6 + $0xbb8] sm:$0xf] }
 0x14e   : > { %807 = vst [vmem:[%s8533_s7 + $0x4e0] sm:$0xf] %v806_v56  ;;  %v934_v56 = vld [vmem:[%s8528_s6 + $0xbc0] sm:$0xf] }
 0x14f   : > { %809 = vst [vmem:[%s8533_s7 + $0x4e4] sm:$0xf] %v808_v57  ;;  %v936_v57 = vld [vmem:[%s8528_s6 + $0xbc8] sm:$0xf] }
 0x150   : > { %811 = vst [vmem:[%s8533_s7 + $0x4e8] sm:$0xf] %v810_v58  ;;  %v938_v58 = vld [vmem:[%s8528_s6 + $0xbd0] sm:$0xf] }
 0x151   : > { %813 = vst [vmem:[%s8533_s7 + $0x4ec] sm:$0xf] %v812_v59  ;;  %v940_v59 = vld [vmem:[%s8528_s6 + $0xbd8] sm:$0xf] }
 0x152   : > { %815 = vst [vmem:[%s8533_s7 + $0x4f0] sm:$0xf] %v814_v60  ;;  %v942_v60 = vld [vmem:[%s8528_s6 + $0xbe0] sm:$0xf] }
 0x153   : > { %817 = vst [vmem:[%s8533_s7 + $0x4f4] sm:$0xf] %v816_v61  ;;  %v944_v61 = vld [vmem:[%s8528_s6 + $0xbe8] sm:$0xf] }
 0x154   : > { %819 = vst [vmem:[%s8533_s7 + $0x4f8] sm:$0xf] %v818_v62  ;;  %v946_v62 = vld [vmem:[%s8528_s6 + $0xbf0] sm:$0xf] }
 0x155   : > { %821 = vst [vmem:[%s8533_s7 + $0x4fc] sm:$0xf] %v820_v63  ;;  %v948_v63 = vld [vmem:[%s8528_s6 + $0xbf8] sm:$0xf] }
 0x156   : > { %823 = vst [vmem:[%s8533_s7 + $0x500] sm:$0xf] %v822_v0  ;;  %v950_v0 = vld [vmem:[%s8528_s6 + $0xc00] sm:$0xf] }
 0x157   : > { %825 = vst [vmem:[%s8533_s7 + $0x504] sm:$0xf] %v824_v1  ;;  %v952_v1 = vld [vmem:[%s8528_s6 + $0xc08] sm:$0xf] }
 0x158   : > { %827 = vst [vmem:[%s8533_s7 + $0x508] sm:$0xf] %v826_v2  ;;  %v954_v2 = vld [vmem:[%s8528_s6 + $0xc10] sm:$0xf] }
 0x159   : > { %829 = vst [vmem:[%s8533_s7 + $0x50c] sm:$0xf] %v828_v3  ;;  %v956_v3 = vld [vmem:[%s8528_s6 + $0xc18] sm:$0xf] }
 0x15a   : > { %831 = vst [vmem:[%s8533_s7 + $0x510] sm:$0xf] %v830_v4  ;;  %v958_v4 = vld [vmem:[%s8528_s6 + $0xc20] sm:$0xf] }
 0x15b   : > { %833 = vst [vmem:[%s8533_s7 + $0x514] sm:$0xf] %v832_v5  ;;  %v960_v5 = vld [vmem:[%s8528_s6 + $0xc28] sm:$0xf] }
 0x15c   : > { %835 = vst [vmem:[%s8533_s7 + $0x518] sm:$0xf] %v834_v6  ;;  %v962_v6 = vld [vmem:[%s8528_s6 + $0xc30] sm:$0xf] }
 0x15d   : > { %837 = vst [vmem:[%s8533_s7 + $0x51c] sm:$0xf] %v836_v7  ;;  %v964_v7 = vld [vmem:[%s8528_s6 + $0xc38] sm:$0xf] }
 0x15e   : > { %839 = vst [vmem:[%s8533_s7 + $0x520] sm:$0xf] %v838_v8  ;;  %v966_v8 = vld [vmem:[%s8528_s6 + $0xc40] sm:$0xf] }
 0x15f   : > { %841 = vst [vmem:[%s8533_s7 + $0x524] sm:$0xf] %v840_v9  ;;  %v968_v9 = vld [vmem:[%s8528_s6 + $0xc48] sm:$0xf] }
 0x160   : > { %843 = vst [vmem:[%s8533_s7 + $0x528] sm:$0xf] %v842_v10  ;;  %v970_v10 = vld [vmem:[%s8528_s6 + $0xc50] sm:$0xf] }
 0x161   : > { %845 = vst [vmem:[%s8533_s7 + $0x52c] sm:$0xf] %v844_v11  ;;  %v972_v11 = vld [vmem:[%s8528_s6 + $0xc58] sm:$0xf] }
 0x162   : > { %847 = vst [vmem:[%s8533_s7 + $0x530] sm:$0xf] %v846_v12  ;;  %v974_v12 = vld [vmem:[%s8528_s6 + $0xc60] sm:$0xf] }
 0x163   : > { %849 = vst [vmem:[%s8533_s7 + $0x534] sm:$0xf] %v848_v13  ;;  %v976_v13 = vld [vmem:[%s8528_s6 + $0xc68] sm:$0xf] }
 0x164   : > { %851 = vst [vmem:[%s8533_s7 + $0x538] sm:$0xf] %v850_v14  ;;  %v978_v14 = vld [vmem:[%s8528_s6 + $0xc70] sm:$0xf] }
 0x165   : > { %853 = vst [vmem:[%s8533_s7 + $0x53c] sm:$0xf] %v852_v15  ;;  %v980_v15 = vld [vmem:[%s8528_s6 + $0xc78] sm:$0xf] }
 0x166   : > { %855 = vst [vmem:[%s8533_s7 + $0x540] sm:$0xf] %v854_v16  ;;  %v982_v16 = vld [vmem:[%s8528_s6 + $0xc80] sm:$0xf] }
 0x167   : > { %857 = vst [vmem:[%s8533_s7 + $0x544] sm:$0xf] %v856_v17  ;;  %v984_v17 = vld [vmem:[%s8528_s6 + $0xc88] sm:$0xf] }
 0x168   : > { %859 = vst [vmem:[%s8533_s7 + $0x548] sm:$0xf] %v858_v18  ;;  %v986_v18 = vld [vmem:[%s8528_s6 + $0xc90] sm:$0xf] }
 0x169   : > { %861 = vst [vmem:[%s8533_s7 + $0x54c] sm:$0xf] %v860_v19  ;;  %v988_v19 = vld [vmem:[%s8528_s6 + $0xc98] sm:$0xf] }
 0x16a   : > { %863 = vst [vmem:[%s8533_s7 + $0x550] sm:$0xf] %v862_v20  ;;  %v990_v20 = vld [vmem:[%s8528_s6 + $0xca0] sm:$0xf] }
 0x16b   : > { %865 = vst [vmem:[%s8533_s7 + $0x554] sm:$0xf] %v864_v21  ;;  %v992_v21 = vld [vmem:[%s8528_s6 + $0xca8] sm:$0xf] }
 0x16c   : > { %867 = vst [vmem:[%s8533_s7 + $0x558] sm:$0xf] %v866_v22  ;;  %v994_v22 = vld [vmem:[%s8528_s6 + $0xcb0] sm:$0xf] }
 0x16d   : > { %869 = vst [vmem:[%s8533_s7 + $0x55c] sm:$0xf] %v868_v23  ;;  %v996_v23 = vld [vmem:[%s8528_s6 + $0xcb8] sm:$0xf] }
 0x16e   : > { %871 = vst [vmem:[%s8533_s7 + $0x560] sm:$0xf] %v870_v24  ;;  %v998_v24 = vld [vmem:[%s8528_s6 + $0xcc0] sm:$0xf] }
 0x16f   : > { %873 = vst [vmem:[%s8533_s7 + $0x564] sm:$0xf] %v872_v25  ;;  %v1000_v25 = vld [vmem:[%s8528_s6 + $0xcc8] sm:$0xf] }
 0x170   : > { %875 = vst [vmem:[%s8533_s7 + $0x568] sm:$0xf] %v874_v26  ;;  %v1002_v26 = vld [vmem:[%s8528_s6 + $0xcd0] sm:$0xf] }
 0x171   : > { %877 = vst [vmem:[%s8533_s7 + $0x56c] sm:$0xf] %v876_v27  ;;  %v1004_v27 = vld [vmem:[%s8528_s6 + $0xcd8] sm:$0xf] }
 0x172   : > { %879 = vst [vmem:[%s8533_s7 + $0x570] sm:$0xf] %v878_v28  ;;  %v1006_v28 = vld [vmem:[%s8528_s6 + $0xce0] sm:$0xf] }
 0x173   : > { %881 = vst [vmem:[%s8533_s7 + $0x574] sm:$0xf] %v880_v29  ;;  %v1008_v29 = vld [vmem:[%s8528_s6 + $0xce8] sm:$0xf] }
 0x174   : > { %883 = vst [vmem:[%s8533_s7 + $0x578] sm:$0xf] %v882_v30  ;;  %v1010_v30 = vld [vmem:[%s8528_s6 + $0xcf0] sm:$0xf] }
 0x175   : > { %885 = vst [vmem:[%s8533_s7 + $0x57c] sm:$0xf] %v884_v31  ;;  %v1012_v31 = vld [vmem:[%s8528_s6 + $0xcf8] sm:$0xf] }
 0x176   : > { %887 = vst [vmem:[%s8533_s7 + $0x580] sm:$0xf] %v886_v32  ;;  %v1014_v32 = vld [vmem:[%s8528_s6 + $0xd00] sm:$0xf] }
 0x177   : > { %889 = vst [vmem:[%s8533_s7 + $0x584] sm:$0xf] %v888_v33  ;;  %v1016_v33 = vld [vmem:[%s8528_s6 + $0xd08] sm:$0xf] }
 0x178   : > { %891 = vst [vmem:[%s8533_s7 + $0x588] sm:$0xf] %v890_v34  ;;  %v1018_v34 = vld [vmem:[%s8528_s6 + $0xd10] sm:$0xf] }
 0x179   : > { %893 = vst [vmem:[%s8533_s7 + $0x58c] sm:$0xf] %v892_v35  ;;  %v1020_v35 = vld [vmem:[%s8528_s6 + $0xd18] sm:$0xf] }
 0x17a   : > { %895 = vst [vmem:[%s8533_s7 + $0x590] sm:$0xf] %v894_v36  ;;  %v1022_v36 = vld [vmem:[%s8528_s6 + $0xd20] sm:$0xf] }
 0x17b   : > { %897 = vst [vmem:[%s8533_s7 + $0x594] sm:$0xf] %v896_v37  ;;  %v1024_v37 = vld [vmem:[%s8528_s6 + $0xd28] sm:$0xf] }
 0x17c   : > { %899 = vst [vmem:[%s8533_s7 + $0x598] sm:$0xf] %v898_v38  ;;  %v1026_v38 = vld [vmem:[%s8528_s6 + $0xd30] sm:$0xf] }
 0x17d   : > { %901 = vst [vmem:[%s8533_s7 + $0x59c] sm:$0xf] %v900_v39  ;;  %v1028_v39 = vld [vmem:[%s8528_s6 + $0xd38] sm:$0xf] }
 0x17e   : > { %903 = vst [vmem:[%s8533_s7 + $0x5a0] sm:$0xf] %v902_v40  ;;  %v1030_v40 = vld [vmem:[%s8528_s6 + $0xd40] sm:$0xf] }
 0x17f   : > { %905 = vst [vmem:[%s8533_s7 + $0x5a4] sm:$0xf] %v904_v41  ;;  %v1032_v41 = vld [vmem:[%s8528_s6 + $0xd48] sm:$0xf] }
 0x180   : > { %907 = vst [vmem:[%s8533_s7 + $0x5a8] sm:$0xf] %v906_v42  ;;  %v1034_v42 = vld [vmem:[%s8528_s6 + $0xd50] sm:$0xf] }
 0x181   : > { %909 = vst [vmem:[%s8533_s7 + $0x5ac] sm:$0xf] %v908_v43  ;;  %v1036_v43 = vld [vmem:[%s8528_s6 + $0xd58] sm:$0xf] }
 0x182   : > { %911 = vst [vmem:[%s8533_s7 + $0x5b0] sm:$0xf] %v910_v44  ;;  %v1038_v44 = vld [vmem:[%s8528_s6 + $0xd60] sm:$0xf] }
 0x183   : > { %913 = vst [vmem:[%s8533_s7 + $0x5b4] sm:$0xf] %v912_v45  ;;  %v1040_v45 = vld [vmem:[%s8528_s6 + $0xd68] sm:$0xf] }
 0x184   : > { %915 = vst [vmem:[%s8533_s7 + $0x5b8] sm:$0xf] %v914_v46  ;;  %v1042_v46 = vld [vmem:[%s8528_s6 + $0xd70] sm:$0xf] }
 0x185   : > { %917 = vst [vmem:[%s8533_s7 + $0x5bc] sm:$0xf] %v916_v47  ;;  %v1044_v47 = vld [vmem:[%s8528_s6 + $0xd78] sm:$0xf] }
 0x186   : > { %919 = vst [vmem:[%s8533_s7 + $0x5c0] sm:$0xf] %v918_v48  ;;  %v1046_v48 = vld [vmem:[%s8528_s6 + $0xd80] sm:$0xf] }
 0x187   : > { %921 = vst [vmem:[%s8533_s7 + $0x5c4] sm:$0xf] %v920_v49  ;;  %v1048_v49 = vld [vmem:[%s8528_s6 + $0xd88] sm:$0xf] }
 0x188   : > { %923 = vst [vmem:[%s8533_s7 + $0x5c8] sm:$0xf] %v922_v50  ;;  %v1050_v50 = vld [vmem:[%s8528_s6 + $0xd90] sm:$0xf] }
 0x189   : > { %925 = vst [vmem:[%s8533_s7 + $0x5cc] sm:$0xf] %v924_v51  ;;  %v1052_v51 = vld [vmem:[%s8528_s6 + $0xd98] sm:$0xf] }
 0x18a   : > { %927 = vst [vmem:[%s8533_s7 + $0x5d0] sm:$0xf] %v926_v52  ;;  %v1054_v52 = vld [vmem:[%s8528_s6 + $0xda0] sm:$0xf] }
 0x18b   : > { %929 = vst [vmem:[%s8533_s7 + $0x5d4] sm:$0xf] %v928_v53  ;;  %v1056_v53 = vld [vmem:[%s8528_s6 + $0xda8] sm:$0xf] }
 0x18c   : > { %931 = vst [vmem:[%s8533_s7 + $0x5d8] sm:$0xf] %v930_v54  ;;  %v1058_v54 = vld [vmem:[%s8528_s6 + $0xdb0] sm:$0xf] }
 0x18d   : > { %933 = vst [vmem:[%s8533_s7 + $0x5dc] sm:$0xf] %v932_v55  ;;  %v1060_v55 = vld [vmem:[%s8528_s6 + $0xdb8] sm:$0xf] }
 0x18e   : > { %935 = vst [vmem:[%s8533_s7 + $0x5e0] sm:$0xf] %v934_v56  ;;  %v1062_v56 = vld [vmem:[%s8528_s6 + $0xdc0] sm:$0xf] }
 0x18f   : > { %937 = vst [vmem:[%s8533_s7 + $0x5e4] sm:$0xf] %v936_v57  ;;  %v1064_v57 = vld [vmem:[%s8528_s6 + $0xdc8] sm:$0xf] }
 0x190   : > { %939 = vst [vmem:[%s8533_s7 + $0x5e8] sm:$0xf] %v938_v58  ;;  %v1066_v58 = vld [vmem:[%s8528_s6 + $0xdd0] sm:$0xf] }
 0x191   : > { %941 = vst [vmem:[%s8533_s7 + $0x5ec] sm:$0xf] %v940_v59  ;;  %v1068_v59 = vld [vmem:[%s8528_s6 + $0xdd8] sm:$0xf] }
 0x192   : > { %943 = vst [vmem:[%s8533_s7 + $0x5f0] sm:$0xf] %v942_v60  ;;  %v1070_v60 = vld [vmem:[%s8528_s6 + $0xde0] sm:$0xf] }
 0x193   : > { %945 = vst [vmem:[%s8533_s7 + $0x5f4] sm:$0xf] %v944_v61  ;;  %v1072_v61 = vld [vmem:[%s8528_s6 + $0xde8] sm:$0xf] }
 0x194   : > { %947 = vst [vmem:[%s8533_s7 + $0x5f8] sm:$0xf] %v946_v62  ;;  %v1074_v62 = vld [vmem:[%s8528_s6 + $0xdf0] sm:$0xf] }
 0x195   : > { %949 = vst [vmem:[%s8533_s7 + $0x5fc] sm:$0xf] %v948_v63  ;;  %v1076_v63 = vld [vmem:[%s8528_s6 + $0xdf8] sm:$0xf] }
 0x196   : > { %951 = vst [vmem:[%s8533_s7 + $0x600] sm:$0xf] %v950_v0  ;;  %v1078_v0 = vld [vmem:[%s8528_s6 + $0xe00] sm:$0xf] }
 0x197   : > { %953 = vst [vmem:[%s8533_s7 + $0x604] sm:$0xf] %v952_v1  ;;  %v1080_v1 = vld [vmem:[%s8528_s6 + $0xe08] sm:$0xf] }
 0x198   : > { %955 = vst [vmem:[%s8533_s7 + $0x608] sm:$0xf] %v954_v2  ;;  %v1082_v2 = vld [vmem:[%s8528_s6 + $0xe10] sm:$0xf] }
 0x199   : > { %957 = vst [vmem:[%s8533_s7 + $0x60c] sm:$0xf] %v956_v3  ;;  %v1084_v3 = vld [vmem:[%s8528_s6 + $0xe18] sm:$0xf] }
 0x19a   : > { %959 = vst [vmem:[%s8533_s7 + $0x610] sm:$0xf] %v958_v4  ;;  %v1086_v4 = vld [vmem:[%s8528_s6 + $0xe20] sm:$0xf] }
 0x19b   : > { %961 = vst [vmem:[%s8533_s7 + $0x614] sm:$0xf] %v960_v5  ;;  %v1088_v5 = vld [vmem:[%s8528_s6 + $0xe28] sm:$0xf] }
 0x19c   : > { %963 = vst [vmem:[%s8533_s7 + $0x618] sm:$0xf] %v962_v6  ;;  %v1090_v6 = vld [vmem:[%s8528_s6 + $0xe30] sm:$0xf] }
 0x19d   : > { %965 = vst [vmem:[%s8533_s7 + $0x61c] sm:$0xf] %v964_v7  ;;  %v1092_v7 = vld [vmem:[%s8528_s6 + $0xe38] sm:$0xf] }
 0x19e   : > { %967 = vst [vmem:[%s8533_s7 + $0x620] sm:$0xf] %v966_v8  ;;  %v1094_v8 = vld [vmem:[%s8528_s6 + $0xe40] sm:$0xf] }
 0x19f   : > { %969 = vst [vmem:[%s8533_s7 + $0x624] sm:$0xf] %v968_v9  ;;  %v1096_v9 = vld [vmem:[%s8528_s6 + $0xe48] sm:$0xf] }
 0x1a0   : > { %971 = vst [vmem:[%s8533_s7 + $0x628] sm:$0xf] %v970_v10  ;;  %v1098_v10 = vld [vmem:[%s8528_s6 + $0xe50] sm:$0xf] }
 0x1a1   : > { %973 = vst [vmem:[%s8533_s7 + $0x62c] sm:$0xf] %v972_v11  ;;  %v1100_v11 = vld [vmem:[%s8528_s6 + $0xe58] sm:$0xf] }
 0x1a2   : > { %975 = vst [vmem:[%s8533_s7 + $0x630] sm:$0xf] %v974_v12  ;;  %v1102_v12 = vld [vmem:[%s8528_s6 + $0xe60] sm:$0xf] }
 0x1a3   : > { %977 = vst [vmem:[%s8533_s7 + $0x634] sm:$0xf] %v976_v13  ;;  %v1104_v13 = vld [vmem:[%s8528_s6 + $0xe68] sm:$0xf] }
 0x1a4   : > { %979 = vst [vmem:[%s8533_s7 + $0x638] sm:$0xf] %v978_v14  ;;  %v1106_v14 = vld [vmem:[%s8528_s6 + $0xe70] sm:$0xf] }
 0x1a5   : > { %981 = vst [vmem:[%s8533_s7 + $0x63c] sm:$0xf] %v980_v15  ;;  %v1108_v15 = vld [vmem:[%s8528_s6 + $0xe78] sm:$0xf] }
 0x1a6   : > { %983 = vst [vmem:[%s8533_s7 + $0x640] sm:$0xf] %v982_v16  ;;  %v1110_v16 = vld [vmem:[%s8528_s6 + $0xe80] sm:$0xf] }
 0x1a7   : > { %985 = vst [vmem:[%s8533_s7 + $0x644] sm:$0xf] %v984_v17  ;;  %v1112_v17 = vld [vmem:[%s8528_s6 + $0xe88] sm:$0xf] }
 0x1a8   : > { %987 = vst [vmem:[%s8533_s7 + $0x648] sm:$0xf] %v986_v18  ;;  %v1114_v18 = vld [vmem:[%s8528_s6 + $0xe90] sm:$0xf] }
 0x1a9   : > { %989 = vst [vmem:[%s8533_s7 + $0x64c] sm:$0xf] %v988_v19  ;;  %v1116_v19 = vld [vmem:[%s8528_s6 + $0xe98] sm:$0xf] }
 0x1aa   : > { %991 = vst [vmem:[%s8533_s7 + $0x650] sm:$0xf] %v990_v20  ;;  %v1118_v20 = vld [vmem:[%s8528_s6 + $0xea0] sm:$0xf] }
 0x1ab   : > { %993 = vst [vmem:[%s8533_s7 + $0x654] sm:$0xf] %v992_v21  ;;  %v1120_v21 = vld [vmem:[%s8528_s6 + $0xea8] sm:$0xf] }
 0x1ac   : > { %995 = vst [vmem:[%s8533_s7 + $0x658] sm:$0xf] %v994_v22  ;;  %v1122_v22 = vld [vmem:[%s8528_s6 + $0xeb0] sm:$0xf] }
 0x1ad   : > { %997 = vst [vmem:[%s8533_s7 + $0x65c] sm:$0xf] %v996_v23  ;;  %v1124_v23 = vld [vmem:[%s8528_s6 + $0xeb8] sm:$0xf] }
 0x1ae   : > { %999 = vst [vmem:[%s8533_s7 + $0x660] sm:$0xf] %v998_v24  ;;  %v1126_v24 = vld [vmem:[%s8528_s6 + $0xec0] sm:$0xf] }
 0x1af   : > { %1001 = vst [vmem:[%s8533_s7 + $0x664] sm:$0xf] %v1000_v25  ;;  %v1128_v25 = vld [vmem:[%s8528_s6 + $0xec8] sm:$0xf] }
 0x1b0   : > { %1003 = vst [vmem:[%s8533_s7 + $0x668] sm:$0xf] %v1002_v26  ;;  %v1130_v26 = vld [vmem:[%s8528_s6 + $0xed0] sm:$0xf] }
 0x1b1   : > { %1005 = vst [vmem:[%s8533_s7 + $0x66c] sm:$0xf] %v1004_v27  ;;  %v1132_v27 = vld [vmem:[%s8528_s6 + $0xed8] sm:$0xf] }
 0x1b2   : > { %1007 = vst [vmem:[%s8533_s7 + $0x670] sm:$0xf] %v1006_v28  ;;  %v1134_v28 = vld [vmem:[%s8528_s6 + $0xee0] sm:$0xf] }
 0x1b3   : > { %1009 = vst [vmem:[%s8533_s7 + $0x674] sm:$0xf] %v1008_v29  ;;  %v1136_v29 = vld [vmem:[%s8528_s6 + $0xee8] sm:$0xf] }
 0x1b4   : > { %1011 = vst [vmem:[%s8533_s7 + $0x678] sm:$0xf] %v1010_v30  ;;  %v1138_v30 = vld [vmem:[%s8528_s6 + $0xef0] sm:$0xf] }
 0x1b5   : > { %1013 = vst [vmem:[%s8533_s7 + $0x67c] sm:$0xf] %v1012_v31  ;;  %v1140_v31 = vld [vmem:[%s8528_s6 + $0xef8] sm:$0xf] }
 0x1b6   : > { %1015 = vst [vmem:[%s8533_s7 + $0x680] sm:$0xf] %v1014_v32  ;;  %v1142_v32 = vld [vmem:[%s8528_s6 + $0xf00] sm:$0xf] }
 0x1b7   : > { %1017 = vst [vmem:[%s8533_s7 + $0x684] sm:$0xf] %v1016_v33  ;;  %v1144_v33 = vld [vmem:[%s8528_s6 + $0xf08] sm:$0xf] }
 0x1b8   : > { %1019 = vst [vmem:[%s8533_s7 + $0x688] sm:$0xf] %v1018_v34  ;;  %v1146_v34 = vld [vmem:[%s8528_s6 + $0xf10] sm:$0xf] }
 0x1b9   : > { %1021 = vst [vmem:[%s8533_s7 + $0x68c] sm:$0xf] %v1020_v35  ;;  %v1148_v35 = vld [vmem:[%s8528_s6 + $0xf18] sm:$0xf] }
 0x1ba   : > { %1023 = vst [vmem:[%s8533_s7 + $0x690] sm:$0xf] %v1022_v36  ;;  %v1150_v36 = vld [vmem:[%s8528_s6 + $0xf20] sm:$0xf] }
 0x1bb   : > { %1025 = vst [vmem:[%s8533_s7 + $0x694] sm:$0xf] %v1024_v37  ;;  %v1152_v37 = vld [vmem:[%s8528_s6 + $0xf28] sm:$0xf] }
 0x1bc   : > { %1027 = vst [vmem:[%s8533_s7 + $0x698] sm:$0xf] %v1026_v38  ;;  %v1154_v38 = vld [vmem:[%s8528_s6 + $0xf30] sm:$0xf] }
 0x1bd   : > { %1029 = vst [vmem:[%s8533_s7 + $0x69c] sm:$0xf] %v1028_v39  ;;  %v1156_v39 = vld [vmem:[%s8528_s6 + $0xf38] sm:$0xf] }
 0x1be   : > { %1031 = vst [vmem:[%s8533_s7 + $0x6a0] sm:$0xf] %v1030_v40  ;;  %v1158_v40 = vld [vmem:[%s8528_s6 + $0xf40] sm:$0xf] }
 0x1bf   : > { %1033 = vst [vmem:[%s8533_s7 + $0x6a4] sm:$0xf] %v1032_v41  ;;  %v1160_v41 = vld [vmem:[%s8528_s6 + $0xf48] sm:$0xf] }
 0x1c0   : > { %1035 = vst [vmem:[%s8533_s7 + $0x6a8] sm:$0xf] %v1034_v42  ;;  %v1162_v42 = vld [vmem:[%s8528_s6 + $0xf50] sm:$0xf] }
 0x1c1   : > { %1037 = vst [vmem:[%s8533_s7 + $0x6ac] sm:$0xf] %v1036_v43  ;;  %v1164_v43 = vld [vmem:[%s8528_s6 + $0xf58] sm:$0xf] }
 0x1c2   : > { %1039 = vst [vmem:[%s8533_s7 + $0x6b0] sm:$0xf] %v1038_v44  ;;  %v1166_v44 = vld [vmem:[%s8528_s6 + $0xf60] sm:$0xf] }
 0x1c3   : > { %1041 = vst [vmem:[%s8533_s7 + $0x6b4] sm:$0xf] %v1040_v45  ;;  %v1168_v45 = vld [vmem:[%s8528_s6 + $0xf68] sm:$0xf] }
 0x1c4   : > { %1043 = vst [vmem:[%s8533_s7 + $0x6b8] sm:$0xf] %v1042_v46  ;;  %v1170_v46 = vld [vmem:[%s8528_s6 + $0xf70] sm:$0xf] }
 0x1c5   : > { %1045 = vst [vmem:[%s8533_s7 + $0x6bc] sm:$0xf] %v1044_v47  ;;  %v1172_v47 = vld [vmem:[%s8528_s6 + $0xf78] sm:$0xf] }
 0x1c6   : > { %1047 = vst [vmem:[%s8533_s7 + $0x6c0] sm:$0xf] %v1046_v48  ;;  %v1174_v48 = vld [vmem:[%s8528_s6 + $0xf80] sm:$0xf] }
 0x1c7   : > { %1049 = vst [vmem:[%s8533_s7 + $0x6c4] sm:$0xf] %v1048_v49  ;;  %v1176_v49 = vld [vmem:[%s8528_s6 + $0xf88] sm:$0xf] }
 0x1c8   : > { %1051 = vst [vmem:[%s8533_s7 + $0x6c8] sm:$0xf] %v1050_v50  ;;  %v1178_v50 = vld [vmem:[%s8528_s6 + $0xf90] sm:$0xf] }
 0x1c9   : > { %1053 = vst [vmem:[%s8533_s7 + $0x6cc] sm:$0xf] %v1052_v51  ;;  %v1180_v51 = vld [vmem:[%s8528_s6 + $0xf98] sm:$0xf] }
 0x1ca   : > { %1055 = vst [vmem:[%s8533_s7 + $0x6d0] sm:$0xf] %v1054_v52  ;;  %v1182_v52 = vld [vmem:[%s8528_s6 + $0xfa0] sm:$0xf] }
 0x1cb   : > { %1057 = vst [vmem:[%s8533_s7 + $0x6d4] sm:$0xf] %v1056_v53  ;;  %v1184_v53 = vld [vmem:[%s8528_s6 + $0xfa8] sm:$0xf] }
 0x1cc   : > { %1059 = vst [vmem:[%s8533_s7 + $0x6d8] sm:$0xf] %v1058_v54  ;;  %v1186_v54 = vld [vmem:[%s8528_s6 + $0xfb0] sm:$0xf] }
 0x1cd   : > { %1061 = vst [vmem:[%s8533_s7 + $0x6dc] sm:$0xf] %v1060_v55  ;;  %v1188_v55 = vld [vmem:[%s8528_s6 + $0xfb8] sm:$0xf] }
 0x1ce   : > { %1063 = vst [vmem:[%s8533_s7 + $0x6e0] sm:$0xf] %v1062_v56  ;;  %v1190_v56 = vld [vmem:[%s8528_s6 + $0xfc0] sm:$0xf] }
 0x1cf   : > { %1065 = vst [vmem:[%s8533_s7 + $0x6e4] sm:$0xf] %v1064_v57  ;;  %v1192_v57 = vld [vmem:[%s8528_s6 + $0xfc8] sm:$0xf] }
 0x1d0   : > { %1067 = vst [vmem:[%s8533_s7 + $0x6e8] sm:$0xf] %v1066_v58  ;;  %v1194_v58 = vld [vmem:[%s8528_s6 + $0xfd0] sm:$0xf] }
 0x1d1   : > { %1069 = vst [vmem:[%s8533_s7 + $0x6ec] sm:$0xf] %v1068_v59  ;;  %v1196_v59 = vld [vmem:[%s8528_s6 + $0xfd8] sm:$0xf] }
 0x1d2   : > { %1071 = vst [vmem:[%s8533_s7 + $0x6f0] sm:$0xf] %v1070_v60  ;;  %v1198_v60 = vld [vmem:[%s8528_s6 + $0xfe0] sm:$0xf] }
 0x1d3   : > { %1073 = vst [vmem:[%s8533_s7 + $0x6f4] sm:$0xf] %v1072_v61  ;;  %v1200_v61 = vld [vmem:[%s8528_s6 + $0xfe8] sm:$0xf] }
 0x1d4   : > { %1075 = vst [vmem:[%s8533_s7 + $0x6f8] sm:$0xf] %v1074_v62  ;;  %v1202_v62 = vld [vmem:[%s8528_s6 + $0xff0] sm:$0xf] }
 0x1d5   : > { %1077 = vst [vmem:[%s8533_s7 + $0x6fc] sm:$0xf] %v1076_v63  ;;  %v1204_v63 = vld [vmem:[%s8528_s6 + $0xff8] sm:$0xf] }
 0x1d6   : > { %1079 = vst [vmem:[%s8533_s7 + $0x700] sm:$0xf] %v1078_v0 }
 0x1d7   : > { %1081 = vst [vmem:[%s8533_s7 + $0x704] sm:$0xf] %v1080_v1 }
 0x1d8   : > { %1083 = vst [vmem:[%s8533_s7 + $0x708] sm:$0xf] %v1082_v2 }
 0x1d9   : > { %1085 = vst [vmem:[%s8533_s7 + $0x70c] sm:$0xf] %v1084_v3 }
 0x1da   : > { %1087 = vst [vmem:[%s8533_s7 + $0x710] sm:$0xf] %v1086_v4 }
 0x1db   : > { %1089 = vst [vmem:[%s8533_s7 + $0x714] sm:$0xf] %v1088_v5 }
 0x1dc   : > { %1091 = vst [vmem:[%s8533_s7 + $0x718] sm:$0xf] %v1090_v6 }
 0x1dd   : > { %1093 = vst [vmem:[%s8533_s7 + $0x71c] sm:$0xf] %v1092_v7 }
 0x1de   : > { %1095 = vst [vmem:[%s8533_s7 + $0x720] sm:$0xf] %v1094_v8 }
 0x1df   : > { %1097 = vst [vmem:[%s8533_s7 + $0x724] sm:$0xf] %v1096_v9 }
 0x1e0   : > { %1099 = vst [vmem:[%s8533_s7 + $0x728] sm:$0xf] %v1098_v10 }
 0x1e1   : > { %1101 = vst [vmem:[%s8533_s7 + $0x72c] sm:$0xf] %v1100_v11 }
 0x1e2   : > { %1103 = vst [vmem:[%s8533_s7 + $0x730] sm:$0xf] %v1102_v12 }
 0x1e3   : > { %1105 = vst [vmem:[%s8533_s7 + $0x734] sm:$0xf] %v1104_v13 }
 0x1e4   : > { %1107 = vst [vmem:[%s8533_s7 + $0x738] sm:$0xf] %v1106_v14 }
 0x1e5   : > { %1109 = vst [vmem:[%s8533_s7 + $0x73c] sm:$0xf] %v1108_v15 }
 0x1e6   : > { %1111 = vst [vmem:[%s8533_s7 + $0x740] sm:$0xf] %v1110_v16 }
 0x1e7   : > { %1113 = vst [vmem:[%s8533_s7 + $0x744] sm:$0xf] %v1112_v17 }
 0x1e8   : > { %1115 = vst [vmem:[%s8533_s7 + $0x748] sm:$0xf] %v1114_v18 }
 0x1e9   : > { %1117 = vst [vmem:[%s8533_s7 + $0x74c] sm:$0xf] %v1116_v19 }
 0x1ea   : > { %1119 = vst [vmem:[%s8533_s7 + $0x750] sm:$0xf] %v1118_v20 }
 0x1eb   : > { %1121 = vst [vmem:[%s8533_s7 + $0x754] sm:$0xf] %v1120_v21 }
 0x1ec   : > { %1123 = vst [vmem:[%s8533_s7 + $0x758] sm:$0xf] %v1122_v22 }
 0x1ed   : > { %1125 = vst [vmem:[%s8533_s7 + $0x75c] sm:$0xf] %v1124_v23 }
 0x1ee   : > { %1127 = vst [vmem:[%s8533_s7 + $0x760] sm:$0xf] %v1126_v24 }
 0x1ef   : > { %1129 = vst [vmem:[%s8533_s7 + $0x764] sm:$0xf] %v1128_v25 }
 0x1f0   : > { %1131 = vst [vmem:[%s8533_s7 + $0x768] sm:$0xf] %v1130_v26 }
 0x1f1   : > { %1133 = vst [vmem:[%s8533_s7 + $0x76c] sm:$0xf] %v1132_v27 }
 0x1f2   : > { %1135 = vst [vmem:[%s8533_s7 + $0x770] sm:$0xf] %v1134_v28 }
 0x1f3   : > { %1137 = vst [vmem:[%s8533_s7 + $0x774] sm:$0xf] %v1136_v29 }
 0x1f4   : > { %1139 = vst [vmem:[%s8533_s7 + $0x778] sm:$0xf] %v1138_v30 }
 0x1f5   : > { %1141 = vst [vmem:[%s8533_s7 + $0x77c] sm:$0xf] %v1140_v31 }
 0x1f6   : > { %1143 = vst [vmem:[%s8533_s7 + $0x780] sm:$0xf] %v1142_v32 }
 0x1f7   : > { %1145 = vst [vmem:[%s8533_s7 + $0x784] sm:$0xf] %v1144_v33 }
 0x1f8   : > { %1147 = vst [vmem:[%s8533_s7 + $0x788] sm:$0xf] %v1146_v34 }
 0x1f9   : > { %1149 = vst [vmem:[%s8533_s7 + $0x78c] sm:$0xf] %v1148_v35 }
 0x1fa   : > { %1151 = vst [vmem:[%s8533_s7 + $0x790] sm:$0xf] %v1150_v36 }
 0x1fb   : > { %1153 = vst [vmem:[%s8533_s7 + $0x794] sm:$0xf] %v1152_v37 }
 0x1fc   : > { %1155 = vst [vmem:[%s8533_s7 + $0x798] sm:$0xf] %v1154_v38 }
 0x1fd   : > { %1157 = vst [vmem:[%s8533_s7 + $0x79c] sm:$0xf] %v1156_v39 }
 0x1fe   : > { %1159 = vst [vmem:[%s8533_s7 + $0x7a0] sm:$0xf] %v1158_v40 }
 0x1ff   : > { %1161 = vst [vmem:[%s8533_s7 + $0x7a4] sm:$0xf] %v1160_v41 }
 0x200   : > { %1163 = vst [vmem:[%s8533_s7 + $0x7a8] sm:$0xf] %v1162_v42 }
 0x201   : > { %1165 = vst [vmem:[%s8533_s7 + $0x7ac] sm:$0xf] %v1164_v43 }
 0x202   : > { %1167 = vst [vmem:[%s8533_s7 + $0x7b0] sm:$0xf] %v1166_v44 }
 0x203   : > { %1169 = vst [vmem:[%s8533_s7 + $0x7b4] sm:$0xf] %v1168_v45 }
 0x204   : > { %1171 = vst [vmem:[%s8533_s7 + $0x7b8] sm:$0xf] %v1170_v46 }
 0x205   : > { %1173 = vst [vmem:[%s8533_s7 + $0x7bc] sm:$0xf] %v1172_v47 }
 0x206   : > { %1175 = vst [vmem:[%s8533_s7 + $0x7c0] sm:$0xf] %v1174_v48 }
 0x207   : > { %1177 = vst [vmem:[%s8533_s7 + $0x7c4] sm:$0xf] %v1176_v49 }
 0x208   : > { %1179 = vst [vmem:[%s8533_s7 + $0x7c8] sm:$0xf] %v1178_v50 }
 0x209   : > { %1181 = vst [vmem:[%s8533_s7 + $0x7cc] sm:$0xf] %v1180_v51 }
 0x20a   : > { %1183 = vst [vmem:[%s8533_s7 + $0x7d0] sm:$0xf] %v1182_v52 }
 0x20b   : > { %1185 = vst [vmem:[%s8533_s7 + $0x7d4] sm:$0xf] %v1184_v53 }
 0x20c   : > { %1187 = vst [vmem:[%s8533_s7 + $0x7d8] sm:$0xf] %v1186_v54 }
 0x20d   : > { %1189 = vst [vmem:[%s8533_s7 + $0x7dc] sm:$0xf] %v1188_v55 }
 0x20e   : > { %1191 = vst [vmem:[%s8533_s7 + $0x7e0] sm:$0xf] %v1190_v56 }
 0x20f   : > { %1193 = vst [vmem:[%s8533_s7 + $0x7e4] sm:$0xf] %v1192_v57 }
 0x210   : > { %1195 = vst [vmem:[%s8533_s7 + $0x7e8] sm:$0xf] %v1194_v58 }
 0x211   : > { %1197 = vst [vmem:[%s8533_s7 + $0x7ec] sm:$0xf] %v1196_v59 }
 0x212   : > { %1199 = vst [vmem:[%s8533_s7 + $0x7f0] sm:$0xf] %v1198_v60 }
 0x213   : > { %1201 = vst [vmem:[%s8533_s7 + $0x7f4] sm:$0xf] %v1200_v61 }
 0x214   : > { %1203 = vst [vmem:[%s8533_s7 + $0x7f8] sm:$0xf] %v1202_v62 }
 0x215   : > { %1205 = vst [vmem:[%s8533_s7 + $0x7fc] sm:$0xf] %v1204_v63 }
 0x216 PF: > { %p7046_p7 = scmp.ge.s32.totalorder %s8446_s18, 1  ;;  %p4332_p8 = scmp.lt.s32.totalorder %s8446_s18, 5 }
 0x218   : > { %p4333_p9 = pnand %p7046_p7, %p4332_p8 }
 0x219   : > { %s4339_s8 = sand.u32 (!%p4333_p9), 1, %s8422_s12   ;;  %s7048_s9 = sshll.u32 (!%p4333_p9), %s8430_s14, 5 }
 0x21a   : > { %4336 = sbr.rel (%p4333_p9) target bundleno = 959 (0x3bf), region = 80  ;;  %s7047_s10 = sshll.u32 (!%p4333_p9), %s4339_s8, 11 }
 0x21b   : > { %p4369_p10 = scmp.lt.s32.totalorder (!%p4333_p9), %s7048_s9, 63  ;;  %p4374_p11 = scmp.lt.s32.totalorder (!%p4333_p9), %s8434_s15, 1 }
 0x21c   : > { %s9575_s30 = scalar_lea.vmem (!%p4333_p9), [#allocation2], %s7047_s10  ;;  %p7050_p12 = scmp.ne.s32.totalorder (!%p4333_p9), %s8430_s14, 0 }
 0x21f   : > { %s9885_s9 = smov (!%p4369_p10, %s7048_s9), 63  ;;  %s9887_s15 = smov (!%p4374_p11, %s8434_s15), 1 }
 0x220   : > { %s9565_s22 = scalar_lea.vmem %s9868_s0, %s9885_s9  ;;  %s4376_s26 = scalar_lea.vmem %s9870_s2, %s9887_s15 }
 0x221   : > { %s7049_s27 = sshll.u32 %s9887_s15, 1  ;;  %4384 = sbr.rel (%p7050_p12) target bundleno = 552 (0x228), region = 88 }
 0x222   : > { %s9573_s12 = scalar_lea.vmem %s9871_s3, %s7049_s27 }
 0x226   : > { %v8391_v0 = vld [vmem:[%s4376_s26] ss:$0 sm:$0xff] }
 0x227   : > { %4389 = vst [vmem:[%s9573_s12] sm:$0x3] %v8391_v0 }
 0x228 PF: > { %v8086_v1 = vld [vmem:[%s9575_s30 + $0x38] sm:$0xff]  ;;  %v8085_v5 = vld [vmem:[%s9575_s30 + $0x30] sm:$0xff]  ;;  %v8084_v9 = vld [vmem:[%s9575_s30 + $0x28] sm:$0xff]  ;;  %p8075_p13 = scmp.ne.s32.totalorder %s8430_s14, 1 }
 0x229   : > { %v8094_v2 = vld [vmem:[%s9575_s30 + $0x78] sm:$0xff]  ;;  %6515 = vmatpush.bf16.msra.mxu0 %v8086_v1  ;;  %v8093_v6 = vld [vmem:[%s9575_s30 + $0x70] sm:$0xff]  ;;  %v8092_v10 = vld [vmem:[%s9575_s30 + $0x68] sm:$0xff] }
 0x22a   : > { %v8102_v3 = vld [vmem:[%s9575_s30 + $0xb8] sm:$0xff]  ;;  %6528 = vmatpush.bf16.msra.mxu1 %v8094_v2  ;;  %v8101_v7 = vld [vmem:[%s9575_s30 + $0xb0] sm:$0xff]  ;;  %v8100_v11 = vld [vmem:[%s9575_s30 + $0xa8] sm:$0xff] }
 0x22b   : > { %v8110_v4 = vld [vmem:[%s9575_s30 + $0xf8] sm:$0xff]  ;;  %6541 = vmatpush.bf16.msra.mxu2 %v8102_v3  ;;  %v8109_v8 = vld [vmem:[%s9575_s30 + $0xf0] sm:$0xff]  ;;  %v8108_v12 = vld [vmem:[%s9575_s30 + $0xe8] sm:$0xff] }
 0x22c   : > { %6554 = vmatpush.bf16.msra.mxu3 %v8110_v4  ;;  %v8083_v13 = vld [vmem:[%s9575_s30 + $0x20] sm:$0xff]  ;;  %v8082_v17 = vld [vmem:[%s9575_s30 + $0x18] sm:$0xff]  ;;  %v8081_v22 = vld [vmem:[%s9575_s30 + $0x10] sm:$0xff] }
 0x22d   : > { %6516 = vmatpush.bf16.msra.mxu0 %v8085_v5  ;;  %v8091_v14 = vld [vmem:[%s9575_s30 + $0x60] sm:$0xff]  ;;  %v8090_v18 = vld [vmem:[%s9575_s30 + $0x58] sm:$0xff]  ;;  %v8089_v23 = vld [vmem:[%s9575_s30 + $0x50] sm:$0xff] }
 0x22e   : > { %6529 = vmatpush.bf16.msra.mxu1 %v8093_v6  ;;  %v8099_v15 = vld [vmem:[%s9575_s30 + $0xa0] sm:$0xff]  ;;  %v8098_v19 = vld [vmem:[%s9575_s30 + $0x98] sm:$0xff]  ;;  %v8097_v24 = vld [vmem:[%s9575_s30 + $0x90] sm:$0xff] }
 0x22f   : > { %6542 = vmatpush.bf16.msra.mxu2 %v8101_v7  ;;  %v8107_v16 = vld [vmem:[%s9575_s30 + $0xe0] sm:$0xff]  ;;  %v8106_v20 = vld [vmem:[%s9575_s30 + $0xd8] sm:$0xff]  ;;  %v8105_v25 = vld [vmem:[%s9575_s30 + $0xd0] sm:$0xff] }
 0x230   : > { %6555 = vmatpush.bf16.msra.mxu3 %v8109_v8  ;;  %v4391_v21 = vld [vmem:[%s9565_s22] sm:$0xff]  ;;  %v8080_v26 = vld [vmem:[%s9575_s30 + $0x8] sm:$0xff]  ;;  %v8079_v30 = vld [vmem:[%s9575_s30] sm:$0xff] }
 0x231   : > { %6517 = vmatpush.bf16.msra.mxu0 %v8084_v9  ;;  %4908 = vst [vmem:[#allocation1] ss:$9 sm:$0xff] %v4391_v21  ;;  %v8088_v27 = vld [vmem:[%s9575_s30 + $0x48] sm:$0xff]  ;;  %v8087_v31 = vld [vmem:[%s9575_s30 + $0x40] sm:$0xff]  ;;  %v8118_v34 = vld [vmem:[%s9575_s30 + $0x138] sm:$0xff] }
 0x232   : > { %6530 = vmatpush.bf16.msra.mxu1 %v8092_v10  ;;  %v8096_v28 = vld [vmem:[%s9575_s30 + $0x88] sm:$0xff]  ;;  %v8095_v32 = vld [vmem:[%s9575_s30 + $0x80] sm:$0xff]  ;;  %v8126_v35 = vld [vmem:[%s9575_s30 + $0x178] sm:$0xff] }
 0x233   : > { %6543 = vmatpush.bf16.msra.mxu2 %v8100_v11  ;;  %v8104_v29 = vld [vmem:[%s9575_s30 + $0xc8] sm:$0xff]  ;;  %v8103_v33 = vld [vmem:[%s9575_s30 + $0xc0] sm:$0xff]  ;;  %v8134_v36 = vld [vmem:[%s9575_s30 + $0x1b8] sm:$0xff] }
 0x234   : > { %6556 = vmatpush.bf16.msra.mxu3 %v8108_v12  ;;  %v8142_v37 = vld [vmem:[%s9575_s30 + $0x1f8] sm:$0xff]  ;;  %v8117_v38 = vld [vmem:[%s9575_s30 + $0x130] sm:$0xff]  ;;  %v8116_v46 = vld [vmem:[%s9575_s30 + $0x128] sm:$0xff] }
 0x235   : > { %6518 = vmatpush.bf16.msra.mxu0 %v8083_v13  ;;  %v8125_v41 = vld [vmem:[%s9575_s30 + $0x170] sm:$0xff]  ;;  %v8124_v47 = vld [vmem:[%s9575_s30 + $0x168] sm:$0xff]  ;;  %v4392_v53 = vld [vmem:[%s9565_s22 + $0x8] sm:$0xff] }
 0x236   : > { %6531 = vmatpush.bf16.msra.mxu1 %v8091_v14  ;;  %v8133_v44 = vld [vmem:[%s9575_s30 + $0x1b0] sm:$0xff]  ;;  %v8132_v48 = vld [vmem:[%s9575_s30 + $0x1a8] sm:$0xff]  ;;  %v8115_v55 = vld [vmem:[%s9575_s30 + $0x120] sm:$0xff] }
 0x237   : > { %6544 = vmatpush.bf16.msra.mxu2 %v8099_v15  ;;  %v8141_v45 = vld [vmem:[%s9575_s30 + $0x1f0] sm:$0xff]  ;;  %v8140_v49 = vld [vmem:[%s9575_s30 + $0x1e8] sm:$0xff]  ;;  %v8123_v56 = vld [vmem:[%s9575_s30 + $0x160] sm:$0xff] }
 0x238   : > { %6557 = vmatpush.bf16.msra.mxu3 %v8107_v16  ;;  %v4911_v39 = vld [vmem:[#allocation1 + $0x12] sm:$0xff]  ;;  %v4909_v40 = vld [vmem:[#allocation1] sm:$0xff]  ;;  %v4910_v43 = vld [vmem:[#allocation1 + $0x9] sm:$0xff] }
 0x239   : > { %6519 = vmatpush.bf16.msra.mxu0 %v8082_v17  ;;  %v4912_v42 = vld [vmem:[#allocation1 + $0x1b] sm:$0xff]  ;;  %v4913_v51 = vld [vmem:[#allocation1 + $0x24] sm:$0xff]  ;;  %v4914_v54 = vld [vmem:[#allocation1 + $0x2d] sm:$0xff] }
 0x23a   : > { %6532 = vmatpush.bf16.msra.mxu1 %v8090_v18  ;;  %v4915_v50 = vld [vmem:[#allocation1 + $0x36] sm:$0xff]  ;;  %v4916_v52 = vld [vmem:[#allocation1 + $0x3f] sm:$0xff]  ;;  %v8131_v57 = vld [vmem:[%s9575_s30 + $0x1a0] sm:$0xff] }
 0x23b   : > { %6545 = vmatpush.bf16.msra.mxu2 %v8098_v19  ;;  %4918 = vst [vmem:[#allocation1] ss:$9 sm:$0xff] %v4392_v53  ;;  %v8139_v58 = vld [vmem:[%s9575_s30 + $0x1e0] sm:$0xff]  ;;  %v8114_v59 = vld [vmem:[%s9575_s30 + $0x118] sm:$0xff]  ;;  %v8113_v63 = vld [vmem:[%s9575_s30 + $0x110] sm:$0xff] }
 0x23c   : > { %6558 = vmatpush.bf16.msra.mxu3 %v8106_v20  ;;  %v8122_v60 = vld [vmem:[%s9575_s30 + $0x158] sm:$0xff]  ;;  %v8121_v0 = vld [vmem:[%s9575_s30 + $0x150] sm:$0xff]  ;;  %v8112_v3 = vld [vmem:[%s9575_s30 + $0x108] sm:$0xff] }
 0x23d   : > { %6520 = vmatpush.bf16.msra.mxu0 %v8081_v22  ;;  %v8130_v61 = vld [vmem:[%s9575_s30 + $0x198] sm:$0xff]  ;;  %v8129_v1 = vld [vmem:[%s9575_s30 + $0x190] sm:$0xff]  ;;  %v8120_v4 = vld [vmem:[%s9575_s30 + $0x148] sm:$0xff] }
 0x23e   : > { %6533 = vmatpush.bf16.msra.mxu1 %v8089_v23  ;;  %v8138_v62 = vld [vmem:[%s9575_s30 + $0x1d8] sm:$0xff]  ;;  %v8137_v2 = vld [vmem:[%s9575_s30 + $0x1d0] sm:$0xff]  ;;  %v8128_v5 = vld [vmem:[%s9575_s30 + $0x188] sm:$0xff] }
 0x23f   : > { %6546 = vmatpush.bf16.msra.mxu2 %v8097_v24  ;;  %v8136_v6 = vld [vmem:[%s9575_s30 + $0x1c8] sm:$0xff]  ;;  %v8111_v7 = vld [vmem:[%s9575_s30 + $0x100] sm:$0xff]  ;;  %v8150_v11 = vld [vmem:[%s9575_s30 + $0x238] sm:$0xff] }
 0x240   : > { %6559 = vmatpush.bf16.msra.mxu3 %v8105_v25  ;;  %v8119_v8 = vld [vmem:[%s9575_s30 + $0x140] sm:$0xff]  ;;  %v8158_v12 = vld [vmem:[%s9575_s30 + $0x278] sm:$0xff]  ;;  %v8149_v15 = vld [vmem:[%s9575_s30 + $0x230] sm:$0xff] }
 0x241   : > { %6521 = vmatpush.bf16.msra.mxu0 %v8080_v26  ;;  %v8127_v9 = vld [vmem:[%s9575_s30 + $0x180] sm:$0xff]  ;;  %v8166_v13 = vld [vmem:[%s9575_s30 + $0x2b8] sm:$0xff]  ;;  %v8157_v16 = vld [vmem:[%s9575_s30 + $0x270] sm:$0xff] }
 0x242   : > { %6534 = vmatpush.bf16.msra.mxu1 %v8088_v27  ;;  %v8135_v10 = vld [vmem:[%s9575_s30 + $0x1c0] sm:$0xff]  ;;  %v8174_v14 = vld [vmem:[%s9575_s30 + $0x2f8] sm:$0xff]  ;;  %v8165_v17 = vld [vmem:[%s9575_s30 + $0x2b0] sm:$0xff] }
 0x243   : > { %6547 = vmatpush.bf16.msra.mxu2 %v8096_v28  ;;  %v8173_v18 = vld [vmem:[%s9575_s30 + $0x2f0] sm:$0xff]  ;;  %v8148_v19 = vld [vmem:[%s9575_s30 + $0x228] sm:$0xff]  ;;  %v8147_v23 = vld [vmem:[%s9575_s30 + $0x220] sm:$0xff] }
 0x244   : > { %6560 = vmatpush.bf16.msra.mxu3 %v8104_v29  ;;  %v8156_v20 = vld [vmem:[%s9575_s30 + $0x268] sm:$0xff]  ;;  %v8155_v24 = vld [vmem:[%s9575_s30 + $0x260] sm:$0xff]  ;;  %v8146_v27 = vld [vmem:[%s9575_s30 + $0x218] sm:$0xff] }
 0x245   : > { %6522 = vmatpush.bf16.msra.mxu0 %v8079_v30  ;;  %v8164_v21 = vld [vmem:[%s9575_s30 + $0x2a8] sm:$0xff]  ;;  %v8163_v25 = vld [vmem:[%s9575_s30 + $0x2a0] sm:$0xff]  ;;  %v8154_v28 = vld [vmem:[%s9575_s30 + $0x258] sm:$0xff] }
 0x246   : > { %6535 = vmatpush.bf16.msra.mxu1 %v8087_v31  ;;  %v8172_v22 = vld [vmem:[%s9575_s30 + $0x2e8] sm:$0xff]  ;;  %v8171_v26 = vld [vmem:[%s9575_s30 + $0x2e0] sm:$0xff]  ;;  %v8162_v29 = vld [vmem:[%s9575_s30 + $0x298] sm:$0xff] }
 0x247   : > { %6548 = vmatpush.bf16.msra.mxu2 %v8095_v32  ;;  %v8170_v30 = vld [vmem:[%s9575_s30 + $0x2d8] sm:$0xff]  ;;  %v8145_v31 = vld [vmem:[%s9575_s30 + $0x210] sm:$0xff] }
 0x248   : > { %6561 = vmatpush.bf16.msra.mxu3 %v8103_v33  ;;  %6523 = vmatmul.bf16.vlgmr.msra.gmra.mxu0 %v4909_v40  ;;  %v8153_v32 = vld [vmem:[%s9575_s30 + $0x250] sm:$0xff]  ;;  %v8151_v40 = vld [vmem:[%s9575_s30 + $0x240] sm:$0xff] }
 0x249   : > { %6567 = vmatpush.bf16.msrb.mxu0 %v8118_v34  ;;  %6536 = vmatmul.bf16.vlgmr.msra.gmra.mxu1 %v4910_v43  ;;  %v8161_v33 = vld [vmem:[%s9575_s30 + $0x290] sm:$0xff]  ;;  %v8182_v43 = vld [vmem:[%s9575_s30 + $0x338] sm:$0xff] }
 0x24a   : > { %6580 = vmatpush.bf16.msrb.mxu1 %v8126_v35  ;;  %6549 = vmatmul.bf16.vlgmr.msra.gmra.mxu2 %v4911_v39  ;;  %v8169_v34 = vld [vmem:[%s9575_s30 + $0x2d0] sm:$0xff]  ;;  %v8144_v35 = vld [vmem:[%s9575_s30 + $0x208] sm:$0xff]  ;;  %v8143_v39 = vld [vmem:[%s9575_s30 + $0x200] sm:$0xff] }
 0x24b   : > { %6593 = vmatpush.bf16.msrb.mxu2 %v8134_v36  ;;  %6562 = vmatmul.bf16.vlgmr.msra.gmra.mxu3 %v4912_v42  ;;  %v8152_v36 = vld [vmem:[%s9575_s30 + $0x248] sm:$0xff]  ;;  %v8167_v42 = vld [vmem:[%s9575_s30 + $0x2c0] sm:$0xff]  ;;  %v8197_v53 = vld [vmem:[%s9575_s30 + $0x3b0] sm:$0xff] }
 0x24c   : > { %6606 = vmatpush.bf16.msrb.mxu3 %v8142_v37  ;;  %v8160_v37 = vld [vmem:[%s9575_s30 + $0x288] sm:$0xff] }
 0x24d   : > { %6568 = vmatpush.bf16.msrb.mxu0 %v8117_v38  ;;  %v8168_v38 = vld [vmem:[%s9575_s30 + $0x2c8] sm:$0xff] }
 0x24e   : > { %6581 = vmatpush.bf16.msrb.mxu1 %v8125_v41  ;;  %v8159_v41 = vld [vmem:[%s9575_s30 + $0x280] sm:$0xff] }
 0x24f   : > { %6594 = vmatpush.bf16.msrb.mxu2 %v8133_v44  ;;  %v8190_v44 = vld [vmem:[%s9575_s30 + $0x378] sm:$0xff] }
 0x250   : > { %6607 = vmatpush.bf16.msrb.mxu3 %v8141_v45  ;;  %v8198_v45 = vld [vmem:[%s9575_s30 + $0x3b8] sm:$0xff] }
 0x251   : > { %6569 = vmatpush.bf16.msrb.mxu0 %v8116_v46  ;;  %v8206_v46 = vld [vmem:[%s9575_s30 + $0x3f8] sm:$0xff] }
 0x252   : > { %6582 = vmatpush.bf16.msrb.mxu1 %v8124_v47  ;;  %v4919_v47 = vld [vmem:[#allocation1] sm:$0xff] }
 0x253   : > { %6595 = vmatpush.bf16.msrb.mxu2 %v8132_v48  ;;  %v4921_v48 = vld [vmem:[#allocation1 + $0x12] sm:$0xff] }
 0x254   : > { %6608 = vmatpush.bf16.msrb.mxu3 %v8140_v49  ;;  %v4920_v49 = vld [vmem:[#allocation1 + $0x9] sm:$0xff] }
 0x255   : > { %6570 = vmatpush.bf16.msrb.mxu0 %v8115_v55  ;;  %v8180_v55 = vld [vmem:[%s9575_s30 + $0x328] sm:$0xff] }
 0x256   : > { %6583 = vmatpush.bf16.msrb.mxu1 %v8123_v56  ;;  %v8188_v56 = vld [vmem:[%s9575_s30 + $0x368] sm:$0xff] }
 0x257   : > { %6596 = vmatpush.bf16.msrb.mxu2 %v8131_v57  ;;  %v8196_v57 = vld [vmem:[%s9575_s30 + $0x3a8] sm:$0xff] }
 0x258   : > { %6609 = vmatpush.bf16.msrb.mxu3 %v8139_v58  ;;  %v8204_v58 = vld [vmem:[%s9575_s30 + $0x3e8] sm:$0xff] }
 0x259   : > { %6571 = vmatpush.bf16.msrb.mxu0 %v8114_v59  ;;  %v8179_v59 = vld [vmem:[%s9575_s30 + $0x320] sm:$0xff] }
 0x25a   : > { %6584 = vmatpush.bf16.msrb.mxu1 %v8122_v60  ;;  %v8187_v60 = vld [vmem:[%s9575_s30 + $0x360] sm:$0xff] }
 0x25b   : > { %6597 = vmatpush.bf16.msrb.mxu2 %v8130_v61  ;;  %v8195_v61 = vld [vmem:[%s9575_s30 + $0x3a0] sm:$0xff] }
 0x25c   : > { %6610 = vmatpush.bf16.msrb.mxu3 %v8138_v62  ;;  %v8203_v62 = vld [vmem:[%s9575_s30 + $0x3e0] sm:$0xff] }
 0x25d   : > { %6572 = vmatpush.bf16.msrb.mxu0 %v8113_v63  ;;  %v8178_v63 = vld [vmem:[%s9575_s30 + $0x318] sm:$0xff] }
 0x25e   : > { %6585 = vmatpush.bf16.msrb.mxu1 %v8121_v0  ;;  %v8186_v0 = vld [vmem:[%s9575_s30 + $0x358] sm:$0xff] }
 0x25f   : > { %6598 = vmatpush.bf16.msrb.mxu2 %v8129_v1  ;;  %v8194_v1 = vld [vmem:[%s9575_s30 + $0x398] sm:$0xff] }
 0x260   : > { %6611 = vmatpush.bf16.msrb.mxu3 %v8137_v2  ;;  %v8202_v2 = vld [vmem:[%s9575_s30 + $0x3d8] sm:$0xff] }
 0x261   : > { %6573 = vmatpush.bf16.msrb.mxu0 %v8112_v3  ;;  %v8177_v3 = vld [vmem:[%s9575_s30 + $0x310] sm:$0xff] }
 0x262   : > { %6586 = vmatpush.bf16.msrb.mxu1 %v8120_v4  ;;  %v8185_v4 = vld [vmem:[%s9575_s30 + $0x350] sm:$0xff] }
 0x263   : > { %6599 = vmatpush.bf16.msrb.mxu2 %v8128_v5  ;;  %v8193_v5 = vld [vmem:[%s9575_s30 + $0x390] sm:$0xff] }
 0x264   : > { %6612 = vmatpush.bf16.msrb.mxu3 %v8136_v6  ;;  %v8201_v6 = vld [vmem:[%s9575_s30 + $0x3d0] sm:$0xff] }
 0x265   : > { %6574 = vmatpush.bf16.msrb.mxu0 %v8111_v7  ;;  %v8176_v7 = vld [vmem:[%s9575_s30 + $0x308] sm:$0xff] }
 0x266   : > { %6587 = vmatpush.bf16.msrb.mxu1 %v8119_v8  ;;  %v8184_v8 = vld [vmem:[%s9575_s30 + $0x348] sm:$0xff] }
 0x267   : > { %6600 = vmatpush.bf16.msrb.mxu2 %v8127_v9  ;;  %v8192_v9 = vld [vmem:[%s9575_s30 + $0x388] sm:$0xff] }
 0x268   : > { %6613 = vmatpush.bf16.msrb.mxu3 %v8135_v10  ;;  %6575 = vmatmul.bf16.vlgmr.msrb.gmra.mxu0 %v4913_v51  ;;  %v8181_v51 = vld [vmem:[%s9575_s30 + $0x330] sm:$0xff]  ;;  %v8200_v10 = vld [vmem:[%s9575_s30 + $0x3c8] sm:$0xff] }
 0x269   : > { %6619 = vmatpush.bf16.msra.mxu0 %v8150_v11  ;;  %6588 = vmatmul.bf16.vlgmr.msrb.gmra.mxu1 %v4914_v54  ;;  %v8205_v54 = vld [vmem:[%s9575_s30 + $0x3f0] sm:$0xff]  ;;  %v4923_v11 = vld [vmem:[#allocation1 + $0x24] sm:$0xff] }
 0x26a   : > { %6632 = vmatpush.bf16.msra.mxu1 %v8158_v12  ;;  %6601 = vmatmul.bf16.vlgmr.msrb.gmra.mxu2 %v4915_v50  ;;  %v4922_v50 = vld [vmem:[#allocation1 + $0x1b] sm:$0xff] }
 0x26b   : > { %6645 = vmatpush.bf16.msra.mxu2 %v8166_v13  ;;  %6614 = vmatmul.bf16.vlgmr.msrb.gmra.mxu3 %v4916_v52  ;;  %v8189_v52 = vld [vmem:[%s9575_s30 + $0x370] sm:$0xff]  ;;  %v4924_v13 = vld [vmem:[#allocation1 + $0x2d] sm:$0xff] }
 0x26c   : > { %6658 = vmatpush.bf16.msra.mxu3 %v8174_v14  ;;  %v4925_v12 = vld [vmem:[#allocation1 + $0x36] sm:$0xff]  ;;  %v4926_v14 = vld [vmem:[#allocation1 + $0x3f] sm:$0xff] }
 0x26d   : > { %6620 = vmatpush.bf16.msra.mxu0 %v8149_v15  ;;  %v4393_v15 = vld [vmem:[%s9565_s22 + $0x10] sm:$0xff] }
 0x26e   : > { %6633 = vmatpush.bf16.msra.mxu1 %v8157_v16  ;;  %4928 = vst [vmem:[#allocation1] ss:$9 sm:$0xff] %v4393_v15  ;;  %v8175_v16 = vld [vmem:[%s9575_s30 + $0x300] sm:$0xff] }
 0x26f   : > { %6646 = vmatpush.bf16.msra.mxu2 %v8165_v17  ;;  %v8183_v17 = vld [vmem:[%s9575_s30 + $0x340] sm:$0xff] }
 0x270   : > { %6659 = vmatpush.bf16.msra.mxu3 %v8173_v18  ;;  %v8191_v18 = vld [vmem:[%s9575_s30 + $0x380] sm:$0xff] }
 0x271   : > { %6621 = vmatpush.bf16.msra.mxu0 %v8148_v19  ;;  %v8199_v19 = vld [vmem:[%s9575_s30 + $0x3c0] sm:$0xff] }
 0x272   : > { %6634 = vmatpush.bf16.msra.mxu1 %v8156_v20  ;;  %v8214_v20 = vld [vmem:[%s9575_s30 + $0x438] sm:$0xff] }
 0x273   : > { %6647 = vmatpush.bf16.msra.mxu2 %v8164_v21  ;;  %v8222_v21 = vld [vmem:[%s9575_s30 + $0x478] sm:$0xff] }
 0x274   : > { %6660 = vmatpush.bf16.msra.mxu3 %v8172_v22  ;;  %v8230_v22 = vld [vmem:[%s9575_s30 + $0x4b8] sm:$0xff] }
 0x275   : > { %6622 = vmatpush.bf16.msra.mxu0 %v8147_v23  ;;  %v8238_v23 = vld [vmem:[%s9575_s30 + $0x4f8] sm:$0xff] }
 0x276   : > { %6635 = vmatpush.bf16.msra.mxu1 %v8155_v24  ;;  %v8213_v24 = vld [vmem:[%s9575_s30 + $0x430] sm:$0xff] }
 0x277   : > { %6648 = vmatpush.bf16.msra.mxu2 %v8163_v25  ;;  %v8221_v25 = vld [vmem:[%s9575_s30 + $0x470] sm:$0xff] }
 0x278   : > { %6661 = vmatpush.bf16.msra.mxu3 %v8171_v26  ;;  %v8229_v26 = vld [vmem:[%s9575_s30 + $0x4b0] sm:$0xff] }
 0x279   : > { %6623 = vmatpush.bf16.msra.mxu0 %v8146_v27  ;;  %v8237_v27 = vld [vmem:[%s9575_s30 + $0x4f0] sm:$0xff] }
 0x27a   : > { %6636 = vmatpush.bf16.msra.mxu1 %v8154_v28  ;;  %v8212_v28 = vld [vmem:[%s9575_s30 + $0x428] sm:$0xff] }
 0x27b   : > { %6649 = vmatpush.bf16.msra.mxu2 %v8162_v29  ;;  %v8220_v29 = vld [vmem:[%s9575_s30 + $0x468] sm:$0xff] }
 0x27c   : > { %6662 = vmatpush.bf16.msra.mxu3 %v8170_v30  ;;  %v8228_v30 = vld [vmem:[%s9575_s30 + $0x4a8] sm:$0xff] }
 0x27d   : > { %6624 = vmatpush.bf16.msra.mxu0 %v8145_v31  ;;  %v8236_v31 = vld [vmem:[%s9575_s30 + $0x4e8] sm:$0xff] }
 0x27e   : > { %6637 = vmatpush.bf16.msra.mxu1 %v8153_v32  ;;  %v8211_v32 = vld [vmem:[%s9575_s30 + $0x420] sm:$0xff] }
 0x27f   : > { %6650 = vmatpush.bf16.msra.mxu2 %v8161_v33  ;;  %v8219_v33 = vld [vmem:[%s9575_s30 + $0x460] sm:$0xff] }
 0x280   : > { %6663 = vmatpush.bf16.msra.mxu3 %v8169_v34  ;;  %v8227_v34 = vld [vmem:[%s9575_s30 + $0x4a0] sm:$0xff] }
 0x281   : > { %6625 = vmatpush.bf16.msra.mxu0 %v8144_v35  ;;  %v8235_v35 = vld [vmem:[%s9575_s30 + $0x4e0] sm:$0xff] }
 0x282   : > { %6638 = vmatpush.bf16.msra.mxu1 %v8152_v36  ;;  %v8210_v36 = vld [vmem:[%s9575_s30 + $0x418] sm:$0xff] }
 0x283   : > { %6651 = vmatpush.bf16.msra.mxu2 %v8160_v37  ;;  %v8218_v37 = vld [vmem:[%s9575_s30 + $0x458] sm:$0xff] }
 0x284   : > { %6664 = vmatpush.bf16.msra.mxu3 %v8168_v38  ;;  %v8226_v38 = vld [vmem:[%s9575_s30 + $0x498] sm:$0xff] }
 0x285   : > { %6626 = vmatpush.bf16.msra.mxu0 %v8143_v39  ;;  %v8234_v39 = vld [vmem:[%s9575_s30 + $0x4d8] sm:$0xff] }
 0x286   : > { %6639 = vmatpush.bf16.msra.mxu1 %v8151_v40  ;;  %v8209_v40 = vld [vmem:[%s9575_s30 + $0x410] sm:$0xff] }
 0x287   : > { %6652 = vmatpush.bf16.msra.mxu2 %v8159_v41  ;;  %v8217_v41 = vld [vmem:[%s9575_s30 + $0x450] sm:$0xff] }
 0x288   : > { %6665 = vmatpush.bf16.msra.mxu3 %v8167_v42  ;;  %6627 = vmatmul.bf16.vlgmr.msra.gmra.mxu0 %v4919_v47  ;;  %v8225_v42 = vld [vmem:[%s9575_s30 + $0x490] sm:$0xff]  ;;  %v8232_v47 = vld [vmem:[%s9575_s30 + $0x4c8] sm:$0xff] }
 0x289   : > { %6671 = vmatpush.bf16.msrb.mxu0 %v8182_v43  ;;  %6640 = vmatmul.bf16.vlgmr.msra.gmra.mxu1 %v4920_v49  ;;  %v8233_v43 = vld [vmem:[%s9575_s30 + $0x4d0] sm:$0xff]  ;;  %v8215_v49 = vld [vmem:[%s9575_s30 + $0x440] sm:$0xff] }
 0x28a   : > { %6684 = vmatpush.bf16.msrb.mxu1 %v8190_v44  ;;  %6653 = vmatmul.bf16.vlgmr.msra.gmra.mxu2 %v4921_v48  ;;  %v8208_v44 = vld [vmem:[%s9575_s30 + $0x408] sm:$0xff]  ;;  %v8207_v48 = vld [vmem:[%s9575_s30 + $0x400] sm:$0xff] }
 0x28b   : > { %6697 = vmatpush.bf16.msrb.mxu2 %v8198_v45  ;;  %6666 = vmatmul.bf16.vlgmr.msra.gmra.mxu3 %v4922_v50  ;;  %v8216_v45 = vld [vmem:[%s9575_s30 + $0x448] sm:$0xff]  ;;  %v8223_v50 = vld [vmem:[%s9575_s30 + $0x480] sm:$0xff] }
 0x28c   : > { %6710 = vmatpush.bf16.msrb.mxu3 %v8206_v46  ;;  %v8224_v46 = vld [vmem:[%s9575_s30 + $0x488] sm:$0xff] }
 0x28d   : > { %6672 = vmatpush.bf16.msrb.mxu0 %v8181_v51  ;;  %v8231_v51 = vld [vmem:[%s9575_s30 + $0x4c0] sm:$0xff] }
 0x28e   : > { %6685 = vmatpush.bf16.msrb.mxu1 %v8189_v52  ;;  %v8246_v52 = vld [vmem:[%s9575_s30 + $0x538] sm:$0xff] }
 0x28f   : > { %6698 = vmatpush.bf16.msrb.mxu2 %v8197_v53  ;;  %v8254_v53 = vld [vmem:[%s9575_s30 + $0x578] sm:$0xff] }
 0x290   : > { %6711 = vmatpush.bf16.msrb.mxu3 %v8205_v54  ;;  %v8262_v54 = vld [vmem:[%s9575_s30 + $0x5b8] sm:$0xff] }
 0x291   : > { %6673 = vmatpush.bf16.msrb.mxu0 %v8180_v55  ;;  %v8270_v55 = vld [vmem:[%s9575_s30 + $0x5f8] sm:$0xff] }
 0x292   : > { %6686 = vmatpush.bf16.msrb.mxu1 %v8188_v56  ;;  %v4929_v56 = vld [vmem:[#allocation1] sm:$0xff] }
 0x293   : > { %6699 = vmatpush.bf16.msrb.mxu2 %v8196_v57  ;;  %v4931_v57 = vld [vmem:[#allocation1 + $0x12] sm:$0xff] }
 0x294   : > { %6712 = vmatpush.bf16.msrb.mxu3 %v8204_v58  ;;  %v4930_v58 = vld [vmem:[#allocation1 + $0x9] sm:$0xff] }
 0x295   : > { %6674 = vmatpush.bf16.msrb.mxu0 %v8179_v59  ;;  %v4932_v59 = vld [vmem:[#allocation1 + $0x1b] sm:$0xff] }
 0x296   : > { %6687 = vmatpush.bf16.msrb.mxu1 %v8187_v60  ;;  %v8245_v60 = vld [vmem:[%s9575_s30 + $0x530] sm:$0xff] }
 0x297   : > { %6700 = vmatpush.bf16.msrb.mxu2 %v8195_v61  ;;  %v8253_v61 = vld [vmem:[%s9575_s30 + $0x570] sm:$0xff] }
 0x298   : > { %6713 = vmatpush.bf16.msrb.mxu3 %v8203_v62  ;;  %v8261_v62 = vld [vmem:[%s9575_s30 + $0x5b0] sm:$0xff] }
 0x299   : > { %6675 = vmatpush.bf16.msrb.mxu0 %v8178_v63  ;;  %v8269_v63 = vld [vmem:[%s9575_s30 + $0x5f0] sm:$0xff] }
 0x29a   : > { %6688 = vmatpush.bf16.msrb.mxu1 %v8186_v0  ;;  %v8244_v0 = vld [vmem:[%s9575_s30 + $0x528] sm:$0xff] }
 0x29b   : > { %6701 = vmatpush.bf16.msrb.mxu2 %v8194_v1  ;;  %v8252_v1 = vld [vmem:[%s9575_s30 + $0x568] sm:$0xff] }
 0x29c   : > { %6714 = vmatpush.bf16.msrb.mxu3 %v8202_v2  ;;  %v8260_v2 = vld [vmem:[%s9575_s30 + $0x5a8] sm:$0xff] }
 0x29d   : > { %6676 = vmatpush.bf16.msrb.mxu0 %v8177_v3  ;;  %v8268_v3 = vld [vmem:[%s9575_s30 + $0x5e8] sm:$0xff] }
 0x29e   : > { %6689 = vmatpush.bf16.msrb.mxu1 %v8185_v4 }
 0x29f   : > { %6702 = vmatpush.bf16.msrb.mxu2 %v8193_v5  ;;  %v8243_v5 = vld [vmem:[%s9575_s30 + $0x520] sm:$0xff] }
 0x2a0   : > { %6715 = vmatpush.bf16.msrb.mxu3 %v8201_v6  ;;  %v8251_v6 = vld [vmem:[%s9575_s30 + $0x560] sm:$0xff] }
 0x2a1   : > { %6677 = vmatpush.bf16.msrb.mxu0 %v8176_v7 }
 0x2a2   : > { %6690 = vmatpush.bf16.msrb.mxu1 %v8184_v8  ;;  %v8259_v8 = vld [vmem:[%s9575_s30 + $0x5a0] sm:$0xff] }
 0x2a3   : > { %6703 = vmatpush.bf16.msrb.mxu2 %v8192_v9  ;;  %v8267_v9 = vld [vmem:[%s9575_s30 + $0x5e0] sm:$0xff] }
 0x2a4   : > { %6716 = vmatpush.bf16.msrb.mxu3 %v8200_v10 }
 0x2a5   : > { %6678 = vmatpush.bf16.msrb.mxu0 %v8175_v16 }
 0x2a6   : > { %6691 = vmatpush.bf16.msrb.mxu1 %v8183_v17 }
 0x2a7   : > { %6704 = vmatpush.bf16.msrb.mxu2 %v8191_v18 }
 0x2a8   : > { %6717 = vmatpush.bf16.msrb.mxu3 %v8199_v19  ;;  %6679 = vmatmul.bf16.vlgmr.msrb.gmra.mxu0 %v4923_v11  ;;  %v8242_v11 = vld [vmem:[%s9575_s30 + $0x518] sm:$0xff]  ;;  %v8241_v19 = vld [vmem:[%s9575_s30 + $0x510] sm:$0xff] }
 0x2a9   : > { %6723 = vmatpush.bf16.msra.mxu0 %v8214_v20  ;;  %6692 = vmatmul.bf16.vlgmr.msrb.gmra.mxu1 %v4924_v13  ;;  %v8258_v13 = vld [vmem:[%s9575_s30 + $0x598] sm:$0xff]  ;;  %v8249_v20 = vld [vmem:[%s9575_s30 + $0x550] sm:$0xff] }
 0x2aa   : > { %6736 = vmatpush.bf16.msra.mxu1 %v8222_v21  ;;  %6705 = vmatmul.bf16.vlgmr.msrb.gmra.mxu2 %v4925_v12  ;;  %v8250_v12 = vld [vmem:[%s9575_s30 + $0x558] sm:$0xff] }
 0x2ab   : > { %6749 = vmatpush.bf16.msra.mxu2 %v8230_v22  ;;  %6718 = vmatmul.bf16.vlgmr.msrb.gmra.mxu3 %v4926_v14  ;;  %v8266_v14 = vld [vmem:[%s9575_s30 + $0x5d8] sm:$0xff] }
 0x2ac   : > { %6762 = vmatpush.bf16.msra.mxu3 %v8238_v23  ;;  %v8257_v23 = vld [vmem:[%s9575_s30 + $0x590] sm:$0xff] }
 0x2ad   : > { %6724 = vmatpush.bf16.msra.mxu0 %v8213_v24  ;;  %v8265_v24 = vld [vmem:[%s9575_s30 + $0x5d0] sm:$0xff] }
 0x2ae   : > { %6737 = vmatpush.bf16.msra.mxu1 %v8221_v25  ;;  %v8240_v25 = vld [vmem:[%s9575_s30 + $0x508] sm:$0xff] }
 0x2af   : > { %6750 = vmatpush.bf16.msra.mxu2 %v8229_v26  ;;  %v8248_v26 = vld [vmem:[%s9575_s30 + $0x548] sm:$0xff] }
 0x2b0   : > { %6763 = vmatpush.bf16.msra.mxu3 %v8237_v27  ;;  %v8256_v27 = vld [vmem:[%s9575_s30 + $0x588] sm:$0xff] }
 0x2b1   : > { %6725 = vmatpush.bf16.msra.mxu0 %v8212_v28  ;;  %v8264_v28 = vld [vmem:[%s9575_s30 + $0x5c8] sm:$0xff] }
 0x2b2   : > { %6738 = vmatpush.bf16.msra.mxu1 %v8220_v29  ;;  %v4933_v29 = vld [vmem:[#allocation1 + $0x24] sm:$0xff] }
 0x2b3   : > { %6751 = vmatpush.bf16.msra.mxu2 %v8228_v30  ;;  %v4935_v30 = vld [vmem:[#allocation1 + $0x36] sm:$0xff] }
 0x2b4   : > { %6764 = vmatpush.bf16.msra.mxu3 %v8236_v31 }
 0x2b5   : > { %6726 = vmatpush.bf16.msra.mxu0 %v8211_v32  ;;  %v4934_v32 = vld [vmem:[#allocation1 + $0x2d] sm:$0xff] }
 0x2b6   : > { %6739 = vmatpush.bf16.msra.mxu1 %v8219_v33  ;;  %v4936_v33 = vld [vmem:[#allocation1 + $0x3f] sm:$0xff] }
 0x2b7   : > { %6752 = vmatpush.bf16.msra.mxu2 %v8227_v34 }
 0x2b8   : > { %6765 = vmatpush.bf16.msra.mxu3 %v8235_v35  ;;  %v4394_v35 = vld [vmem:[%s9565_s22 + $0x18] sm:$0xff] }
 0x2b9   : > { %6727 = vmatpush.bf16.msra.mxu0 %v8210_v36  ;;  %4938 = vst [vmem:[#allocation1] ss:$9 sm:$0xff] %v4394_v35  ;;  %v8239_v36 = vld [vmem:[%s9575_s30 + $0x500] sm:$0xff]  ;;  %v8332_v35 = vld [vmem:[%s9575_s30 + $0x7e8] sm:$0xff] }
 0x2ba   : > { %6740 = vmatpush.bf16.msra.mxu1 %v8218_v37  ;;  %v8247_v37 = vld [vmem:[%s9575_s30 + $0x540] sm:$0xff] }
 0x2bb   : > { %6753 = vmatpush.bf16.msra.mxu2 %v8226_v38  ;;  %v8255_v38 = vld [vmem:[%s9575_s30 + $0x580] sm:$0xff] }
 0x2bc   : > { %6766 = vmatpush.bf16.msra.mxu3 %v8234_v39  ;;  %v8263_v39 = vld [vmem:[%s9575_s30 + $0x5c0] sm:$0xff] }
 0x2bd   : > { %6728 = vmatpush.bf16.msra.mxu0 %v8209_v40  ;;  %v8278_v40 = vld [vmem:[%s9575_s30 + $0x638] sm:$0xff] }
 0x2be   : > { %6741 = vmatpush.bf16.msra.mxu1 %v8217_v41  ;;  %v8286_v41 = vld [vmem:[%s9575_s30 + $0x678] sm:$0xff] }
 0x2bf   : > { %6754 = vmatpush.bf16.msra.mxu2 %v8225_v42  ;;  %v8294_v42 = vld [vmem:[%s9575_s30 + $0x6b8] sm:$0xff] }
 0x2c0   : > { %6767 = vmatpush.bf16.msra.mxu3 %v8233_v43  ;;  %v8302_v43 = vld [vmem:[%s9575_s30 + $0x6f8] sm:$0xff] }
 0x2c1   : > { %6729 = vmatpush.bf16.msra.mxu0 %v8208_v44  ;;  %v8277_v44 = vld [vmem:[%s9575_s30 + $0x630] sm:$0xff] }
 0x2c2   : > { %6742 = vmatpush.bf16.msra.mxu1 %v8216_v45  ;;  %v8285_v45 = vld [vmem:[%s9575_s30 + $0x670] sm:$0xff] }
 0x2c3   : > { %6755 = vmatpush.bf16.msra.mxu2 %v8224_v46  ;;  %v8293_v46 = vld [vmem:[%s9575_s30 + $0x6b0] sm:$0xff] }
 0x2c4   : > { %6768 = vmatpush.bf16.msra.mxu3 %v8232_v47  ;;  %v8301_v47 = vld [vmem:[%s9575_s30 + $0x6f0] sm:$0xff] }
 0x2c5   : > { %6730 = vmatpush.bf16.msra.mxu0 %v8207_v48  ;;  %v6524_v4 = vpop.f32.mrf.mxu0  ;;  %v8276_v48 = vld [vmem:[%s9575_s30 + $0x628] sm:$0xff] }
 0x2c6   : > { %6743 = vmatpush.bf16.msra.mxu1 %v8215_v49  ;;  %v6537_v7 = vpop.f32.mrf.mxu1  ;;  %v8284_v49 = vld [vmem:[%s9575_s30 + $0x668] sm:$0xff] }
 0x2c7   : > { %6756 = vmatpush.bf16.msra.mxu2 %v8223_v50  ;;  %v6538_v10 = vadd.f32 %v6537_v7, %v6524_v4  ;;  %v8292_v50 = vld [vmem:[%s9575_s30 + $0x6a8] sm:$0xff]  ;;  %v8273_v4 = vld [vmem:[%s9575_s30 + $0x610] sm:$0xff] }
 0x2c8   : > { %6769 = vmatpush.bf16.msra.mxu3 %v8231_v51  ;;  %6731 = vmatmul.bf16.vlgmr.msra.gmra.mxu0 %v4929_v56  ;;  %v8300_v51 = vld [vmem:[%s9575_s30 + $0x6e8] sm:$0xff] }
 0x2c9   : > { %6775 = vmatpush.bf16.msrb.mxu0 %v8246_v52  ;;  %6744 = vmatmul.bf16.vlgmr.msra.gmra.mxu1 %v4930_v58  ;;  %v8299_v58 = vld [vmem:[%s9575_s30 + $0x6e0] sm:$0xff] }
 0x2ca   : > { %6788 = vmatpush.bf16.msrb.mxu1 %v8254_v53  ;;  %6757 = vmatmul.bf16.vlgmr.msra.gmra.mxu2 %v4931_v57  ;;  %v8275_v53 = vld [vmem:[%s9575_s30 + $0x620] sm:$0xff] }
 0x2cb   : > { %6801 = vmatpush.bf16.msrb.mxu2 %v8262_v54  ;;  %6770 = vmatmul.bf16.vlgmr.msra.gmra.mxu3 %v4932_v59  ;;  %v8283_v54 = vld [vmem:[%s9575_s30 + $0x660] sm:$0xff] }
 0x2cc   : > { %6814 = vmatpush.bf16.msrb.mxu3 %v8270_v55  ;;  %v8291_v57 = vld [vmem:[%s9575_s30 + $0x6a0] sm:$0xff] }
 0x2cd   : > { %6776 = vmatpush.bf16.msrb.mxu0 %v8245_v60  ;;  %v6550_v15 = vpop.f32.mrf.mxu2  ;;  %v6526_v18 = vpop.f32.mrf.mxu0  ;;  %v8274_v60 = vld [vmem:[%s9575_s30 + $0x618] sm:$0xff] }
 0x2ce   : > { %6789 = vmatpush.bf16.msrb.mxu1 %v8253_v61  ;;  %v6551_v16 = vadd.f32 %v6550_v15, %v6538_v10  ;;  %v6563_v17 = vpop.f32.mrf.mxu3  ;;  %v6539_v22 = vpop.f32.mrf.mxu1  ;;  %v8282_v61 = vld [vmem:[%s9575_s30 + $0x658] sm:$0xff]  ;;  %v8272_v10 = vld [vmem:[%s9575_s30 + $0x608] sm:$0xff]  ;;  %v8287_v18 = vld [vmem:[%s9575_s30 + $0x680] sm:$0xff] }
 0x2cf   : > { %6802 = vmatpush.bf16.msrb.mxu2 %v8261_v62  ;;  %v8290_v62 = vld [vmem:[%s9575_s30 + $0x698] sm:$0xff] }
 0x2d0   : > { %6815 = vmatpush.bf16.msrb.mxu3 %v8269_v63  ;;  %v9764_v21 = vadd.f32 %v6563_v17, %v6551_v16  ;;  %v8298_v63 = vld [vmem:[%s9575_s30 + $0x6d8] sm:$0xff]  ;;  %v8271_v16 = vld [vmem:[%s9575_s30 + $0x600] sm:$0xff] }
 0x2d1   : > { %6777 = vmatpush.bf16.msrb.mxu0 %v8244_v0  ;;  %v8279_v17 = vld [vmem:[%s9575_s30 + $0x640] sm:$0xff]  ;;  %v8326_v22 = vld [vmem:[%s9575_s30 + $0x7b8] sm:$0xff] }
 0x2d2   : > { %6790 = vmatpush.bf16.msrb.mxu1 %v8252_v1 }
 0x2d3   : > { %6803 = vmatpush.bf16.msrb.mxu2 %v8260_v2 }
 0x2d4   : > { %6816 = vmatpush.bf16.msrb.mxu3 %v8268_v3 }
 0x2d5   : > { %6778 = vmatpush.bf16.msrb.mxu0 %v8243_v5  ;;  %v6552_v31 = vpop.f32.mrf.mxu2  ;;  %v8281_v5 = vld [vmem:[%s9575_s30 + $0x650] sm:$0xff] }
 0x2d6   : > { %6791 = vmatpush.bf16.msrb.mxu1 %v8251_v6  ;;  %v6565_v34 = vpop.f32.mrf.mxu3  ;;  %v8333_v31 = vld [vmem:[%s9575_s30 + $0x7f0] sm:$0xff] }
 0x2d7   : > { %6804 = vmatpush.bf16.msrb.mxu2 %v8259_v8  ;;  %v8289_v8 = vld [vmem:[%s9575_s30 + $0x690] sm:$0xff]  ;;  %v8324_v34 = vld [vmem:[%s9575_s30 + $0x7a8] sm:$0xff] }
 0x2d8   : > { %6817 = vmatpush.bf16.msrb.mxu3 %v8267_v9  ;;  %v8297_v9 = vld [vmem:[%s9575_s30 + $0x6d0] sm:$0xff] }
 0x2d9   : > { %6779 = vmatpush.bf16.msrb.mxu0 %v8242_v11  ;;  %v8280_v11 = vld [vmem:[%s9575_s30 + $0x648] sm:$0xff] }
 0x2da   : > { %6792 = vmatpush.bf16.msrb.mxu1 %v8250_v12  ;;  %v8288_v12 = vld [vmem:[%s9575_s30 + $0x688] sm:$0xff] }
 0x2db   : > { %6805 = vmatpush.bf16.msrb.mxu2 %v8258_v13  ;;  %v8296_v13 = vld [vmem:[%s9575_s30 + $0x6c8] sm:$0xff] }
 0x2dc   : > { %6818 = vmatpush.bf16.msrb.mxu3 %v8266_v14 }
 0x2dd   : > { %6780 = vmatpush.bf16.msrb.mxu0 %v8241_v19  ;;  %v8295_v19 = vld [vmem:[%s9575_s30 + $0x6c0] sm:$0xff] }
 0x2de   : > { %6793 = vmatpush.bf16.msrb.mxu1 %v8249_v20  ;;  %v8310_v20 = vld [vmem:[%s9575_s30 + $0x738] sm:$0xff] }
 0x2df   : > { %6806 = vmatpush.bf16.msrb.mxu2 %v8257_v23  ;;  %v8334_v23 = vld [vmem:[%s9575_s30 + $0x7f8] sm:$0xff] }
 0x2e0   : > { %6819 = vmatpush.bf16.msrb.mxu3 %v8265_v24  ;;  %v4939_v24 = vld [vmem:[#allocation1] sm:$0xff] }
 0x2e1   : > { %6781 = vmatpush.bf16.msrb.mxu0 %v8240_v25  ;;  %v4941_v25 = vld [vmem:[#allocation1 + $0x12] sm:$0xff] }
 0x2e2   : > { %6794 = vmatpush.bf16.msrb.mxu1 %v8248_v26  ;;  %v4940_v26 = vld [vmem:[#allocation1 + $0x9] sm:$0xff] }
 0x2e3   : > { %6807 = vmatpush.bf16.msrb.mxu2 %v8256_v27  ;;  %v4942_v27 = vld [vmem:[#allocation1 + $0x1b] sm:$0xff] }
 0x2e4   : > { %6820 = vmatpush.bf16.msrb.mxu3 %v8264_v28  ;;  %v8309_v28 = vld [vmem:[%s9575_s30 + $0x730] sm:$0xff] }
 0x2e5   : > { %6782 = vmatpush.bf16.msrb.mxu0 %v8239_v36  ;;  %v6576_v52 = vpop.f32.mrf.mxu0 }
 0x2e6   : > { %6795 = vmatpush.bf16.msrb.mxu1 %v8247_v37  ;;  %v6577_v55 = vadd.f32 %v6576_v52, %v9764_v21  ;;  %v6589_v56 = vpop.f32.mrf.mxu1  ;;  %v8318_v21 = vld [vmem:[%s9575_s30 + $0x778] sm:$0xff] }
 0x2e7   : > { %6808 = vmatpush.bf16.msrb.mxu2 %v8255_v38  ;;  %v8307_v38 = vld [vmem:[%s9575_s30 + $0x720] sm:$0xff] }
 0x2e8   : > { %6821 = vmatpush.bf16.msrb.mxu3 %v8263_v39  ;;  %6783 = vmatmul.bf16.vlgmr.msrb.gmra.mxu0 %v4933_v29  ;;  %v6590_v59 = vadd.f32 %v6589_v56, %v6577_v55  ;;  %v8317_v29 = vld [vmem:[%s9575_s30 + $0x770] sm:$0xff]  ;;  %v8315_v39 = vld [vmem:[%s9575_s30 + $0x760] sm:$0xff] }
 0x2e9   : > { %6827 = vmatpush.bf16.msra.mxu0 %v8278_v40  ;;  %6796 = vmatmul.bf16.vlgmr.msrb.gmra.mxu1 %v4934_v32  ;;  %v8308_v32 = vld [vmem:[%s9575_s30 + $0x728] sm:$0xff]  ;;  %v8321_v56 = vld [vmem:[%s9575_s30 + $0x790] sm:$0xff] }
 0x2ea   : > { %6840 = vmatpush.bf16.msra.mxu1 %v8286_v41  ;;  %6809 = vmatmul.bf16.vlgmr.msrb.gmra.mxu2 %v4935_v30  ;;  %v8325_v30 = vld [vmem:[%s9575_s30 + $0x7b0] sm:$0xff]  ;;  %v8323_v41 = vld [vmem:[%s9575_s30 + $0x7a0] sm:$0xff] }
 0x2eb   : > { %6853 = vmatpush.bf16.msra.mxu2 %v8294_v42  ;;  %6822 = vmatmul.bf16.vlgmr.msrb.gmra.mxu3 %v4936_v33  ;;  %v8316_v33 = vld [vmem:[%s9575_s30 + $0x768] sm:$0xff]  ;;  %v8331_v42 = vld [vmem:[%s9575_s30 + $0x7e0] sm:$0xff] }
 0x2ec   : > { %6866 = vmatpush.bf16.msra.mxu3 %v8302_v43 }
 0x2ed   : > { %6828 = vmatpush.bf16.msra.mxu0 %v8277_v44  ;;  %v6602_v0 = vpop.f32.mrf.mxu2  ;;  %v6578_v3 = vpop.f32.mrf.mxu0  ;;  %v8306_v44 = vld [vmem:[%s9575_s30 + $0x718] sm:$0xff] }
 0x2ee   : > { %6841 = vmatpush.bf16.msra.mxu1 %v8285_v45  ;;  %v6603_v1 = vadd.f32 %v6602_v0, %v6590_v59  ;;  %v6615_v2 = vpop.f32.mrf.mxu3  ;;  %v6591_v7 = vpop.f32.mrf.mxu1  ;;  %v8314_v45 = vld [vmem:[%s9575_s30 + $0x758] sm:$0xff]  ;;  %v8312_v59 = vld [vmem:[%s9575_s30 + $0x748] sm:$0xff]  ;;  %v8303_v0 = vld [vmem:[%s9575_s30 + $0x700] sm:$0xff] }
 0x2ef   : > { %6854 = vmatpush.bf16.msra.mxu2 %v8293_v46  ;;  %v8322_v46 = vld [vmem:[%s9575_s30 + $0x798] sm:$0xff]  ;;  %v8327_v3 = vld [vmem:[%s9575_s30 + $0x7c0] sm:$0xff] }
 0x2f0   : > { %6867 = vmatpush.bf16.msra.mxu3 %v8301_v47  ;;  %v6616_v6 = vadd.f32 %v6615_v2, %v6603_v1  ;;  %v8330_v47 = vld [vmem:[%s9575_s30 + $0x7d8] sm:$0xff]  ;;  %v8311_v1 = vld [vmem:[%s9575_s30 + $0x740] sm:$0xff] }
 0x2f1   : > { %6829 = vmatpush.bf16.msra.mxu0 %v8276_v48  ;;  %v8319_v2 = vld [vmem:[%s9575_s30 + $0x780] sm:$0xff]  ;;  %v4946_v7 = vld [vmem:[#allocation1 + $0x3f] sm:$0xff] }
 0x2f2   : > { %6842 = vmatpush.bf16.msra.mxu1 %v8284_v49 }
 0x2f3   : > { %6855 = vmatpush.bf16.msra.mxu2 %v8292_v50 }
 0x2f4   : > { %6868 = vmatpush.bf16.msra.mxu3 %v8300_v51 }
 0x2f5   : > { %6830 = vmatpush.bf16.msra.mxu0 %v8275_v53  ;;  %v6604_v14 = vpop.f32.mrf.mxu2  ;;  %v8305_v53 = vld [vmem:[%s9575_s30 + $0x710] sm:$0xff] }
 0x2f6   : > { %6843 = vmatpush.bf16.msra.mxu1 %v8283_v54  ;;  %v6617_v15 = vpop.f32.mrf.mxu3  ;;  %v8313_v54 = vld [vmem:[%s9575_s30 + $0x750] sm:$0xff] }
 0x2f7   : > { %6856 = vmatpush.bf16.msra.mxu2 %v8291_v57  ;;  %v8329_v57 = vld [vmem:[%s9575_s30 + $0x7d0] sm:$0xff] }
 0x2f8   : > { %6869 = vmatpush.bf16.msra.mxu3 %v8299_v58  ;;  %v8304_v58 = vld [vmem:[%s9575_s30 + $0x708] sm:$0xff] }
 0x2f9   : > { %6831 = vmatpush.bf16.msra.mxu0 %v8274_v60  ;;  %v8320_v60 = vld [vmem:[%s9575_s30 + $0x788] sm:$0xff] }
 0x2fa   : > { %6844 = vmatpush.bf16.msra.mxu1 %v8282_v61  ;;  %v8328_v61 = vld [vmem:[%s9575_s30 + $0x7c8] sm:$0xff] }
 0x2fb   : > { %6857 = vmatpush.bf16.msra.mxu2 %v8290_v62 }
 0x2fc   : > { %6870 = vmatpush.bf16.msra.mxu3 %v8298_v63 }
 0x2fd   : > { %6832 = vmatpush.bf16.msra.mxu0 %v8273_v4  ;;  %v4943_v4 = vld [vmem:[#allocation1 + $0x24] sm:$0xff] }
 0x2fe   : > { %6845 = vmatpush.bf16.msra.mxu1 %v8281_v5  ;;  %v4944_v5 = vld [vmem:[#allocation1 + $0x2d] sm:$0xff] }
 0x2ff   : > { %6858 = vmatpush.bf16.msra.mxu2 %v8289_v8 }
 0x300   : > { %6871 = vmatpush.bf16.msra.mxu3 %v8297_v9 }
 0x301   : > { %6833 = vmatpush.bf16.msra.mxu0 %v8272_v10 }
 0x302   : > { %6846 = vmatpush.bf16.msra.mxu1 %v8280_v11 }
 0x303   : > { %6859 = vmatpush.bf16.msra.mxu2 %v8288_v12 }
 0x304   : > { %6872 = vmatpush.bf16.msra.mxu3 %v8296_v13 }
 0x305   : > { %6834 = vmatpush.bf16.msra.mxu0 %v8271_v16  ;;  %v6628_v36 = vpop.f32.mrf.mxu0 }
 0x306   : > { %6847 = vmatpush.bf16.msra.mxu1 %v8279_v17  ;;  %v6629_v37 = vadd.f32 %v6628_v36, %v6616_v6  ;;  %v6641_v40 = vpop.f32.mrf.mxu1  ;;  %v4945_v6 = vld [vmem:[#allocation1 + $0x36] sm:$0xff] }
 0x307   : > { %6860 = vmatpush.bf16.msra.mxu2 %v8287_v18 }
 0x308   : > { %6873 = vmatpush.bf16.msra.mxu3 %v8295_v19  ;;  %6835 = vmatmul.bf16.vlgmr.msra.gmra.mxu0 %v4939_v24  ;;  %v6642_v43 = vadd.f32 %v6641_v40, %v6629_v37 }
 0x309   : > { %6879 = vmatpush.bf16.msrb.mxu0 %v8310_v20  ;;  %6848 = vmatmul.bf16.vlgmr.msra.gmra.mxu1 %v4940_v26 }
 0x30a   : > { %6892 = vmatpush.bf16.msrb.mxu1 %v8318_v21  ;;  %6861 = vmatmul.bf16.vlgmr.msra.gmra.mxu2 %v4941_v25 }
 0x30b   : > { %6905 = vmatpush.bf16.msrb.mxu2 %v8326_v22  ;;  %6874 = vmatmul.bf16.vlgmr.msra.gmra.mxu3 %v4942_v27 }
 0x30c   : > { %6918 = vmatpush.bf16.msrb.mxu3 %v8334_v23 }
 0x30d   : > { %6880 = vmatpush.bf16.msrb.mxu0 %v8309_v28  ;;  %v6654_v48 = vpop.f32.mrf.mxu2  ;;  %v6630_v51 = vpop.f32.mrf.mxu0 }
 0x30e   : > { %6893 = vmatpush.bf16.msrb.mxu1 %v8317_v29  ;;  %v6655_v49 = vadd.f32 %v6654_v48, %v6642_v43  ;;  %v6667_v50 = vpop.f32.mrf.mxu3  ;;  %v6643_v55 = vpop.f32.mrf.mxu1 }
 0x30f   : > { %6906 = vmatpush.bf16.msrb.mxu2 %v8325_v30 }
 0x310   : > { %6919 = vmatpush.bf16.msrb.mxu3 %v8333_v31  ;;  %v6668_v52 = vadd.f32 %v6667_v50, %v6655_v49 }
 0x311   : > { %6881 = vmatpush.bf16.msrb.mxu0 %v8308_v32 }
 0x312   : > { %6894 = vmatpush.bf16.msrb.mxu1 %v8316_v33 }
 0x313   : > { %6907 = vmatpush.bf16.msrb.mxu2 %v8324_v34 }
 0x314   : > { %6920 = vmatpush.bf16.msrb.mxu3 %v8332_v35 }
 0x315   : > { %6882 = vmatpush.bf16.msrb.mxu0 %v8307_v38  ;;  %v6656_v62 = vpop.f32.mrf.mxu2 }
 0x316   : > { %6895 = vmatpush.bf16.msrb.mxu1 %v8315_v39  ;;  %v6669_v63 = vpop.f32.mrf.mxu3 }
 0x317   : > { %6908 = vmatpush.bf16.msrb.mxu2 %v8323_v41 }
 0x318   : > { %6921 = vmatpush.bf16.msrb.mxu3 %v8331_v42 }
 0x319   : > { %6883 = vmatpush.bf16.msrb.mxu0 %v8306_v44 }
 0x31a   : > { %6896 = vmatpush.bf16.msrb.mxu1 %v8314_v45 }
 0x31b   : > { %6909 = vmatpush.bf16.msrb.mxu2 %v8322_v46 }
 0x31c   : > { %6922 = vmatpush.bf16.msrb.mxu3 %v8330_v47 }
 0x31d   : > { %6884 = vmatpush.bf16.msrb.mxu0 %v8305_v53 }
 0x31e   : > { %6897 = vmatpush.bf16.msrb.mxu1 %v8313_v54 }
 0x31f   : > { %6910 = vmatpush.bf16.msrb.mxu2 %v8321_v56 }
 0x320   : > { %6923 = vmatpush.bf16.msrb.mxu3 %v8329_v57 }
 0x321   : > { %6885 = vmatpush.bf16.msrb.mxu0 %v8304_v58 }
 0x322   : > { %6898 = vmatpush.bf16.msrb.mxu1 %v8312_v59 }
 0x323   : > { %6911 = vmatpush.bf16.msrb.mxu2 %v8320_v60 }
 0x324   : > { %6924 = vmatpush.bf16.msrb.mxu3 %v8328_v61 }
 0x325   : > { %6886 = vmatpush.bf16.msrb.mxu0 %v8303_v0  ;;  %v6680_v8 = vpop.f32.mrf.mxu0 }
 0x326   : > { %6899 = vmatpush.bf16.msrb.mxu1 %v8311_v1  ;;  %v6681_v9 = vadd.f32 %v6680_v8, %v6668_v52  ;;  %v6693_v10 = vpop.f32.mrf.mxu1  ;;  %v4390_v1 = vld [vmem:[%s9573_s12] sm:$0x3] }
 0x327   : > { %6912 = vmatpush.bf16.msrb.mxu2 %v8319_v2 }
 0x328   : > { %6925 = vmatpush.bf16.msrb.mxu3 %v8327_v3  ;;  %6887 = vmatmul.bf16.vlgmr.msrb.gmra.mxu0 %v4943_v4  ;;  %v6694_v11 = vadd.f32 %v6693_v10, %v6681_v9 }
 0x329   : > { %6900 = vmatmul.bf16.vlgmr.msrb.gmra.mxu1 %v4944_v5 }
 0x32a   : > { %6913 = vmatmul.bf16.vlgmr.msrb.gmra.mxu2 %v4945_v6 }
 0x32b   : > { %6926 = vmatmul.bf16.vlgmr.msrb.gmra.mxu3 %v4946_v7 }
 0x32d   : > { %v6706_v12 = vpop.f32.mrf.mxu2  ;;  %v6682_v15 = vpop.f32.mrf.mxu0 }
 0x32e   : > { %v6707_v13 = vadd.f32 %v6706_v12, %v6694_v11  ;;  %v6719_v14 = vpop.f32.mrf.mxu3  ;;  %v6695_v17 = vpop.f32.mrf.mxu1 }
 0x330   : > { %v6720_v16 = vadd.f32 %v6719_v14, %v6707_v13 }
 0x335   : > { %v6708_v18 = vpop.f32.mrf.mxu2 }
 0x336   : > { %v6721_v19 = vpop.f32.mrf.mxu3 }
 0x345   : > { %v6732_v20 = vpop.f32.mrf.mxu0 }
 0x346   : > { %v6733_v21 = vadd.f32 %v6732_v20, %v6720_v16  ;;  %v6745_v22 = vpop.f32.mrf.mxu1 }
 0x348   : > { %v6746_v23 = vadd.f32 %v6745_v22, %v6733_v21 }
 0x34d   : > { %v6758_v24 = vpop.f32.mrf.mxu2  ;;  %v6734_v27 = vpop.f32.mrf.mxu0 }
 0x34e   : > { %v6759_v25 = vadd.f32 %v6758_v24, %v6746_v23  ;;  %v6771_v26 = vpop.f32.mrf.mxu3  ;;  %v6747_v29 = vpop.f32.mrf.mxu1 }
 0x350   : > { %v6772_v28 = vadd.f32 %v6771_v26, %v6759_v25 }
 0x355   : > { %v6760_v30 = vpop.f32.mrf.mxu2 }
 0x356   : > { %v6773_v31 = vpop.f32.mrf.mxu3 }
 0x365   : > { %v6784_v32 = vpop.f32.mrf.mxu0 }
 0x366   : > { %v6797_v33 = vpop.f32.mrf.mxu1  ;;  %v6785_v43 = vadd.f32 %v6784_v32, %v6772_v28 }
 0x368   : > { %v6798_v47 = vadd.f32 %v6797_v33, %v6785_v43 }
 0x36d   : > { %v6810_v34 = vpop.f32.mrf.mxu2  ;;  %v6786_v36 = vpop.f32.mrf.mxu0 }
 0x36e   : > { %v6823_v35 = vpop.f32.mrf.mxu3  ;;  %v6799_v37 = vpop.f32.mrf.mxu1  ;;  %v6811_v48 = vadd.f32 %v6810_v34, %v6798_v47 }
 0x370   : > { %v6824_v51 = vadd.f32 %v6823_v35, %v6811_v48 }
 0x375   : > { %v6812_v38 = vpop.f32.mrf.mxu2 }
 0x376   : > { %v6825_v39 = vpop.f32.mrf.mxu3 }
 0x385   : > { %v6836_v40 = vpop.f32.mrf.mxu0 }
 0x386   : > { %v6849_v41 = vpop.f32.mrf.mxu1  ;;  %v6837_v52 = vadd.f32 %v6836_v40, %v6824_v51 }
 0x388   : > { %v6850_v53 = vadd.f32 %v6849_v41, %v6837_v52 }
 0x38d   : > { %v6862_v42 = vpop.f32.mrf.mxu2  ;;  %v6838_v45 = vpop.f32.mrf.mxu0 }
 0x38e   : > { %v6875_v44 = vpop.f32.mrf.mxu3  ;;  %v6851_v46 = vpop.f32.mrf.mxu1  ;;  %v6863_v54 = vadd.f32 %v6862_v42, %v6850_v53 }
 0x390   : > { %v6876_v55 = vadd.f32 %v6875_v44, %v6863_v54 }
 0x395   : > { %v6864_v49 = vpop.f32.mrf.mxu2 }
 0x396   : > { %v6877_v50 = vpop.f32.mrf.mxu3 }
 0x3a5   : > { %v6888_v56 = vpop.f32.mrf.mxu0 }
 0x3a6   : > { %v6901_v57 = vpop.f32.mrf.mxu1  ;;  %v6889_v58 = vadd.f32 %v6888_v56, %v6876_v55 }
 0x3a8   : > { %v6902_v59 = vadd.f32 %v6901_v57, %v6889_v58 }
 0x3ad   : > { %v6914_v60 = vpop.f32.mrf.mxu2  ;;  %v6890_v63 = vpop.f32.mrf.mxu0 }
 0x3ae   : > { %v6927_v61 = vpop.f32.mrf.mxu3  ;;  %v6915_v62 = vadd.f32 %v6914_v60, %v6902_v59  ;;  %v6903_v0 = vpop.f32.mrf.mxu1 }
 0x3b0   : > { %v6928_v2 = vadd.f32 %v6927_v61, %v6915_v62 }
 0x3b2   : > { %v6931_v3 = vadd.f32 %v6928_v2, %v4390_v1  ;;  %6936 = sbr.rel (%p8075_p13) target bundleno = 959 (0x3bf), region = 92 }
 0x3b4   : > { %6932 = vst [vmem:[%s9573_s12] sm:$0x3] %v6931_v3 }
 0x3b5   : > { %v6916_v4 = vpop.f32.mrf.mxu2 }
 0x3b6   : > { %v6929_v5 = vpop.f32.mrf.mxu3 }
 0x3bb   : > { %v6937_v6 = vld [vmem:[%s9573_s12] sm:$0x3] }
 0x3bc   : > { %v6938_v7 = vmax.f32 %v6937_v6, 0.0 }
 0x3be   : > { %6939 = vst [vmem:[%s9573_s12] sm:$0x3] %v6938_v7 }
 0x3bf PF: > { %s13_s18 = sadd.s32 1, %s8446_s18   ;;  %s9872_s12 = smov %s8426_s13 }
 0x3c0   : > { %p10_p0 = scmp.ge.s32.totalorder %s13_s18, 6   ;;  %s9873_s13 = smov %s8519_s25 }
 0x3c1   : > { %s9874_s14 = smov %s8438_s16  ;;  %s9875_s15 = smov %s8442_s17 }
 0x3c2   : > { %s9876_s16 = smov %s9879_s19  ;;  %s9877_s17 = smov %s9883_s20 }
 0x3c3   :  { %12 = sbr.rel (!%p10_p0) target bundleno = 4 (0x4), region = 137 }

</bundles_post_ra>
